<compile_context>
chip_gen: v7x
topology: tpu7x:2x2x1
jax: 0.10.0
libtpu: 0.0.40
codegen_flags: <defaults>
</compile_context>

<pallas_src>
import functools
import numpy as np
import jax
import jax.numpy as jnp
from jax import lax
from jax.experimental import pallas as pl
from jax.experimental.pallas import tpu as pltpu

EPS = 1e-5      # nn.BatchNorm2d default
C_PAD = 128     # channel axis padded to one lane tile (max Cout = 64)
# (Cout, Cin, K, pad) -- static config of the PyTorch module (conv1..conv4).
CONV_CFG = ((8, 1, 5, 2), (16, 8, 5, 2), (32, 16, 3, 1), (64, 32, 3, 1))


def _round_up(x, m):
    return ((x + m - 1) // m) * m


def _vmem_limit_bytes():
    # Derive the scoped-VMEM limit from the actual chip (v5e/v6e: 128 MiB,
    # v7x: 64 MiB) with headroom, instead of hardcoding 32 MiB.
    try:
        cap = int(pltpu.get_tpu_info().vmem_capacity_bytes)
    except Exception:
        cap = 64 * 1024 * 1024
    return int(cap * 3 // 4)


# ----------------------- one-time host-side constant packing -----------------
def _unrolled_conv_pool_matrix_np(w, h, wd, k, pad, in_dim, bp):
    """Dense matrix U [in_dim, 4*bp] mapping the flat (y, x, cin) activation to
    the conv outputs at the four 2x2-pool positions; column layout
    (quadrant, py, px, cout), zero-padded to bp lanes per quadrant."""
    cout, cin = int(w.shape[0]), int(w.shape[1])
    hh, wh = h // 2, wd // 2
    msp = hh * wh
    bsz = msp * cout

    Q, PY, PX, DY, DX = np.meshgrid(np.arange(4), np.arange(hh), np.arange(wh),
                                    np.arange(k), np.arange(k), indexing="ij")
    y_in = 2 * PY + (Q // 2) + DY - pad
    x_in = 2 * PX + (Q % 2) + DX - pad
    valid = (y_in >= 0) & (y_in < h) & (x_in >= 0) & (x_in < wd)
    rows = (y_in * wd + x_in)[valid]       # input spatial index  (y, x)
    qidx = Q[valid]                        # pool quadrant
    cols = (PY * wh + PX)[valid]           # output spatial index (py, px)
    taps = (DY * k + DX)[valid]            # conv tap index       (dy, dx)

    wr = np.transpose(w, (2, 3, 1, 0)).reshape(k * k, cin, cout)  # [tap,ci,co]
    u = np.zeros((h * wd, 4, msp, cin, cout), np.float32)
    u[rows, qidx, cols] = wr[taps]         # no duplicate indices by construction
    u = np.transpose(u, (0, 3, 1, 2, 4))   # [(y,x), ci, q, (py,px), co]
    u = u.reshape(h * wd * cin, 4, bsz)
    u_full = np.zeros((in_dim, 4, bp), np.float32)
    u_full[: h * wd * cin, :, :bsz] = u
    return u_full.reshape(in_dim, 4 * bp)


def prepare_constants(params, input_size):
    """Pure NumPy, called ONCE per weight update (outside the jitted path).
    Returns (dict of device arrays, bp_list tuple of static ints)."""
    h, wd = input_size
    u_list, pm_blocks, pt_blocks, gb_rows, bp_list = [], [], [], [], []
    in_dim = h * wd * CONV_CFG[0][1]

    for (w, _b, g, beta), (cout, _cin, k, pad) in zip(params["conv"], CONV_CFG):
        w = np.asarray(w, np.float32)
        g = np.asarray(g, np.float32)
        beta = np.asarray(beta, np.float32)
        msp = (h // 2) * (wd // 2)
        bsz = msp * cout
        bp = _round_up(bsz, 128)

        u_list.append(jnp.asarray(
            _unrolled_conv_pool_matrix_np(w, h, wd, k, pad, in_dim, bp),
            dtype=jnp.bfloat16))                     # bf16 MXU operand

        # Channel indicator: lane (py,px,co) -> channel co.
        ind = np.zeros((bp, C_PAD), np.float32)
        lanes = np.arange(bsz)
        ind[lanes, lanes % cout] = 1.0
        pm_blocks.append(ind / float(msp))           # folds 1/(H*W); 1/N in-kernel
        pt_blocks.append(ind.T)                      # [C_PAD, bp] broadcast matrix

        gr = np.zeros((2, C_PAD), np.float32)
        gr[0, :cout] = g                             # gamma
        gr[1, :cout] = beta                          # beta
        gb_rows.append(gr)

        bp_list.append(bp)
        in_dim = bp
        h, wd = h // 2, wd // 2

    pm_all = np.concatenate(pm_blocks, axis=0)       # [sum(bp), 128]
    pt_all = np.concatenate(pt_blocks, axis=1)       # [128, sum(bp)]
    gb_all = np.concatenate(gb_rows, axis=0)         # [2*L, 128]

    # fc layers: PyTorch .view flattens NCHW (c,h,w); our lanes are (h,w,c).
    w1 = np.asarray(params["fc1"][0], np.float32)
    b1 = np.asarray(params["fc1"][1], np.float32)
    w2 = np.asarray(params["fc2"][0], np.float32)
    b2 = np.asarray(params["fc2"][1], np.float32)
    c_last = CONV_CFG[-1][0]
    hf, wf = h, wd
    fc1_in = c_last * hf * wf
    fc1_out = int(w1.shape[0])
    n_cls = int(w2.shape[0])
    assert fc1_out <= 128 and n_cls <= 128

    torch_idx = np.arange(fc1_in).reshape(c_last, hf, wf).transpose(1, 2, 0).reshape(-1)
    w1m = np.zeros((bp_list[-1], 128), np.float32)
    w1m[:fc1_in, :fc1_out] = w1.T[torch_idx, :]
    w2m = np.zeros((128, 128), np.float32)
    w2m[:fc1_out, :n_cls] = w2.T
    fcw = np.concatenate([w1m, w2m], axis=0)         # [bp_last + 128, 128]

    bvec = np.zeros((2, 128), np.float32)
    bvec[0, :fc1_out] = b1
    bvec[1, :] = -1e30                               # padded classes -> softmax 0
    bvec[1, :n_cls] = b2

    arrays = {
        "u": tuple(u_list),
        "pm": jnp.asarray(pm_all),
        "pt": jnp.asarray(pt_all),
        "gb": jnp.asarray(gb_all),
        "fcw": jnp.asarray(fcw),
        "bvec": jnp.asarray(bvec),
    }
    return arrays, tuple(bp_list)


# --------------------------------- kernel ------------------------------------
def _make_fused_kernel(bp_list, n_batch, fc_rows):
    n_layers = len(bp_list)
    pm_offs = []
    off = 0
    for bp in bp_list:
        pm_offs.append(off)
        off += bp
    inv_n = 1.0 / float(n_batch)

    def kernel(*refs):
        # refs = x, U_1..U_L, pm_all, pt_all, gb_all, fcw, bvec, out
        x_ref = refs[0]
        u_refs = refs[1:1 + n_layers]
        pm_ref, pt_ref, gb_ref, fcw_ref, bvec_ref = refs[1 + n_layers:1 + n_layers + 5]
        o_ref = refs[-1]

        gb = gb_ref[...]          # [2L, 128] gamma/beta table
        bvec = bvec_ref[...]      # [2, 128]  fc biases
        act = x_ref[...]          # f32 [N, in_dim]

        for l in range(n_layers):
            bp = bp_list[l]
            off = pm_offs[l]
            # conv at all four 2x2-pool positions: ONE bf16 MXU matmul.
            z = jnp.dot(act.astype(jnp.bfloat16), u_refs[l][...],
                        preferred_element_type=jnp.float32)       # [N, 4*bp]
            # 2x2 max pool = max over four 128-aligned column blocks.
            pooled = jnp.maximum(
                jnp.maximum(z[:, 0 * bp:1 * bp], z[:, 1 * bp:2 * bp]),
                jnp.maximum(z[:, 2 * bp:3 * bp], z[:, 3 * bp:4 * bp]))
            # BatchNorm2d (training mode, biased stats over N,H,W):
            # ONE matmul for sum and sum-of-squares.
            stacked = jnp.concatenate([pooled, pooled * pooled], axis=0)  # [2N,bp]
            stats = jnp.dot(stacked, pm_ref[off:off + bp, :],
                            preferred_element_type=jnp.float32) * inv_n   # [2N,128]
            mean_c = jnp.sum(stats[:n_batch], axis=0, keepdims=True)      # [1,128]
            ex2_c = jnp.sum(stats[n_batch:], axis=0, keepdims=True)       # [1,128]
            var_c = ex2_c - mean_c * mean_c
            scale_c = gb[2 * l:2 * l + 1, :] * lax.rsqrt(var_c + EPS)     # [1,128]
            shift_c = gb[2 * l + 1:2 * l + 2, :] - mean_c * scale_c       # [1,128]
            # ONE matmul to broadcast scale AND shift to the (spatial,chan) lanes.
            ssb = jnp.dot(jnp.concatenate([scale_c, shift_c], axis=0),
                          pt_ref[:, off:off + bp],
                          preferred_element_type=jnp.float32)             # [2, bp]
            act = jnp.maximum(pooled * ssb[0:1, :] + ssb[1:2, :], 0.0)    # BN+ReLU

        hidden = jnp.maximum(
            jnp.dot(act, fcw_ref[0:fc_rows, :], preferred_element_type=jnp.float32)
            + bvec[0:1, :], 0.0)                                          # fc1+ReLU
        logits = jnp.dot(hidden, fcw_ref[fc_rows:fc_rows + 128, :],
                         preferred_element_type=jnp.float32) + bvec[1:2, :]  # fc2
        # softmax over 128 lanes; padded classes carry a -1e30 bias -> exact 0.
        m = jnp.max(logits, axis=-1, keepdims=True)
        e = jnp.exp(logits - m)
        o_ref[...] = e * pl.reciprocal(jnp.sum(e, axis=-1, keepdims=True),
                                       approx=True)

    return kernel


# --------------------------------- wrapper ------------------------------------
@functools.partial(jax.jit, static_argnames=("bp_list", "input_hw", "n_cls"))
def simple_blob_forward(x_nchw, arrays, *, bp_list, input_hw, n_cls=4):
    n = x_nchw.shape[0]
    h, wd = input_hw
    # NCHW with Cin=1: row-major (y, x) flatten == the kernel's (y, x, cin) layout.
    act0 = x_nchw.astype(jnp.float32).reshape(n, h * wd)

    inputs = [act0, *arrays["u"], arrays["pm"], arrays["pt"], arrays["gb"],
              arrays["fcw"], arrays["bvec"]]
    out = pl.pallas_call(
        _make_fused_kernel(bp_list, n, bp_list[-1]),
        out_shape=jax.ShapeDtypeStruct((n, 128), jnp.float32),
        in_specs=[pl.BlockSpec(memory_space=pltpu.MemorySpace.VMEM)] * len(inputs),
        out_specs=pl.BlockSpec(memory_space=pltpu.MemorySpace.VMEM),
        compiler_params=pltpu.CompilerParams(vmem_limit_bytes=_vmem_limit_bytes()),
    )(*inputs)
    return out[:, :n_cls]


# ---------------------------- pure-JAX reference ------------------------------
def reference_forward(x_nchw, params):
    x = jnp.transpose(x_nchw, (0, 2, 3, 1)).astype(jnp.float32)
    n = x.shape[0]
    for (w, b, g, beta), (_, _, _, pad) in zip(params["conv"], CONV_CFG):
        w_hwio = jnp.transpose(w, (2, 3, 1, 0))
        y = lax.conv_general_dilated(x, w_hwio, (1, 1), [(pad, pad), (pad, pad)],
                                     dimension_numbers=("NHWC", "HWIO", "NHWC"))
        y = y + b
        y = lax.reduce_window(y, -jnp.inf, lax.max, (1, 2, 2, 1), (1, 2, 2, 1),
                              "VALID")
        mean = jnp.mean(y, axis=(0, 1, 2), keepdims=True)
        var = jnp.mean((y - mean) ** 2, axis=(0, 1, 2), keepdims=True)
        y = (y - mean) * lax.rsqrt(var + EPS) * g + beta
        x = jnp.maximum(y, 0.0)
    feat = jnp.transpose(x, (0, 3, 1, 2)).reshape(n, -1)
    w1, b1 = params["fc1"]
    w2, b2 = params["fc2"]
    h = jnp.maximum(feat @ w1.T + b1, 0.0)
    return jax.nn.softmax(h @ w2.T + b2, axis=-1)


# ----------------------------------- params -----------------------------------
def make_params(key, input_size):
    hf, wf = input_size[0] // 16, input_size[1] // 16
    fc1_in = 64 * hf * wf
    fc1_out = fc1_in // 2
    ks = list(jax.random.split(key, 16))
    conv = []
    for i, (co, ci, k, _p) in enumerate(CONV_CFG):
        w = 0.1 * jax.random.normal(ks[3 * i], (co, ci, k, k), jnp.float32)
        b = 0.1 * jax.random.normal(ks[3 * i + 1], (co,), jnp.float32)
        g = 1.0 + 0.1 * jax.random.normal(ks[3 * i + 2], (co,), jnp.float32)
        beta = 0.1 * jax.random.normal(jax.random.fold_in(ks[3 * i + 2], 7),
                                       (co,), jnp.float32)
        conv.append((w, b, g, beta))
    w1 = 0.1 * jax.random.normal(ks[12], (fc1_out, fc1_in), jnp.float32)
    b1 = 0.1 * jax.random.normal(ks[13], (fc1_out,), jnp.float32)
    w2 = 0.1 * jax.random.normal(ks[14], (4, fc1_out), jnp.float32)
    b2 = 0.1 * jax.random.normal(ks[15], (4,), jnp.float32)
    return {"conv": conv, "fc1": (w1, b1), "fc2": (w2, b2)}


# ----------------------------------- main --------------------------------------
if __name__ == "__main__":
    key = jax.random.PRNGKey(0)
    input_size = (16, 16)                  # -> 64-dim flatten, fc1: 64 -> 32
    batch = 2
    kx, kp = jax.random.split(key)
    x = jax.random.normal(kx, (batch, 1, input_size[0], input_size[1]),
                          jnp.float32)     # NCHW like the PyTorch module
    params = make_params(kp, input_size)

    # Build all kernel constants ONCE (host-side NumPy, outside the jitted path).
    arrays, bp_list = prepare_constants(params, input_size)

    out = jax.block_until_ready(
        simple_blob_forward(x, arrays, bp_list=bp_list, input_hw=input_size))
    ref = jax.block_until_ready(jax.jit(reference_forward)(x, params))

    assert out.shape == (batch, 4), out.shape
    err = float(jnp.max(jnp.abs(out - ref)))
    # Tolerance accounts for bf16 conv operands + approx reciprocal; real bugs
    # produce errors >> 0.05 on a 4-way softmax.
    if not jnp.allclose(out, ref, rtol=5e-2, atol=2e-2):
        raise AssertionError(f"mismatch vs reference, max abs err = {err}")
    print("KERNEL_OK")
</pallas_src>

<mosaic_0001>
module attributes {stable_mosaic.version = 11 : i64} {
  func.func @kernel(%arg0: memref<2x256xf32, #tpu.memory_space<vmem>>, %arg1: memref<256x2048xbf16, #tpu.memory_space<vmem>>, %arg2: memref<512x1024xbf16, #tpu.memory_space<vmem>>, %arg3: memref<256x512xbf16, #tpu.memory_space<vmem>>, %arg4: memref<128x512xbf16, #tpu.memory_space<vmem>>, %arg5: memref<1024x128xf32, #tpu.memory_space<vmem>>, %arg6: memref<128x1024xf32, #tpu.memory_space<vmem>>, %arg7: memref<8x128xf32, #tpu.memory_space<vmem>>, %arg8: memref<256x128xf32, #tpu.memory_space<vmem>>, %arg9: memref<2x128xf32, #tpu.memory_space<vmem>>, %arg10: memref<2x128xf32, #tpu.memory_space<vmem>>) attributes {dimension_semantics = [], scalar_prefetch = 0 : i64, scratch_operands = 0 : i64, tpu.core_type = #tpu.core_type<tc>} {
    %c0 = arith.constant 0 : index
    %c0_0 = arith.constant 0 : index
    %0 = vector.load %arg7[%c0, %c0_0] : memref<8x128xf32, #tpu.memory_space<vmem>>, vector<8x128xf32>
    %c0_1 = arith.constant 0 : index
    %c0_2 = arith.constant 0 : index
    %1 = vector.load %arg9[%c0_1, %c0_2] : memref<2x128xf32, #tpu.memory_space<vmem>>, vector<2x128xf32>
    %c0_3 = arith.constant 0 : index
    %c0_4 = arith.constant 0 : index
    %2 = vector.load %arg0[%c0_3, %c0_4] : memref<2x256xf32, #tpu.memory_space<vmem>>, vector<2x256xf32>
    %3 = arith.truncf %2 : vector<2x256xf32> to vector<2x256xbf16>
    %c0_5 = arith.constant 0 : index
    %c0_6 = arith.constant 0 : index
    %4 = vector.load %arg1[%c0_5, %c0_6] : memref<256x2048xbf16, #tpu.memory_space<vmem>>, vector<256x2048xbf16>
    %cst = arith.constant dense<0.000000e+00> : vector<2x2048xf32>
    %5 = tpu.matmul %3, %4, %cst {dimension_numbers = #tpu.dot_dimension_numbers<[1], [0], [0], [1], [0, 0, 1, 1], [], []>} : vector<2x256xbf16>, vector<256x2048xbf16>, vector<2x2048xf32> -> vector<2x2048xf32>
    %6 = vector.extract_strided_slice %5 {offsets = [0, 0], sizes = [2, 512], strides = [1, 1]} : vector<2x2048xf32> to vector<2x512xf32>
    %7 = vector.extract_strided_slice %5 {offsets = [0, 512], sizes = [2, 512], strides = [1, 1]} : vector<2x2048xf32> to vector<2x512xf32>
    %8 = arith.maximumf %6, %7 : vector<2x512xf32>
    %9 = vector.extract_strided_slice %5 {offsets = [0, 1024], sizes = [2, 512], strides = [1, 1]} : vector<2x2048xf32> to vector<2x512xf32>
    %10 = vector.extract_strided_slice %5 {offsets = [0, 1536], sizes = [2, 512], strides = [1, 1]} : vector<2x2048xf32> to vector<2x512xf32>
    %11 = arith.maximumf %9, %10 : vector<2x512xf32>
    %12 = arith.maximumf %8, %11 : vector<2x512xf32>
    %13 = arith.mulf %12, %12 : vector<2x512xf32>
    %14 = tpu.concatenate %12, %13 in 0 : vector<2x512xf32>, vector<2x512xf32> -> vector<4x512xf32>
    %c0_7 = arith.constant 0 : index
    %c0_8 = arith.constant 0 : index
    %15 = vector.load %arg5[%c0_7, %c0_8] : memref<1024x128xf32, #tpu.memory_space<vmem>>, vector<512x128xf32>
    %cst_9 = arith.constant dense<0.000000e+00> : vector<4x128xf32>
    %16 = tpu.matmul %14, %15, %cst_9 {dimension_numbers = #tpu.dot_dimension_numbers<[1], [0], [0], [1], [0, 0, 1, 1], [], []>} : vector<4x512xf32>, vector<512x128xf32>, vector<4x128xf32> -> vector<4x128xf32>
    %cst_10 = arith.constant 5.000000e-01 : f32
    %17 = vector.broadcast %cst_10 : f32 to vector<4x128xf32>
    %18 = arith.mulf %16, %17 : vector<4x128xf32>
    %19 = vector.extract_strided_slice %18 {offsets = [0, 0], sizes = [2, 128], strides = [1, 1]} : vector<4x128xf32> to vector<2x128xf32>
    %cst_11 = arith.constant dense<0.000000e+00> : vector<128xf32>
    %20 = vector.multi_reduction <add>, %19, %cst_11 [0] : vector<2x128xf32> to vector<128xf32>
    %21 = vector.shape_cast %20 : vector<128xf32> to vector<1x128xf32>
    %22 = vector.extract_strided_slice %18 {offsets = [2, 0], sizes = [2, 128], strides = [1, 1]} : vector<4x128xf32> to vector<2x128xf32>
    %cst_12 = arith.constant dense<0.000000e+00> : vector<128xf32>
    %23 = vector.multi_reduction <add>, %22, %cst_12 [0] : vector<2x128xf32> to vector<128xf32>
    %24 = vector.shape_cast %23 : vector<128xf32> to vector<1x128xf32>
    %25 = arith.mulf %21, %21 : vector<1x128xf32>
    %26 = arith.subf %24, %25 : vector<1x128xf32>
    %27 = vector.extract_strided_slice %0 {offsets = [0, 0], sizes = [1, 128], strides = [1, 1]} : vector<8x128xf32> to vector<1x128xf32>
    %cst_13 = arith.constant 9.99999974E-6 : f32
    %28 = vector.broadcast %cst_13 : f32 to vector<1x128xf32>
    %29 = arith.addf %26, %28 : vector<1x128xf32>
    %30 = math.rsqrt %29 : vector<1x128xf32>
    %31 = arith.mulf %27, %30 : vector<1x128xf32>
    %32 = vector.extract_strided_slice %0 {offsets = [1, 0], sizes = [1, 128], strides = [1, 1]} : vector<8x128xf32> to vector<1x128xf32>
    %33 = arith.mulf %21, %31 : vector<1x128xf32>
    %34 = arith.subf %32, %33 : vector<1x128xf32>
    %35 = tpu.concatenate %31, %34 in 0 : vector<1x128xf32>, vector<1x128xf32> -> vector<2x128xf32>
    %c0_14 = arith.constant 0 : index
    %c0_15 = arith.constant 0 : index
    %36 = vector.load %arg6[%c0_14, %c0_15] : memref<128x1024xf32, #tpu.memory_space<vmem>>, vector<128x512xf32>
    %cst_16 = arith.constant dense<0.000000e+00> : vector<2x512xf32>
    %37 = tpu.matmul %35, %36, %cst_16 {dimension_numbers = #tpu.dot_dimension_numbers<[1], [0], [0], [1], [0, 0, 1, 1], [], []>} : vector<2x128xf32>, vector<128x512xf32>, vector<2x512xf32> -> vector<2x512xf32>
    %38 = vector.extract_strided_slice %37 {offsets = [0, 0], sizes = [1, 512], strides = [1, 1]} : vector<2x512xf32> to vector<1x512xf32>
    %39 = vector.broadcast %38 : vector<1x512xf32> to vector<2x512xf32>
    %40 = arith.mulf %12, %39 : vector<2x512xf32>
    %41 = vector.extract_strided_slice %37 {offsets = [1, 0], sizes = [1, 512], strides = [1, 1]} : vector<2x512xf32> to vector<1x512xf32>
    %42 = vector.broadcast %41 : vector<1x512xf32> to vector<2x512xf32>
    %43 = arith.addf %40, %42 : vector<2x512xf32>
    %cst_17 = arith.constant 0.000000e+00 : f32
    %44 = vector.broadcast %cst_17 : f32 to vector<2x512xf32>
    %45 = arith.maximumf %43, %44 : vector<2x512xf32>
    %46 = arith.truncf %45 : vector<2x512xf32> to vector<2x512xbf16>
    %c0_18 = arith.constant 0 : index
    %c0_19 = arith.constant 0 : index
    %47 = vector.load %arg2[%c0_18, %c0_19] : memref<512x1024xbf16, #tpu.memory_space<vmem>>, vector<512x1024xbf16>
    %cst_20 = arith.constant dense<0.000000e+00> : vector<2x1024xf32>
    %48 = tpu.matmul %46, %47, %cst_20 {dimension_numbers = #tpu.dot_dimension_numbers<[1], [0], [0], [1], [0, 0, 1, 1], [], []>} : vector<2x512xbf16>, vector<512x1024xbf16>, vector<2x1024xf32> -> vector<2x1024xf32>
    %49 = vector.extract_strided_slice %48 {offsets = [0, 0], sizes = [2, 256], strides = [1, 1]} : vector<2x1024xf32> to vector<2x256xf32>
    %50 = vector.extract_strided_slice %48 {offsets = [0, 256], sizes = [2, 256], strides = [1, 1]} : vector<2x1024xf32> to vector<2x256xf32>
    %51 = arith.maximumf %49, %50 : vector<2x256xf32>
    %52 = vector.extract_strided_slice %48 {offsets = [0, 512], sizes = [2, 256], strides = [1, 1]} : vector<2x1024xf32> to vector<2x256xf32>
    %53 = vector.extract_strided_slice %48 {offsets = [0, 768], sizes = [2, 256], strides = [1, 1]} : vector<2x1024xf32> to vector<2x256xf32>
    %54 = arith.maximumf %52, %53 : vector<2x256xf32>
    %55 = arith.maximumf %51, %54 : vector<2x256xf32>
    %56 = arith.mulf %55, %55 : vector<2x256xf32>
    %57 = tpu.concatenate %55, %56 in 0 : vector<2x256xf32>, vector<2x256xf32> -> vector<4x256xf32>
    %c512 = arith.constant 512 : index
    %c0_21 = arith.constant 0 : index
    %58 = vector.load %arg5[%c512, %c0_21] : memref<1024x128xf32, #tpu.memory_space<vmem>>, vector<256x128xf32>
    %cst_22 = arith.constant dense<0.000000e+00> : vector<4x128xf32>
    %59 = tpu.matmul %57, %58, %cst_22 {dimension_numbers = #tpu.dot_dimension_numbers<[1], [0], [0], [1], [0, 0, 1, 1], [], []>} : vector<4x256xf32>, vector<256x128xf32>, vector<4x128xf32> -> vector<4x128xf32>
    %cst_23 = arith.constant 5.000000e-01 : f32
    %60 = vector.broadcast %cst_23 : f32 to vector<4x128xf32>
    %61 = arith.mulf %59, %60 : vector<4x128xf32>
    %62 = vector.extract_strided_slice %61 {offsets = [0, 0], sizes = [2, 128], strides = [1, 1]} : vector<4x128xf32> to vector<2x128xf32>
    %cst_24 = arith.constant dense<0.000000e+00> : vector<128xf32>
    %63 = vector.multi_reduction <add>, %62, %cst_24 [0] : vector<2x128xf32> to vector<128xf32>
    %64 = vector.shape_cast %63 : vector<128xf32> to vector<1x128xf32>
    %65 = vector.extract_strided_slice %61 {offsets = [2, 0], sizes = [2, 128], strides = [1, 1]} : vector<4x128xf32> to vector<2x128xf32>
    %cst_25 = arith.constant dense<0.000000e+00> : vector<128xf32>
    %66 = vector.multi_reduction <add>, %65, %cst_25 [0] : vector<2x128xf32> to vector<128xf32>
    %67 = vector.shape_cast %66 : vector<128xf32> to vector<1x128xf32>
    %68 = arith.mulf %64, %64 : vector<1x128xf32>
    %69 = arith.subf %67, %68 : vector<1x128xf32>
    %70 = vector.extract_strided_slice %0 {offsets = [2, 0], sizes = [1, 128], strides = [1, 1]} : vector<8x128xf32> to vector<1x128xf32>
    %cst_26 = arith.constant 9.99999974E-6 : f32
    %71 = vector.broadcast %cst_26 : f32 to vector<1x128xf32>
    %72 = arith.addf %69, %71 : vector<1x128xf32>
    %73 = math.rsqrt %72 : vector<1x128xf32>
    %74 = arith.mulf %70, %73 : vector<1x128xf32>
    %75 = vector.extract_strided_slice %0 {offsets = [3, 0], sizes = [1, 128], strides = [1, 1]} : vector<8x128xf32> to vector<1x128xf32>
    %76 = arith.mulf %64, %74 : vector<1x128xf32>
    %77 = arith.subf %75, %76 : vector<1x128xf32>
    %78 = tpu.concatenate %74, %77 in 0 : vector<1x128xf32>, vector<1x128xf32> -> vector<2x128xf32>
    %c0_27 = arith.constant 0 : index
    %c512_28 = arith.constant 512 : index
    %79 = vector.load %arg6[%c0_27, %c512_28] : memref<128x1024xf32, #tpu.memory_space<vmem>>, vector<128x256xf32>
    %cst_29 = arith.constant dense<0.000000e+00> : vector<2x256xf32>
    %80 = tpu.matmul %78, %79, %cst_29 {dimension_numbers = #tpu.dot_dimension_numbers<[1], [0], [0], [1], [0, 0, 1, 1], [], []>} : vector<2x128xf32>, vector<128x256xf32>, vector<2x256xf32> -> vector<2x256xf32>
    %81 = vector.extract_strided_slice %80 {offsets = [0, 0], sizes = [1, 256], strides = [1, 1]} : vector<2x256xf32> to vector<1x256xf32>
    %82 = vector.broadcast %81 : vector<1x256xf32> to vector<2x256xf32>
    %83 = arith.mulf %55, %82 : vector<2x256xf32>
    %84 = vector.extract_strided_slice %80 {offsets = [1, 0], sizes = [1, 256], strides = [1, 1]} : vector<2x256xf32> to vector<1x256xf32>
    %85 = vector.broadcast %84 : vector<1x256xf32> to vector<2x256xf32>
    %86 = arith.addf %83, %85 : vector<2x256xf32>
    %cst_30 = arith.constant 0.000000e+00 : f32
    %87 = vector.broadcast %cst_30 : f32 to vector<2x256xf32>
    %88 = arith.maximumf %86, %87 : vector<2x256xf32>
    %89 = arith.truncf %88 : vector<2x256xf32> to vector<2x256xbf16>
    %c0_31 = arith.constant 0 : index
    %c0_32 = arith.constant 0 : index
    %90 = vector.load %arg3[%c0_31, %c0_32] : memref<256x512xbf16, #tpu.memory_space<vmem>>, vector<256x512xbf16>
    %cst_33 = arith.constant dense<0.000000e+00> : vector<2x512xf32>
    %91 = tpu.matmul %89, %90, %cst_33 {dimension_numbers = #tpu.dot_dimension_numbers<[1], [0], [0], [1], [0, 0, 1, 1], [], []>} : vector<2x256xbf16>, vector<256x512xbf16>, vector<2x512xf32> -> vector<2x512xf32>
    %92 = vector.extract_strided_slice %91 {offsets = [0, 0], sizes = [2, 128], strides = [1, 1]} : vector<2x512xf32> to vector<2x128xf32>
    %93 = vector.extract_strided_slice %91 {offsets = [0, 128], sizes = [2, 128], strides = [1, 1]} : vector<2x512xf32> to vector<2x128xf32>
    %94 = arith.maximumf %92, %93 : vector<2x128xf32>
    %95 = vector.extract_strided_slice %91 {offsets = [0, 256], sizes = [2, 128], strides = [1, 1]} : vector<2x512xf32> to vector<2x128xf32>
    %96 = vector.extract_strided_slice %91 {offsets = [0, 384], sizes = [2, 128], strides = [1, 1]} : vector<2x512xf32> to vector<2x128xf32>
    %97 = arith.maximumf %95, %96 : vector<2x128xf32>
    %98 = arith.maximumf %94, %97 : vector<2x128xf32>
    %99 = arith.mulf %98, %98 : vector<2x128xf32>
    %100 = tpu.concatenate %98, %99 in 0 : vector<2x128xf32>, vector<2x128xf32> -> vector<4x128xf32>
    %c768 = arith.constant 768 : index
    %c0_34 = arith.constant 0 : index
    %101 = vector.load %arg5[%c768, %c0_34] : memref<1024x128xf32, #tpu.memory_space<vmem>>, vector<128x128xf32>
    %cst_35 = arith.constant dense<0.000000e+00> : vector<4x128xf32>
    %102 = tpu.matmul %100, %101, %cst_35 {dimension_numbers = #tpu.dot_dimension_numbers<[1], [0], [0], [1], [0, 0, 1, 1], [], []>} : vector<4x128xf32>, vector<128x128xf32>, vector<4x128xf32> -> vector<4x128xf32>
    %cst_36 = arith.constant 5.000000e-01 : f32
    %103 = vector.broadcast %cst_36 : f32 to vector<4x128xf32>
    %104 = arith.mulf %102, %103 : vector<4x128xf32>
    %105 = vector.extract_strided_slice %104 {offsets = [0, 0], sizes = [2, 128], strides = [1, 1]} : vector<4x128xf32> to vector<2x128xf32>
    %cst_37 = arith.constant dense<0.000000e+00> : vector<128xf32>
    %106 = vector.multi_reduction <add>, %105, %cst_37 [0] : vector<2x128xf32> to vector<128xf32>
    %107 = vector.shape_cast %106 : vector<128xf32> to vector<1x128xf32>
    %108 = vector.extract_strided_slice %104 {offsets = [2, 0], sizes = [2, 128], strides = [1, 1]} : vector<4x128xf32> to vector<2x128xf32>
    %cst_38 = arith.constant dense<0.000000e+00> : vector<128xf32>
    %109 = vector.multi_reduction <add>, %108, %cst_38 [0] : vector<2x128xf32> to vector<128xf32>
    %110 = vector.shape_cast %109 : vector<128xf32> to vector<1x128xf32>
    %111 = arith.mulf %107, %107 : vector<1x128xf32>
    %112 = arith.subf %110, %111 : vector<1x128xf32>
    %113 = vector.extract_strided_slice %0 {offsets = [4, 0], sizes = [1, 128], strides = [1, 1]} : vector<8x128xf32> to vector<1x128xf32>
    %cst_39 = arith.constant 9.99999974E-6 : f32
    %114 = vector.broadcast %cst_39 : f32 to vector<1x128xf32>
    %115 = arith.addf %112, %114 : vector<1x128xf32>
    %116 = math.rsqrt %115 : vector<1x128xf32>
    %117 = arith.mulf %113, %116 : vector<1x128xf32>
    %118 = vector.extract_strided_slice %0 {offsets = [5, 0], sizes = [1, 128], strides = [1, 1]} : vector<8x128xf32> to vector<1x128xf32>
    %119 = arith.mulf %107, %117 : vector<1x128xf32>
    %120 = arith.subf %118, %119 : vector<1x128xf32>
    %121 = tpu.concatenate %117, %120 in 0 : vector<1x128xf32>, vector<1x128xf32> -> vector<2x128xf32>
    %c0_40 = arith.constant 0 : index
    %c768_41 = arith.constant 768 : index
    %122 = vector.load %arg6[%c0_40, %c768_41] : memref<128x1024xf32, #tpu.memory_space<vmem>>, vector<128x128xf32>
    %cst_42 = arith.constant dense<0.000000e+00> : vector<2x128xf32>
    %123 = tpu.matmul %121, %122, %cst_42 {dimension_numbers = #tpu.dot_dimension_numbers<[1], [0], [0], [1], [0, 0, 1, 1], [], []>} : vector<2x128xf32>, vector<128x128xf32>, vector<2x128xf32> -> vector<2x128xf32>
    %124 = vector.extract_strided_slice %123 {offsets = [0, 0], sizes = [1, 128], strides = [1, 1]} : vector<2x128xf32> to vector<1x128xf32>
    %125 = vector.broadcast %124 : vector<1x128xf32> to vector<2x128xf32>
    %126 = arith.mulf %98, %125 : vector<2x128xf32>
    %127 = vector.extract_strided_slice %123 {offsets = [1, 0], sizes = [1, 128], strides = [1, 1]} : vector<2x128xf32> to vector<1x128xf32>
    %128 = vector.broadcast %127 : vector<1x128xf32> to vector<2x128xf32>
    %129 = arith.addf %126, %128 : vector<2x128xf32>
    %cst_43 = arith.constant 0.000000e+00 : f32
    %130 = vector.broadcast %cst_43 : f32 to vector<2x128xf32>
    %131 = arith.maximumf %129, %130 : vector<2x128xf32>
    %132 = arith.truncf %131 : vector<2x128xf32> to vector<2x128xbf16>
    %c0_44 = arith.constant 0 : index
    %c0_45 = arith.constant 0 : index
    %133 = vector.load %arg4[%c0_44, %c0_45] : memref<128x512xbf16, #tpu.memory_space<vmem>>, vector<128x512xbf16>
    %cst_46 = arith.constant dense<0.000000e+00> : vector<2x512xf32>
    %134 = tpu.matmul %132, %133, %cst_46 {dimension_numbers = #tpu.dot_dimension_numbers<[1], [0], [0], [1], [0, 0, 1, 1], [], []>} : vector<2x128xbf16>, vector<128x512xbf16>, vector<2x512xf32> -> vector<2x512xf32>
    %135 = vector.extract_strided_slice %134 {offsets = [0, 0], sizes = [2, 128], strides = [1, 1]} : vector<2x512xf32> to vector<2x128xf32>
    %136 = vector.extract_strided_slice %134 {offsets = [0, 128], sizes = [2, 128], strides = [1, 1]} : vector<2x512xf32> to vector<2x128xf32>
    %137 = arith.maximumf %135, %136 : vector<2x128xf32>
    %138 = vector.extract_strided_slice %134 {offsets = [0, 256], sizes = [2, 128], strides = [1, 1]} : vector<2x512xf32> to vector<2x128xf32>
    %139 = vector.extract_strided_slice %134 {offsets = [0, 384], sizes = [2, 128], strides = [1, 1]} : vector<2x512xf32> to vector<2x128xf32>
    %140 = arith.maximumf %138, %139 : vector<2x128xf32>
    %141 = arith.maximumf %137, %140 : vector<2x128xf32>
    %142 = arith.mulf %141, %141 : vector<2x128xf32>
    %143 = tpu.concatenate %141, %142 in 0 : vector<2x128xf32>, vector<2x128xf32> -> vector<4x128xf32>
    %c896 = arith.constant 896 : index
    %c0_47 = arith.constant 0 : index
    %144 = vector.load %arg5[%c896, %c0_47] : memref<1024x128xf32, #tpu.memory_space<vmem>>, vector<128x128xf32>
    %cst_48 = arith.constant dense<0.000000e+00> : vector<4x128xf32>
    %145 = tpu.matmul %143, %144, %cst_48 {dimension_numbers = #tpu.dot_dimension_numbers<[1], [0], [0], [1], [0, 0, 1, 1], [], []>} : vector<4x128xf32>, vector<128x128xf32>, vector<4x128xf32> -> vector<4x128xf32>
    %cst_49 = arith.constant 5.000000e-01 : f32
    %146 = vector.broadcast %cst_49 : f32 to vector<4x128xf32>
    %147 = arith.mulf %145, %146 : vector<4x128xf32>
    %148 = vector.extract_strided_slice %147 {offsets = [0, 0], sizes = [2, 128], strides = [1, 1]} : vector<4x128xf32> to vector<2x128xf32>
    %cst_50 = arith.constant dense<0.000000e+00> : vector<128xf32>
    %149 = vector.multi_reduction <add>, %148, %cst_50 [0] : vector<2x128xf32> to vector<128xf32>
    %150 = vector.shape_cast %149 : vector<128xf32> to vector<1x128xf32>
    %151 = vector.extract_strided_slice %147 {offsets = [2, 0], sizes = [2, 128], strides = [1, 1]} : vector<4x128xf32> to vector<2x128xf32>
    %cst_51 = arith.constant dense<0.000000e+00> : vector<128xf32>
    %152 = vector.multi_reduction <add>, %151, %cst_51 [0] : vector<2x128xf32> to vector<128xf32>
    %153 = vector.shape_cast %152 : vector<128xf32> to vector<1x128xf32>
    %154 = arith.mulf %150, %150 : vector<1x128xf32>
    %155 = arith.subf %153, %154 : vector<1x128xf32>
    %156 = vector.extract_strided_slice %0 {offsets = [6, 0], sizes = [1, 128], strides = [1, 1]} : vector<8x128xf32> to vector<1x128xf32>
    %cst_52 = arith.constant 9.99999974E-6 : f32
    %157 = vector.broadcast %cst_52 : f32 to vector<1x128xf32>
    %158 = arith.addf %155, %157 : vector<1x128xf32>
    %159 = math.rsqrt %158 : vector<1x128xf32>
    %160 = arith.mulf %156, %159 : vector<1x128xf32>
    %161 = vector.extract_strided_slice %0 {offsets = [7, 0], sizes = [1, 128], strides = [1, 1]} : vector<8x128xf32> to vector<1x128xf32>
    %162 = arith.mulf %150, %160 : vector<1x128xf32>
    %163 = arith.subf %161, %162 : vector<1x128xf32>
    %164 = tpu.concatenate %160, %163 in 0 : vector<1x128xf32>, vector<1x128xf32> -> vector<2x128xf32>
    %c0_53 = arith.constant 0 : index
    %c896_54 = arith.constant 896 : index
    %165 = vector.load %arg6[%c0_53, %c896_54] : memref<128x1024xf32, #tpu.memory_space<vmem>>, vector<128x128xf32>
    %cst_55 = arith.constant dense<0.000000e+00> : vector<2x128xf32>
    %166 = tpu.matmul %164, %165, %cst_55 {dimension_numbers = #tpu.dot_dimension_numbers<[1], [0], [0], [1], [0, 0, 1, 1], [], []>} : vector<2x128xf32>, vector<128x128xf32>, vector<2x128xf32> -> vector<2x128xf32>
    %167 = vector.extract_strided_slice %166 {offsets = [0, 0], sizes = [1, 128], strides = [1, 1]} : vector<2x128xf32> to vector<1x128xf32>
    %168 = vector.broadcast %167 : vector<1x128xf32> to vector<2x128xf32>
    %169 = arith.mulf %141, %168 : vector<2x128xf32>
    %170 = vector.extract_strided_slice %166 {offsets = [1, 0], sizes = [1, 128], strides = [1, 1]} : vector<2x128xf32> to vector<1x128xf32>
    %171 = vector.broadcast %170 : vector<1x128xf32> to vector<2x128xf32>
    %172 = arith.addf %169, %171 : vector<2x128xf32>
    %cst_56 = arith.constant 0.000000e+00 : f32
    %173 = vector.broadcast %cst_56 : f32 to vector<2x128xf32>
    %174 = arith.maximumf %172, %173 : vector<2x128xf32>
    %c0_57 = arith.constant 0 : index
    %c0_58 = arith.constant 0 : index
    %175 = vector.load %arg8[%c0_57, %c0_58] : memref<256x128xf32, #tpu.memory_space<vmem>>, vector<128x128xf32>
    %cst_59 = arith.constant dense<0.000000e+00> : vector<2x128xf32>
    %176 = tpu.matmul %174, %175, %cst_59 {dimension_numbers = #tpu.dot_dimension_numbers<[1], [0], [0], [1], [0, 0, 1, 1], [], []>} : vector<2x128xf32>, vector<128x128xf32>, vector<2x128xf32> -> vector<2x128xf32>
    %177 = vector.extract_strided_slice %1 {offsets = [0, 0], sizes = [1, 128], strides = [1, 1]} : vector<2x128xf32> to vector<1x128xf32>
    %178 = vector.broadcast %177 : vector<1x128xf32> to vector<2x128xf32>
    %179 = arith.addf %176, %178 : vector<2x128xf32>
    %cst_60 = arith.constant 0.000000e+00 : f32
    %180 = vector.broadcast %cst_60 : f32 to vector<2x128xf32>
    %181 = arith.maximumf %179, %180 : vector<2x128xf32>
    %c128 = arith.constant 128 : index
    %c0_61 = arith.constant 0 : index
    %182 = vector.load %arg8[%c128, %c0_61] : memref<256x128xf32, #tpu.memory_space<vmem>>, vector<128x128xf32>
    %cst_62 = arith.constant dense<0.000000e+00> : vector<2x128xf32>
    %183 = tpu.matmul %181, %182, %cst_62 {dimension_numbers = #tpu.dot_dimension_numbers<[1], [0], [0], [1], [0, 0, 1, 1], [], []>} : vector<2x128xf32>, vector<128x128xf32>, vector<2x128xf32> -> vector<2x128xf32>
    %184 = vector.extract_strided_slice %1 {offsets = [1, 0], sizes = [1, 128], strides = [1, 1]} : vector<2x128xf32> to vector<1x128xf32>
    %185 = vector.broadcast %184 : vector<1x128xf32> to vector<2x128xf32>
    %186 = arith.addf %183, %185 : vector<2x128xf32>
    %cst_63 = arith.constant dense<0xFF800000> : vector<2xf32>
    %187 = vector.multi_reduction <maximumf>, %186, %cst_63 [1] : vector<2x128xf32> to vector<2xf32>
    %188 = vector.shape_cast %187 : vector<2xf32> to vector<2x1xf32>
    %189 = vector.broadcast %188 : vector<2x1xf32> to vector<2x128xf32>
    %190 = arith.subf %186, %189 : vector<2x128xf32>
    %191 = math.exp %190 : vector<2x128xf32>
    %cst_64 = arith.constant dense<0.000000e+00> : vector<2xf32>
    %192 = vector.multi_reduction <add>, %191, %cst_64 [1] : vector<2x128xf32> to vector<2xf32>
    %193 = vector.shape_cast %192 : vector<2xf32> to vector<2x1xf32>
    %194 = tpu.reciprocal %193 {approx = true} : vector<2x1xf32> -> vector<2x1xf32>
    %195 = vector.broadcast %194 : vector<2x1xf32> to vector<2x128xf32>
    %196 = arith.mulf %191, %195 : vector<2x128xf32>
    %c0_65 = arith.constant 0 : index
    %c0_66 = arith.constant 0 : index
    %197 = vector.load %arg10[%c0_65, %c0_66] : memref<2x128xf32, #tpu.memory_space<vmem>>, vector<2x128xf32>
    tpu.vector_store %arg10[%c0_65, %c0_66], %196 {strides = array<i32>} : memref<2x128xf32, #tpu.memory_space<vmem>>, vector<2x128xf32>,
    return
  }
}

</mosaic_0001>

<bundles_post_ra>
// kernel: simple_blob_forward.1
= control target key start
LH: loop header
LB: loop body
LE: loop exit
PB: predicated region body
PF: predicated region fallthrough
CT: control target
= control target key end

     0   :  { %15 = vsyncpa [#allocation3], 0  ;;  %s8275_s0 = inlined_call_operand.vmem [shape: f32[2,256], index: 0, kind: input, shape index: {}]   ;;  %s8276_s1 = inlined_call_operand.hbm [shape: bf16[256,2048], index: 1, kind: input, shape index: {}]   ;;  %s8277_s2 = inlined_call_operand.hbm [shape: bf16[512,1024], index: 2, kind: input, shape index: {}]   ;;  %s8278_s3 = inlined_call_operand.hbm [shape: bf16[256,512], index: 3, kind: input, shape index: {}]   ;;  %s8279_s4 = inlined_call_operand.hbm [shape: bf16[128,512], index: 4, kind: input, shape index: {}]   ;;  %s8280_s5 = inlined_call_operand.hbm [shape: f32[1024,128], index: 5, kind: input, shape index: {}]   ;;  %s8281_s6 = inlined_call_operand.hbm [shape: f32[128,1024], index: 6, kind: input, shape index: {}]   ;;  %s8282_s7 = inlined_call_operand.vmem [shape: f32[8,128], index: 7, kind: input, shape index: {}]   ;;  %s8283_s8 = inlined_call_operand.hbm [shape: f32[256,128], index: 8, kind: input, shape index: {}]   ;;  %s8284_s9 = inlined_call_operand.vmem [shape: f32[2,128], index: 9, kind: input, shape index: {}]   ;;  %s8285_s10 = inlined_call_operand.hbm [shape: f32[2,128], index: 10, kind: output, shape index: {}]  }
   0x1   :  { %16 = vsyncpa [#allocation6], 0 }
   0x2   :  { %17 = vsyncpa [#allocation9], 0 }
   0x3   :  { %18 = vsyncpa [#allocation12], 0 }
   0x4   :  { %19 = vsyncpa [#allocation4], 0  ;;  %s7822_s13 = smov [#allocation5]   ;;  %s7636_s17 = scalar_lea.hbm %s8277_s2, 32768 }
   0x5   :  { %s39_s14 = sshll.u32 %s7822_s13, 4  ;;  %p7637_p0 = scmp.ne.s32.totalorder %s8277_s2, %s7636_s17  ;;  %s40_s14 = int_to_ptr.vmem [resolvable:$true] %s39_s14 }
   0x6   :  { %p7640_p1 = scmp.lt.u32.totalorder %s7636_s17, %s8277_s2 }
   0x8   :  { %p7642_p2 = pnand %p7640_p1, %p7637_p0 }
   0xa   :  { %7645 = shalt.err (!%p7642_p2)
}
   0xb   :  { %s7646_s22 = scalar_lea.vmem %s40_s14, 32768  ;;  %p7651_p4 = scmp.lt.s32.totalorder %s40_s14, %s40_s14 }
   0xc   :  { %p7647_p3 = scmp.ne.s32.totalorder %s40_s14, %s7646_s22  ;;  %p7652_p5 = scmp.lt.s32.totalorder %s7646_s22, %s7646_s22 }
   0xe   :  { %p7653_p6 = por %p7652_p5, %p7651_p4 }
  0x10   :  { %p7654_p7 = pnand %p7653_p6, %p7647_p3 }
  0x12   :  { %7657 = shalt.err (!%p7654_p7)
}
  0x13   :  { %s7823_s23 = smov 512   ;;  %s7824_s24 = smov 32  }
  0x14   :  { %45 = dma.hbm_to_vmem [thread:$0]  %s8277_s2, 32768, %s40_s14, [#allocation6], %s7823_s23, %s7823_s23, %s7824_s24  }
  0x15   :  { %s7825_s27 = smov [#allocation8]   ;;  %s7658_s11 = scalar_lea.hbm %s8279_s4, 4096 }
  0x16   :  { %s63_s28 = sshll.u32 %s7825_s27, 4  ;;  %p7659_p8 = scmp.ne.s32.totalorder %s8279_s4, %s7658_s11  ;;  %s64_s28 = int_to_ptr.vmem [resolvable:$true] %s63_s28 }
  0x17   :  { %p7662_p9 = scmp.lt.u32.totalorder %s7658_s11, %s8279_s4 }
  0x19   :  { %p7664_p10 = pnand %p7662_p9, %p7659_p8 }
  0x1b   :  { %7667 = shalt.err (!%p7664_p10)
}
  0x1c   :  { %s7668_s17 = scalar_lea.vmem %s64_s28, 4096  ;;  %p7673_p12 = scmp.lt.s32.totalorder %s64_s28, %s64_s28 }
  0x1d   :  { %p7669_p11 = scmp.ne.s32.totalorder %s64_s28, %s7668_s17  ;;  %p7674_p13 = scmp.lt.s32.totalorder %s7668_s17, %s7668_s17 }
  0x1f   :  { %p7675_p0 = por %p7674_p13, %p7673_p12 }
  0x21   :  { %p7676_p1 = pnand %p7675_p0, %p7669_p11 }
  0x23   :  { %7679 = shalt.err (!%p7676_p1)
}
  0x24   :  { %s7826_s2 = smov 256   ;;  %s7827_s14 = smov 16  }
  0x25   :  { %69 = dma.hbm_to_vmem [thread:$0]  %s8279_s4, 4096, %s64_s28, [#allocation9], %s7826_s2, %s7826_s2, %s7827_s14  }
  0x26   :  { %s7828_s20 = smov [#allocation11]   ;;  %s7829_s22 = smov [#allocation2]  }
  0x27   :  { %s87_s21 = sshll.u32 %s7828_s20, 4  ;;  %s27_s23 = sshll.u32 %s7829_s22, 4  ;;  %s88_s21 = int_to_ptr.vmem [resolvable:$true] %s87_s21  ;;  %s7924_s23 = int_to_ptr.vmem [resolvable:$true] %s27_s23 }
  0x28   :  { %s7680_s26 = scalar_lea.hbm %s8281_s6, 16384 }
  0x29   :  { %p7681_p2 = scmp.ne.s32.totalorder %s8281_s6, %s7680_s26  ;;  %p7684_p3 = scmp.lt.u32.totalorder %s7680_s26, %s8281_s6 }
  0x2b   :  { %p7686_p4 = pnand %p7684_p3, %p7681_p2 }
  0x2d   :  { %7689 = shalt.err (!%p7686_p4)
}
  0x2e   :  { %s7690_s4 = scalar_lea.vmem %s88_s21, 16384  ;;  %p7695_p6 = scmp.lt.s32.totalorder %s88_s21, %s88_s21 }
  0x2f   :  { %p7691_p5 = scmp.ne.s32.totalorder %s88_s21, %s7690_s4  ;;  %p7696_p7 = scmp.lt.s32.totalorder %s7690_s4, %s7690_s4 }
  0x31   :  { %p7697_p8 = por %p7696_p7, %p7695_p6 }
  0x33   :  { %p7698_p9 = pnand %p7697_p8, %p7691_p5 }
  0x35   :  { %7701 = shalt.err (!%p7698_p9)
}
  0x36   :  { %s7830_s28 = smov 1024   ;;  %s7831_s12 = smov 64  }
  0x37   :  { %93 = dma.hbm_to_vmem [thread:$0]  %s8281_s6, 16384, %s88_s21, [#allocation12], %s7830_s28, %s7830_s28, %s7831_s12  }
  0x38   :  { %s7702_s18 = scalar_lea.hbm %s8276_s1, 32768 }
  0x39   :  { %p7703_p10 = scmp.ne.s32.totalorder %s8276_s1, %s7702_s18  ;;  %p7706_p11 = scmp.lt.u32.totalorder %s7702_s18, %s8276_s1 }
  0x3b   :  { %p7708_p12 = pnand %p7706_p11, %p7703_p10 }
  0x3d   :  { %7711 = shalt.err (!%p7708_p12)
}
  0x3e   :  { %s7712_s25 = scalar_lea.vmem %s7924_s23, 32768  ;;  %p7717_p0 = scmp.lt.s32.totalorder %s7924_s23, %s7924_s23 }
  0x3f   :  { %p7713_p13 = scmp.ne.s32.totalorder %s7924_s23, %s7712_s25  ;;  %p7718_p1 = scmp.lt.s32.totalorder %s7712_s25, %s7712_s25 }
  0x41   :  { %p7719_p2 = por %p7718_p1, %p7717_p0 }
  0x43   :  { %p7720_p3 = pnand %p7719_p2, %p7713_p13 }
  0x45   :  { %7723 = shalt.err (!%p7720_p3)
}
  0x46   :  { %33 = dma.hbm_to_vmem [thread:$0]  %s8276_s1, 32768, %s7924_s23, [#allocation3], %s7830_s28, %s7830_s28, %s7831_s12  }
  0x47   :  { %s7832_s26 = smov [#allocation7]   ;;  %s7833_s29 = smov [#allocation10]  }
  0x48   :  { %s51_s27 = sshll.u32 %s7832_s26, 4  ;;  %s75_s30 = sshll.u32 %s7833_s29, 4  ;;  %s52_s27 = int_to_ptr.vmem [resolvable:$true] %s51_s27  ;;  %s7955_s30 = int_to_ptr.vmem [resolvable:$true] %s75_s30 }
  0x49   :  { %s7724_s13 = scalar_lea.hbm %s8278_s3, 8192 }
  0x4a   :  { %p7725_p4 = scmp.ne.s32.totalorder %s8278_s3, %s7724_s13  ;;  %p7728_p5 = scmp.lt.u32.totalorder %s7724_s13, %s8278_s3 }
  0x4c   :  { %p7730_p6 = pnand %p7728_p5, %p7725_p4 }
  0x4e   :  { %7733 = shalt.err (!%p7730_p6)
}
  0x4f   :  { %s7734_s1 = scalar_lea.vmem %s52_s27, 8192  ;;  %p7739_p8 = scmp.lt.s32.totalorder %s52_s27, %s52_s27 }
  0x50   :  { %p7735_p7 = scmp.ne.s32.totalorder %s52_s27, %s7734_s1  ;;  %p7740_p9 = scmp.lt.s32.totalorder %s7734_s1, %s7734_s1 }
  0x52   :  { %p7741_p10 = por %p7740_p9, %p7739_p8 }
  0x54   :  { %p7742_p11 = pnand %p7741_p10, %p7735_p7 }
  0x56   :  { %7745 = shalt.err (!%p7742_p11)
}
  0x57   :  { %57 = dma.hbm_to_vmem [thread:$0]  %s8278_s3, 8192, %s52_s27, [#allocation6], %s7826_s2, %s7826_s2, %s7827_s14  }
  0x58   :  { %s7746_s20 = scalar_lea.hbm %s8280_s5, 16384 }
  0x59   :  { %p7747_p12 = scmp.ne.s32.totalorder %s8280_s5, %s7746_s20  ;;  %p7750_p13 = scmp.lt.u32.totalorder %s7746_s20, %s8280_s5 }
  0x5b   :  { %p7752_p0 = pnand %p7750_p13, %p7747_p12 }
  0x5d   :  { %7755 = shalt.err (!%p7752_p0)
}
  0x5e   :  { %s7756_s21 = scalar_lea.vmem %s7955_s30, 16384  ;;  %p7761_p2 = scmp.lt.s32.totalorder %s7955_s30, %s7955_s30 }
  0x5f   :  { %p7757_p1 = scmp.ne.s32.totalorder %s7955_s30, %s7756_s21  ;;  %p7762_p3 = scmp.lt.s32.totalorder %s7756_s21, %s7756_s21 }
  0x61   :  { %p7763_p4 = por %p7762_p3, %p7761_p2 }
  0x63   :  { %p7764_p5 = pnand %p7763_p4, %p7757_p1 }
  0x65   :  { %7767 = shalt.err (!%p7764_p5)
}
  0x66   :  { %s7834_s3 = smov 128   ;;  %s7835_s2 = smov 8  }
  0x67   :  { %81 = dma.hbm_to_vmem [thread:$0]  %s8280_s5, 16384, %s7955_s30, [#allocation9], %s7834_s3, %s7834_s3, %s7835_s2  }
  0x68   :  { %s7836_s27 = smov [#allocation13]   ;;  %s7768_s13 = scalar_lea.hbm %s8283_s8, 4096 }
  0x69   :  { %s101_s29 = sshll.u32 %s7836_s27, 4  ;;  %p7769_p6 = scmp.ne.s32.totalorder %s8283_s8, %s7768_s13  ;;  %s102_s29 = int_to_ptr.vmem [resolvable:$true] %s101_s29 }
  0x6a   :  { %p7772_p7 = scmp.lt.u32.totalorder %s7768_s13, %s8283_s8 }
  0x6c   :  { %p7774_p8 = pnand %p7772_p7, %p7769_p6 }
  0x6e   :  { %7777 = shalt.err (!%p7774_p8)
}
  0x6f   :  { %s7778_s1 = scalar_lea.vmem %s102_s29, 4096  ;;  %p7783_p10 = scmp.lt.s32.totalorder %s102_s29, %s102_s29 }
  0x70   :  { %p7779_p9 = scmp.ne.s32.totalorder %s102_s29, %s7778_s1  ;;  %p7784_p11 = scmp.lt.s32.totalorder %s7778_s1, %s7778_s1 }
  0x72   :  { %p7785_p12 = por %p7784_p11, %p7783_p10 }
  0x74   :  { %p7786_p13 = pnand %p7785_p12, %p7779_p9 }
  0x76   :  { %7789 = shalt.err (!%p7786_p13)
}
  0x77   :  { %107 = dma.hbm_to_vmem [thread:$0]  %s8283_s8, 4096, %s102_s29, [#allocation12], %s7834_s3, %s7834_s3, %s7835_s2  }
  0x78   :  { %7812 = dma.done.wait [#allocation3], 32768  }
  0x79   :  { %7813 = vsyncadd [#allocation3], 4294934528 }
  0x7a   :  { %7814 = dma.done.wait [#allocation6], 40960  }
  0x7b   :  { %7815 = vsyncadd [#allocation6], 4294926336 }
  0x7c   :  { %7816 = dma.done.wait [#allocation9], 20480  }
  0x7d   :  { %7817 = vsyncadd [#allocation9], 4294946816 }
  0x7e   :  { %7818 = dma.done.wait [#allocation12], 20480  }
  0x7f   :  { %7819 = vsyncadd [#allocation12], 4294946816  ;;  %v148_v0 = vld [vmem:[#allocation2] sm:$0xff]  ;;  %v149_v2 = vld [vmem:[#allocation2 + $0x8] sm:$0xff]  ;;  %vm2040_vm0 = vcmask 1041408   ;;  %vm2277_vm1 = vcmask 1040384  }
  0x80   :  { %v156_v1 = vld [vmem:[#allocation2 + $0x40] sm:$0xff]  ;;  %v157_v4 = vld [vmem:[#allocation2 + $0x48] sm:$0xff]  ;;  %vm7839_vm2 = vmmov 0  }
  0x81   :  { %v6083_v3 = vcombine.high %v148_v0, %v156_v1  ;;  %v6082_v5 = vcombine.low %v148_v0, %v156_v1  ;;  %v164_v6 = vld [vmem:[#allocation2 + $0x80] sm:$0xff]  ;;  %v6085_v8 = vcombine.high %v149_v2, %v157_v4  ;;  %v6084_v9 = vcombine.low %v149_v2, %v157_v4  ;;  %v165_v11 = vld [vmem:[#allocation2 + $0x88] sm:$0xff] }
  0x82   :  { %v172_v7 = vld [vmem:[#allocation2 + $0xc0] sm:$0xff]  ;;  %v173_v12 = vld [vmem:[#allocation2 + $0xc8] sm:$0xff] }
  0x83   :  { %v6099_v10 = vcombine.high %v164_v6, %v172_v7  ;;  %v180_v13 = vld [vmem:[#allocation2 + $0x100] sm:$0xff]  ;;  %1684 = vmatprep.subr.bf16.mxu0 %v6083_v3  ;;  %v6101_v14 = vcombine.high %v165_v11, %v173_v12  ;;  %v181_v16 = vld [vmem:[#allocation2 + $0x108] sm:$0xff]  ;;  %1725 = vmatprep.subr.bf16.mxu1 %v6085_v8  ;;  %v6098_v18 = vcombine.low %v164_v6, %v172_v7 }
  0x84   :  { %v188_v15 = vld [vmem:[#allocation2 + $0x140] sm:$0xff]  ;;  %v189_v17 = vld [vmem:[#allocation2 + $0x148] sm:$0xff]  ;;  %1685 = vmatpush1.bf16.msra.mxu0 %v6082_v5  ;;  %1726 = vmatpush1.bf16.msra.mxu1 %v6084_v9  ;;  %v6100_v19 = vcombine.low %v165_v11, %v173_v12 }
  0x85   :  { %1686 = vmatprep.subr.bf16.mxu0 %v6099_v10  ;;  %v6115_v20 = vcombine.high %v180_v13, %v188_v15  ;;  %1727 = vmatprep.subr.bf16.mxu1 %v6101_v14  ;;  %v6117_v21 = vcombine.high %v181_v16, %v189_v17  ;;  %v196_v22 = vld [vmem:[#allocation2 + $0x180] sm:$0xff]  ;;  %v197_v24 = vld [vmem:[#allocation2 + $0x188] sm:$0xff]  ;;  %v6114_v26 = vcombine.low %v180_v13, %v188_v15 }
  0x86   :  { %v204_v23 = vld [vmem:[#allocation2 + $0x1c0] sm:$0xff]  ;;  %v205_v25 = vld [vmem:[#allocation2 + $0x1c8] sm:$0xff]  ;;  %v6116_v27 = vcombine.low %v181_v16, %v189_v17 }
  0x87   :  { %v6131_v28 = vcombine.high %v196_v22, %v204_v23  ;;  %v6133_v29 = vcombine.high %v197_v24, %v205_v25  ;;  %v212_v30 = vld [vmem:[#allocation2 + $0x200] sm:$0xff]  ;;  %v213_v32 = vld [vmem:[#allocation2 + $0x208] sm:$0xff]  ;;  %v6130_v34 = vcombine.low %v196_v22, %v204_v23  ;;  %v6132_v35 = vcombine.low %v197_v24, %v205_v25 }
  0x88   :  { %1687 = vmatpush1.bf16.msra.mxu0 %v6098_v18  ;;  %1728 = vmatpush1.bf16.msra.mxu1 %v6100_v19  ;;  %v220_v31 = vld [vmem:[#allocation2 + $0x240] sm:$0xff]  ;;  %v221_v33 = vld [vmem:[#allocation2 + $0x248] sm:$0xff] }
  0x89   :  { %1688 = vmatprep.subr.bf16.mxu0 %v6115_v20  ;;  %1729 = vmatprep.subr.bf16.mxu1 %v6117_v21  ;;  %v6147_v36 = vcombine.high %v212_v30, %v220_v31  ;;  %v6149_v37 = vcombine.high %v213_v32, %v221_v33  ;;  %v228_v38 = vld [vmem:[#allocation2 + $0x280] sm:$0xff]  ;;  %v229_v40 = vld [vmem:[#allocation2 + $0x288] sm:$0xff]  ;;  %v6146_v42 = vcombine.low %v212_v30, %v220_v31 }
  0x8a   :  { %v236_v39 = vld [vmem:[#allocation2 + $0x2c0] sm:$0xff]  ;;  %v237_v41 = vld [vmem:[#allocation2 + $0x2c8] sm:$0xff]  ;;  %v6148_v43 = vcombine.low %v213_v32, %v221_v33 }
  0x8b   :  { %v6163_v44 = vcombine.high %v228_v38, %v236_v39  ;;  %v6165_v45 = vcombine.high %v229_v40, %v237_v41  ;;  %v244_v46 = vld [vmem:[#allocation2 + $0x300] sm:$0xff]  ;;  %v245_v48 = vld [vmem:[#allocation2 + $0x308] sm:$0xff]  ;;  %v6162_v50 = vcombine.low %v228_v38, %v236_v39  ;;  %v6164_v51 = vcombine.low %v229_v40, %v237_v41 }
  0x8c   :  { %1689 = vmatpush1.bf16.msra.mxu0 %v6114_v26  ;;  %1730 = vmatpush1.bf16.msra.mxu1 %v6116_v27  ;;  %v252_v47 = vld [vmem:[#allocation2 + $0x340] sm:$0xff]  ;;  %v253_v49 = vld [vmem:[#allocation2 + $0x348] sm:$0xff] }
  0x8d   :  { %1690 = vmatprep.subr.bf16.mxu0 %v6131_v28  ;;  %1731 = vmatprep.subr.bf16.mxu1 %v6133_v29  ;;  %v6179_v52 = vcombine.high %v244_v46, %v252_v47  ;;  %v8004_v53 = vld.sshfl [vmem:[%s8275_s0] sm:$0x33 pattern:$0x76325410]  ;;  %v6181_v54 = vcombine.high %v245_v48, %v253_v49  ;;  %v261_v58 = vld [vmem:[#allocation2 + $0x388] sm:$0xff]  ;;  %v6178_v60 = vcombine.low %v244_v46, %v252_v47 }
  0x8e   :  { %v260_v55 = vld [vmem:[#allocation2 + $0x380] sm:$0xff]  ;;  %v143_v57 = vcombine.high %v8004_v53, %v8004_v53  ;;  %v269_v59 = vld [vmem:[#allocation2 + $0x3c8] sm:$0xff]  ;;  %v6180_v62 = vcombine.low %v245_v48, %v253_v49 }
  0x8f   :  { %v268_v56 = vld [vmem:[#allocation2 + $0x3c0] sm:$0xff]  ;;  %v6197_v0 = vcombine.high %v261_v58, %v269_v59  ;;  %v277_v3 = vld [vmem:[#allocation2 + $0x408] sm:$0xff]  ;;  %v6196_v6 = vcombine.low %v261_v58, %v269_v59 }
  0x90   :  { %1691 = vmatpush1.bf16.msra.mxu0 %v6130_v34  ;;  %1732 = vmatpush1.bf16.msra.mxu1 %v6132_v35  ;;  %v8008_v61 = vpack.c.bf16 %v143_v57, %v143_v57  ;;  %v6195_v63 = vcombine.high %v260_v55, %v268_v56  ;;  %v276_v1 = vld [vmem:[#allocation2 + $0x400] sm:$0xff]  ;;  %v285_v4 = vld [vmem:[#allocation2 + $0x448] sm:$0xff]  ;;  %v6194_v5 = vcombine.low %v260_v55, %v268_v56 }
  0x91   :  { %1692 = vmatprep.subr.bf16.mxu0 %v6147_v36  ;;  %1733 = vmatprep.subr.bf16.mxu1 %v6149_v37  ;;  %v284_v2 = vld [vmem:[#allocation2 + $0x440] sm:$0xff]  ;;  %v6213_v8 = vcombine.high %v277_v3, %v285_v4  ;;  %v293_v11 = vld [vmem:[#allocation2 + $0x488] sm:$0xff]  ;;  %v6212_v14 = vcombine.low %v277_v3, %v285_v4  ;;  %v150_v3 = vld [vmem:[#allocation2 + $0x10] sm:$0xff] }
  0x92   :  { %1716 = vmatprep.mubr.bf16.mxu0 %v8008_v61  ;;  %1757 = vmatprep.mubr.bf16.mxu1 %v8008_v61  ;;  %v6211_v7 = vcombine.high %v276_v1, %v284_v2  ;;  %v292_v9 = vld [vmem:[#allocation2 + $0x480] sm:$0xff]  ;;  %v301_v12 = vld [vmem:[#allocation2 + $0x4c8] sm:$0xff]  ;;  %v6210_v13 = vcombine.low %v276_v1, %v284_v2  ;;  %v158_v4 = vld [vmem:[#allocation2 + $0x50] sm:$0xff] }
  0x93   :  { %v300_v10 = vld [vmem:[#allocation2 + $0x4c0] sm:$0xff]  ;;  %v6229_v16 = vcombine.high %v293_v11, %v301_v12  ;;  %v309_v19 = vld [vmem:[#allocation2 + $0x508] sm:$0xff]  ;;  %v6228_v22 = vcombine.low %v293_v11, %v301_v12  ;;  %v166_v11 = vld [vmem:[#allocation2 + $0x90] sm:$0xff] }
  0x94   :  { %1693 = vmatpush1.bf16.msra.mxu0 %v6146_v42  ;;  %1734 = vmatpush1.bf16.msra.mxu1 %v6148_v43  ;;  %v6227_v15 = vcombine.high %v292_v9, %v300_v10  ;;  %v308_v17 = vld [vmem:[#allocation2 + $0x500] sm:$0xff]  ;;  %v317_v20 = vld [vmem:[#allocation2 + $0x548] sm:$0xff]  ;;  %v6226_v21 = vcombine.low %v292_v9, %v300_v10  ;;  %v6087_v9 = vcombine.high %v150_v3, %v158_v4  ;;  %v174_v12 = vld [vmem:[#allocation2 + $0xd0] sm:$0xff] }
  0x95   :  { %1694 = vmatprep.subr.bf16.mxu0 %v6163_v44  ;;  %1735 = vmatprep.subr.bf16.mxu1 %v6165_v45  ;;  %v316_v18 = vld [vmem:[#allocation2 + $0x540] sm:$0xff]  ;;  %v6245_v24 = vcombine.high %v309_v19, %v317_v20  ;;  %v325_v27 = vld [vmem:[#allocation2 + $0x588] sm:$0xff]  ;;  %v6244_v30 = vcombine.low %v309_v19, %v317_v20  ;;  %v182_v19 = vld [vmem:[#allocation2 + $0x110] sm:$0xff] }
  0x96   :  { %v6243_v23 = vcombine.high %v308_v17, %v316_v18  ;;  %v324_v25 = vld [vmem:[#allocation2 + $0x580] sm:$0xff]  ;;  %v333_v28 = vld [vmem:[#allocation2 + $0x5c8] sm:$0xff]  ;;  %v6242_v29 = vcombine.low %v308_v17, %v316_v18  ;;  %v6103_v18 = vcombine.high %v166_v11, %v174_v12  ;;  %v190_v20 = vld [vmem:[#allocation2 + $0x150] sm:$0xff] }
  0x97   :  { %v332_v26 = vld [vmem:[#allocation2 + $0x5c0] sm:$0xff]  ;;  %v6261_v32 = vcombine.high %v325_v27, %v333_v28  ;;  %v341_v35 = vld [vmem:[#allocation2 + $0x608] sm:$0xff]  ;;  %v6260_v38 = vcombine.low %v325_v27, %v333_v28  ;;  %v206_v27 = vld [vmem:[#allocation2 + $0x1d0] sm:$0xff] }
  0x98   :  { %1695 = vmatpush1.bf16.msra.mxu0 %v6162_v50  ;;  %1736 = vmatpush1.bf16.msra.mxu1 %v6164_v51  ;;  %v6259_v31 = vcombine.high %v324_v25, %v332_v26  ;;  %v340_v33 = vld [vmem:[#allocation2 + $0x600] sm:$0xff]  ;;  %v349_v36 = vld [vmem:[#allocation2 + $0x648] sm:$0xff]  ;;  %v6258_v37 = vcombine.low %v324_v25, %v332_v26  ;;  %v6119_v25 = vcombine.high %v182_v19, %v190_v20  ;;  %v198_v26 = vld [vmem:[#allocation2 + $0x190] sm:$0xff] }
  0x99   :  { %1696 = vmatprep.subr.bf16.mxu0 %v6179_v52  ;;  %1737 = vmatprep.subr.bf16.mxu1 %v6181_v54  ;;  %v348_v34 = vld [vmem:[#allocation2 + $0x640] sm:$0xff]  ;;  %v6277_v40 = vcombine.high %v341_v35, %v349_v36  ;;  %v357_v43 = vld [vmem:[#allocation2 + $0x688] sm:$0xff]  ;;  %v6276_v46 = vcombine.low %v341_v35, %v349_v36  ;;  %v199_v28 = vld [vmem:[#allocation2 + $0x198] sm:$0xff] }
  0x9a   :  { %v6275_v39 = vcombine.high %v340_v33, %v348_v34  ;;  %v356_v41 = vld [vmem:[#allocation2 + $0x680] sm:$0xff]  ;;  %v365_v44 = vld [vmem:[#allocation2 + $0x6c8] sm:$0xff]  ;;  %v6274_v45 = vcombine.low %v340_v33, %v348_v34  ;;  %v6135_v33 = vcombine.high %v198_v26, %v206_v27  ;;  %v214_v34 = vld [vmem:[#allocation2 + $0x210] sm:$0xff] }
  0x9b   :  { %v364_v42 = vld [vmem:[#allocation2 + $0x6c0] sm:$0xff]  ;;  %v6293_v48 = vcombine.high %v357_v43, %v365_v44  ;;  %v373_v51 = vld [vmem:[#allocation2 + $0x708] sm:$0xff]  ;;  %v6292_v55 = vcombine.low %v357_v43, %v365_v44  ;;  %v222_v35 = vld [vmem:[#allocation2 + $0x250] sm:$0xff] }
  0x9c   :  { %1697 = vmatpush1.bf16.msra.mxu0 %v6178_v60  ;;  %1738 = vmatpush1.bf16.msra.mxu1 %v6180_v62  ;;  %v6291_v47 = vcombine.high %v356_v41, %v364_v42  ;;  %v372_v49 = vld [vmem:[#allocation2 + $0x700] sm:$0xff]  ;;  %v381_v52 = vld [vmem:[#allocation2 + $0x748] sm:$0xff]  ;;  %v6290_v54 = vcombine.low %v356_v41, %v364_v42  ;;  %v215_v36 = vld [vmem:[#allocation2 + $0x218] sm:$0xff]  ;;  %v6151_v41 = vcombine.high %v214_v34, %v222_v35 }
  0x9d   :  { %1698 = vmatprep.subr.bf16.mxu0 %v6195_v63  ;;  %1739 = vmatprep.subr.bf16.mxu1 %v6197_v0  ;;  %v380_v50 = vld [vmem:[#allocation2 + $0x740] sm:$0xff]  ;;  %v6309_v57 = vcombine.high %v373_v51, %v381_v52  ;;  %v389_v60 = vld [vmem:[#allocation2 + $0x788] sm:$0xff]  ;;  %v6308_v0 = vcombine.low %v373_v51, %v381_v52  ;;  %v230_v42 = vld [vmem:[#allocation2 + $0x290] sm:$0xff] }
  0x9e   :  { %v6307_v56 = vcombine.high %v372_v49, %v380_v50  ;;  %v388_v58 = vld [vmem:[#allocation2 + $0x780] sm:$0xff]  ;;  %v397_v62 = vld [vmem:[#allocation2 + $0x7c8] sm:$0xff]  ;;  %v6306_v63 = vcombine.low %v372_v49, %v380_v50  ;;  %v238_v43 = vld [vmem:[#allocation2 + $0x2d0] sm:$0xff] }
  0x9f   :  { %v396_v59 = vld [vmem:[#allocation2 + $0x7c0] sm:$0xff]  ;;  %v6325_v2 = vcombine.high %v389_v60, %v397_v62  ;;  %v231_v44 = vld [vmem:[#allocation2 + $0x298] sm:$0xff]  ;;  %v6167_v49 = vcombine.high %v230_v42, %v238_v43  ;;  %v246_v50 = vld [vmem:[#allocation2 + $0x310] sm:$0xff] }
  0xa0   :  { %1699 = vmatpush1.bf16.msra.mxu0 %v6194_v5  ;;  %1740 = vmatpush1.bf16.msra.mxu1 %v6196_v6  ;;  %v6323_v1 = vcombine.high %v388_v58, %v396_v59  ;;  %v151_v5 = vld [vmem:[#allocation2 + $0x18] sm:$0xff]  ;;  %v254_v51 = vld [vmem:[#allocation2 + $0x350] sm:$0xff] }
  0xa1   :  { %1700 = vmatprep.subr.bf16.mxu0 %v6211_v7  ;;  %1741 = vmatprep.subr.bf16.mxu1 %v6213_v8  ;;  %v159_v6 = vld [vmem:[#allocation2 + $0x58] sm:$0xff]  ;;  %v6322_v7 = vcombine.low %v388_v58, %v396_v59  ;;  %v6324_v8 = vcombine.low %v389_v60, %v397_v62  ;;  %v6183_v58 = vcombine.high %v246_v50, %v254_v51  ;;  %v262_v59 = vld [vmem:[#allocation2 + $0x390] sm:$0xff] }
  0xa2   :  { %v6089_v10 = vcombine.high %v151_v5, %v159_v6  ;;  %v6088_v17 = vcombine.low %v151_v5, %v159_v6  ;;  %v247_v52 = vld [vmem:[#allocation2 + $0x318] sm:$0xff]  ;;  %v270_v60 = vld [vmem:[#allocation2 + $0x3d0] sm:$0xff] }
  0xa3   :  { %v263_v62 = vld [vmem:[#allocation2 + $0x398] sm:$0xff]  ;;  %v286_v5 = vld [vmem:[#allocation2 + $0x450] sm:$0xff] }
  0xa4   :  { %1701 = vmatpush1.bf16.msra.mxu0 %v6210_v13  ;;  %1742 = vmatpush1.bf16.msra.mxu1 %v6212_v14  ;;  %v8014_v13 = vpack.c.bf16 %v8004_v53, %v8004_v53  ;;  %v167_v14 = vld [vmem:[#allocation2 + $0x98] sm:$0xff]  ;;  %v6102_v53 = vcombine.low %v166_v11, %v174_v12  ;;  %v294_v12 = vld [vmem:[#allocation2 + $0x490] sm:$0xff] }
  0xa5   :  { %1702 = vmatprep.subr.bf16.mxu0 %v6227_v15  ;;  %1743 = vmatprep.subr.bf16.mxu1 %v6229_v16  ;;  %v175_v15 = vld [vmem:[#allocation2 + $0xd8] sm:$0xff]  ;;  %v6086_v16 = vcombine.low %v150_v3, %v158_v4  ;;  %v6199_v3 = vcombine.high %v262_v59, %v270_v60  ;;  %v278_v4 = vld [vmem:[#allocation2 + $0x410] sm:$0xff] }
  0xa6   :  { %v279_v6 = vld [vmem:[#allocation2 + $0x418] sm:$0xff]  ;;  %v6215_v11 = vcombine.high %v278_v4, %v286_v5 }
  0xa8   :  { %1703 = vmatpush1.bf16.msra.mxu0 %v6226_v21  ;;  %1744 = vmatpush1.bf16.msra.mxu1 %v6228_v22  ;;  %v183_v21 = vld [vmem:[#allocation2 + $0x118] sm:$0xff]  ;;  %v6105_v22 = vcombine.high %v167_v14, %v175_v15 }
  0xa9   :  { %1704 = vmatprep.subr.bf16.mxu0 %v6243_v23  ;;  %1745 = vmatprep.subr.bf16.mxu1 %v6245_v24  ;;  %v191_v23 = vld [vmem:[#allocation2 + $0x158] sm:$0xff]  ;;  %v6104_v24 = vcombine.low %v167_v14, %v175_v15  ;;  %v302_v14 = vld [vmem:[#allocation2 + $0x4d0] sm:$0xff] }
  0xaa   :  { %v295_v15 = vld [vmem:[#allocation2 + $0x498] sm:$0xff] }
  0xac   :  { %1705 = vmatpush1.bf16.msra.mxu0 %v6242_v29  ;;  %1746 = vmatpush1.bf16.msra.mxu1 %v6244_v30  ;;  %v6121_v29 = vcombine.high %v183_v21, %v191_v23  ;;  %v207_v30 = vld [vmem:[#allocation2 + $0x1d8] sm:$0xff] }
  0xad   :  { %1706 = vmatprep.subr.bf16.mxu0 %v6259_v31  ;;  %1747 = vmatprep.subr.bf16.mxu1 %v6261_v32  ;;  %v6118_v31 = vcombine.low %v182_v19, %v190_v20  ;;  %v6120_v32 = vcombine.low %v183_v21, %v191_v23  ;;  %v6231_v20 = vcombine.high %v294_v12, %v302_v14  ;;  %v310_v21 = vld [vmem:[#allocation2 + $0x510] sm:$0xff]  ;;  %v311_v23 = vld [vmem:[#allocation2 + $0x518] sm:$0xff] }
  0xb0   :  { %1707 = vmatpush1.bf16.msra.mxu0 %v6258_v37  ;;  %1748 = vmatpush1.bf16.msra.mxu1 %v6260_v38  ;;  %v6137_v37 = vcombine.high %v199_v28, %v207_v30  ;;  %v223_v38 = vld [vmem:[#allocation2 + $0x258] sm:$0xff] }
  0xb1   :  { %1708 = vmatprep.subr.bf16.mxu0 %v6275_v39  ;;  %1749 = vmatprep.subr.bf16.mxu1 %v6277_v40  ;;  %v6134_v39 = vcombine.low %v198_v26, %v206_v27  ;;  %v6136_v40 = vcombine.low %v199_v28, %v207_v30  ;;  %v326_v28 = vld [vmem:[#allocation2 + $0x590] sm:$0xff]  ;;  %v327_v30 = vld [vmem:[#allocation2 + $0x598] sm:$0xff] }
  0xb4   :  { %1709 = vmatpush1.bf16.msra.mxu0 %v6274_v45  ;;  %1750 = vmatpush1.bf16.msra.mxu1 %v6276_v46  ;;  %v6153_v45 = vcombine.high %v215_v36, %v223_v38  ;;  %v239_v46 = vld [vmem:[#allocation2 + $0x2d8] sm:$0xff] }
  0xb5   :  { %1710 = vmatprep.subr.bf16.mxu0 %v6291_v47  ;;  %1751 = vmatprep.subr.bf16.mxu1 %v6293_v48  ;;  %v6150_v47 = vcombine.low %v214_v34, %v222_v35  ;;  %v6152_v48 = vcombine.low %v215_v36, %v223_v38  ;;  %v342_v36 = vld [vmem:[#allocation2 + $0x610] sm:$0xff]  ;;  %v343_v38 = vld [vmem:[#allocation2 + $0x618] sm:$0xff] }
  0xb8   :  { %1711 = vmatpush1.bf16.msra.mxu0 %v6290_v54  ;;  %1752 = vmatpush1.bf16.msra.mxu1 %v6292_v55  ;;  %v6169_v54 = vcombine.high %v231_v44, %v239_v46  ;;  %v255_v55 = vld [vmem:[#allocation2 + $0x358] sm:$0xff] }
  0xb9   :  { %1712 = vmatprep.subr.bf16.mxu0 %v6307_v56  ;;  %1753 = vmatprep.subr.bf16.mxu1 %v6309_v57  ;;  %v6166_v56 = vcombine.low %v230_v42, %v238_v43  ;;  %v6168_v57 = vcombine.low %v231_v44, %v239_v46  ;;  %v358_v44 = vld [vmem:[#allocation2 + $0x690] sm:$0xff]  ;;  %v359_v46 = vld [vmem:[#allocation2 + $0x698] sm:$0xff] }
  0xbc   :  { %1713 = vmatpush1.bf16.msra.mxu0 %v6306_v63  ;;  %1754 = vmatpush1.bf16.msra.mxu1 %v6308_v0  ;;  %v6185_v63 = vcombine.high %v247_v52, %v255_v55  ;;  %v271_v0 = vld [vmem:[#allocation2 + $0x3d8] sm:$0xff] }
  0xbd   :  { %1714 = vmatprep.subr.bf16.mxu0 %v6323_v1  ;;  %1755 = vmatprep.subr.bf16.mxu1 %v6325_v2  ;;  %v6182_v1 = vcombine.low %v246_v50, %v254_v51  ;;  %v6184_v2 = vcombine.low %v247_v52, %v255_v55  ;;  %v382_v55 = vld [vmem:[#allocation2 + $0x750] sm:$0xff] }
  0xc0   :  { %1715 = vmatpush1.bf16.msra.mxu0 %v6322_v7  ;;  %1756 = vmatpush1.bf16.msra.mxu1 %v6324_v8  ;;  %v6201_v7 = vcombine.high %v263_v62, %v271_v0  ;;  %v287_v8 = vld [vmem:[#allocation2 + $0x458] sm:$0xff] }
  0xc1   :  { %1766 = vmatprep.subr.bf16.mxu0 %v6087_v9  ;;  %1807 = vmatprep.subr.bf16.mxu1 %v6089_v10  ;;  %v6198_v9 = vcombine.low %v262_v59, %v270_v60  ;;  %v6200_v10 = vcombine.low %v263_v62, %v271_v0  ;;  %v6216_v19 = vcombine.low %v279_v6, %v287_v8  ;;  %v398_v0 = vld [vmem:[#allocation2 + $0x7d0] sm:$0xff] }
  0xc3   :  { %1717 = vmatmul.mubr.bf16.vlgmr.msra.gmra.mrb[0].mxu0 %v8014_v13  ;;  %1758 = vmatmul.mubr.bf16.vlgmr.msra.gmra.mrb[0].mxu1 %v8014_v13 }
  0xc4   :  { %1767 = vmatpush1.bf16.msra.mxu0 %v6086_v16  ;;  %1808 = vmatpush1.bf16.msra.mxu1 %v6088_v17  ;;  %v6217_v16 = vcombine.high %v279_v6, %v287_v8  ;;  %v303_v17 = vld [vmem:[#allocation2 + $0x4d8] sm:$0xff]  ;;  %v160_v8 = vld [vmem:[#allocation2 + $0x60] sm:$0xff] }
  0xc5   :  { %1768 = vmatprep.subr.bf16.mxu0 %v6103_v18  ;;  %1809 = vmatprep.subr.bf16.mxu1 %v6105_v22  ;;  %v6214_v18 = vcombine.low %v278_v4, %v286_v5  ;;  %v318_v22 = vld [vmem:[#allocation2 + $0x550] sm:$0xff]  ;;  %v6232_v26 = vcombine.low %v295_v15, %v303_v17 }
  0xc6   :  { %1798 = vmatprep.mubr.bf16.mxu0 %v8008_v61  ;;  %1839 = vmatprep.mubr.bf16.mxu1 %v8008_v61  ;;  %v6247_v27 = vcombine.high %v310_v21, %v318_v22 }
  0xc8   :  { %1769 = vmatpush1.bf16.msra.mxu0 %v6102_v53  ;;  %1810 = vmatpush1.bf16.msra.mxu1 %v6104_v24  ;;  %v6233_v53 = vcombine.high %v295_v15, %v303_v17  ;;  %v319_v24 = vld [vmem:[#allocation2 + $0x558] sm:$0xff]  ;;  %v176_v17 = vld [vmem:[#allocation2 + $0xe0] sm:$0xff] }
  0xc9   :  { %1770 = vmatprep.subr.bf16.mxu0 %v6119_v25  ;;  %1811 = vmatprep.subr.bf16.mxu1 %v6121_v29  ;;  %v6230_v25 = vcombine.low %v294_v12, %v302_v14  ;;  %v334_v29 = vld [vmem:[#allocation2 + $0x5d0] sm:$0xff]  ;;  %v6248_v34 = vcombine.low %v311_v23, %v319_v24 }
  0xca   :  { %v6263_v35 = vcombine.high %v326_v28, %v334_v29 }
  0xcc   :  { %1771 = vmatpush1.bf16.msra.mxu0 %v6118_v31  ;;  %1812 = vmatpush1.bf16.msra.mxu1 %v6120_v32  ;;  %v6249_v31 = vcombine.high %v311_v23, %v319_v24  ;;  %v335_v32 = vld [vmem:[#allocation2 + $0x5d8] sm:$0xff]  ;;  %v192_v24 = vld [vmem:[#allocation2 + $0x160] sm:$0xff] }
  0xcd   :  { %1772 = vmatprep.subr.bf16.mxu0 %v6135_v33  ;;  %1813 = vmatprep.subr.bf16.mxu1 %v6137_v37  ;;  %v6246_v33 = vcombine.low %v310_v21, %v318_v22  ;;  %v350_v37 = vld [vmem:[#allocation2 + $0x650] sm:$0xff]  ;;  %v6264_v42 = vcombine.low %v327_v30, %v335_v32 }
  0xce   :  { %v6279_v43 = vcombine.high %v342_v36, %v350_v37 }
  0xd0   :  { %1773 = vmatpush1.bf16.msra.mxu0 %v6134_v39  ;;  %1814 = vmatpush1.bf16.msra.mxu1 %v6136_v40  ;;  %v6265_v39 = vcombine.high %v327_v30, %v335_v32  ;;  %v351_v40 = vld [vmem:[#allocation2 + $0x658] sm:$0xff]  ;;  %v208_v32 = vld [vmem:[#allocation2 + $0x1e0] sm:$0xff] }
  0xd1   :  { %1774 = vmatprep.subr.bf16.mxu0 %v6151_v41  ;;  %1815 = vmatprep.subr.bf16.mxu1 %v6153_v45  ;;  %v6262_v41 = vcombine.low %v326_v28, %v334_v29  ;;  %v366_v45 = vld [vmem:[#allocation2 + $0x6d0] sm:$0xff]  ;;  %v6280_v50 = vcombine.low %v343_v38, %v351_v40 }
  0xd2   :  { %v6295_v51 = vcombine.high %v358_v44, %v366_v45 }
  0xd4   :  { %1775 = vmatpush1.bf16.msra.mxu0 %v6150_v47  ;;  %1816 = vmatpush1.bf16.msra.mxu1 %v6152_v48  ;;  %v6281_v47 = vcombine.high %v343_v38, %v351_v40  ;;  %v367_v48 = vld [vmem:[#allocation2 + $0x6d8] sm:$0xff]  ;;  %v224_v40 = vld [vmem:[#allocation2 + $0x260] sm:$0xff] }
  0xd5   :  { %1776 = vmatprep.subr.bf16.mxu0 %v6167_v49  ;;  %1817 = vmatprep.subr.bf16.mxu1 %v6169_v54  ;;  %v6278_v49 = vcombine.low %v342_v36, %v350_v37  ;;  %v6297_v52 = vcombine.high %v359_v46, %v367_v48  ;;  %v374_v54 = vld [vmem:[#allocation2 + $0x710] sm:$0xff]  ;;  %v6296_v59 = vcombine.low %v359_v46, %v367_v48  ;;  %v240_v48 = vld [vmem:[#allocation2 + $0x2e0] sm:$0xff] }
  0xd6   :  { %v6311_v60 = vcombine.high %v374_v54, %v382_v55 }
  0xd8   :  { %1777 = vmatpush1.bf16.msra.mxu0 %v6166_v56  ;;  %1818 = vmatpush1.bf16.msra.mxu1 %v6168_v57  ;;  %v375_v56 = vld [vmem:[#allocation2 + $0x718] sm:$0xff] }
  0xd9   :  { %1778 = vmatprep.subr.bf16.mxu0 %v6183_v58  ;;  %1819 = vmatprep.subr.bf16.mxu1 %v6185_v63  ;;  %v383_v57 = vld [vmem:[#allocation2 + $0x758] sm:$0xff]  ;;  %v6294_v58 = vcombine.low %v358_v44, %v366_v45  ;;  %v390_v63 = vld [vmem:[#allocation2 + $0x790] sm:$0xff] }
  0xda   :  { %v6313_v62 = vcombine.high %v375_v56, %v383_v57  ;;  %v6312_v4 = vcombine.low %v375_v56, %v383_v57  ;;  %v6327_v5 = vcombine.high %v390_v63, %v398_v0  ;;  %v248_v56 = vld [vmem:[#allocation2 + $0x320] sm:$0xff] }
  0xdb   :  { %v256_v57 = vld [vmem:[#allocation2 + $0x360] sm:$0xff] }
  0xdc   :  { %1779 = vmatpush1.bf16.msra.mxu0 %v6182_v1  ;;  %1820 = vmatpush1.bf16.msra.mxu1 %v6184_v2  ;;  %v391_v1 = vld [vmem:[#allocation2 + $0x798] sm:$0xff] }
  0xdd   :  { %1780 = vmatprep.subr.bf16.mxu0 %v6199_v3  ;;  %1821 = vmatprep.subr.bf16.mxu1 %v6201_v7  ;;  %v399_v2 = vld [vmem:[#allocation2 + $0x7d8] sm:$0xff]  ;;  %v6310_v3 = vcombine.low %v374_v54, %v382_v55  ;;  %v152_v7 = vld [vmem:[#allocation2 + $0x20] sm:$0xff] }
  0xde   :  { %v6329_v6 = vcombine.high %v391_v1, %v399_v2  ;;  %v6328_v12 = vcombine.low %v391_v1, %v399_v2  ;;  %v6091_v14 = vcombine.high %v152_v7, %v160_v8  ;;  %v264_v1 = vld [vmem:[#allocation2 + $0x3a0] sm:$0xff] }
  0xdf   :  { %v272_v2 = vld [vmem:[#allocation2 + $0x3e0] sm:$0xff] }
  0xe0   :  { %1781 = vmatpush1.bf16.msra.mxu0 %v6198_v9  ;;  %1822 = vmatpush1.bf16.msra.mxu1 %v6200_v10  ;;  %v153_v9 = vld [vmem:[#allocation2 + $0x28] sm:$0xff] }
  0xe1   :  { %1782 = vmatprep.subr.bf16.mxu0 %v6215_v11  ;;  %1823 = vmatprep.subr.bf16.mxu1 %v6217_v16  ;;  %v161_v10 = vld [vmem:[#allocation2 + $0x68] sm:$0xff]  ;;  %v6326_v11 = vcombine.low %v390_v63, %v398_v0  ;;  %v168_v16 = vld [vmem:[#allocation2 + $0xa0] sm:$0xff]  ;;  %v6187_v63 = vcombine.high %v248_v56, %v256_v57 }
  0xe2   :  { %v6093_v15 = vcombine.high %v153_v9, %v161_v10  ;;  %v6092_v21 = vcombine.low %v153_v9, %v161_v10  ;;  %v6107_v22 = vcombine.high %v168_v16, %v176_v17  ;;  %v280_v9 = vld [vmem:[#allocation2 + $0x420] sm:$0xff] }
  0xe3   :  { %v288_v10 = vld [vmem:[#allocation2 + $0x460] sm:$0xff] }
  0xe4   :  { %1783 = vmatpush1.bf16.msra.mxu0 %v6214_v18  ;;  %1824 = vmatpush1.bf16.msra.mxu1 %v6216_v19  ;;  %v169_v18 = vld [vmem:[#allocation2 + $0xa8] sm:$0xff] }
  0xe5   :  { %1784 = vmatprep.subr.bf16.mxu0 %v6231_v20  ;;  %1825 = vmatprep.subr.bf16.mxu1 %v6233_v53  ;;  %v177_v19 = vld [vmem:[#allocation2 + $0xe8] sm:$0xff]  ;;  %v6090_v20 = vcombine.low %v152_v7, %v160_v8  ;;  %v184_v53 = vld [vmem:[#allocation2 + $0x120] sm:$0xff]  ;;  %v6203_v7 = vcombine.high %v264_v1, %v272_v2 }
  0xe6   :  { %v6109_v23 = vcombine.high %v169_v18, %v177_v19  ;;  %v6108_v28 = vcombine.low %v169_v18, %v177_v19  ;;  %v6123_v29 = vcombine.high %v184_v53, %v192_v24  ;;  %v296_v18 = vld [vmem:[#allocation2 + $0x4a0] sm:$0xff] }
  0xe7   :  { %v304_v19 = vld [vmem:[#allocation2 + $0x4e0] sm:$0xff] }
  0xe8   :  { %1785 = vmatpush1.bf16.msra.mxu0 %v6230_v25  ;;  %1826 = vmatpush1.bf16.msra.mxu1 %v6232_v26  ;;  %v185_v25 = vld [vmem:[#allocation2 + $0x128] sm:$0xff] }
  0xe9   :  { %1786 = vmatprep.subr.bf16.mxu0 %v6247_v27  ;;  %1827 = vmatprep.subr.bf16.mxu1 %v6249_v31  ;;  %v193_v26 = vld [vmem:[#allocation2 + $0x168] sm:$0xff]  ;;  %v6106_v27 = vcombine.low %v168_v16, %v176_v17  ;;  %v200_v31 = vld [vmem:[#allocation2 + $0x1a0] sm:$0xff]  ;;  %v6219_v16 = vcombine.high %v280_v9, %v288_v10 }
  0xea   :  { %v6125_v30 = vcombine.high %v185_v25, %v193_v26  ;;  %v6124_v36 = vcombine.low %v185_v25, %v193_v26  ;;  %v6139_v37 = vcombine.high %v200_v31, %v208_v32  ;;  %v312_v25 = vld [vmem:[#allocation2 + $0x520] sm:$0xff] }
  0xeb   :  { %v320_v26 = vld [vmem:[#allocation2 + $0x560] sm:$0xff] }
  0xec   :  { %1787 = vmatpush1.bf16.msra.mxu0 %v6246_v33  ;;  %1828 = vmatpush1.bf16.msra.mxu1 %v6248_v34  ;;  %v201_v33 = vld [vmem:[#allocation2 + $0x1a8] sm:$0xff] }
  0xed   :  { %1788 = vmatprep.subr.bf16.mxu0 %v6263_v35  ;;  %1829 = vmatprep.subr.bf16.mxu1 %v6265_v39  ;;  %v209_v34 = vld [vmem:[#allocation2 + $0x1e8] sm:$0xff]  ;;  %v6122_v35 = vcombine.low %v184_v53, %v192_v24  ;;  %v216_v39 = vld [vmem:[#allocation2 + $0x220] sm:$0xff]  ;;  %v6235_v53 = vcombine.high %v296_v18, %v304_v19 }
  0xee   :  { %v6141_v38 = vcombine.high %v201_v33, %v209_v34  ;;  %v6140_v44 = vcombine.low %v201_v33, %v209_v34  ;;  %v6155_v45 = vcombine.high %v216_v39, %v224_v40  ;;  %v328_v33 = vld [vmem:[#allocation2 + $0x5a0] sm:$0xff] }
  0xef   :  { %v336_v34 = vld [vmem:[#allocation2 + $0x5e0] sm:$0xff] }
  0xf0   :  { %1789 = vmatpush1.bf16.msra.mxu0 %v6262_v41  ;;  %1830 = vmatpush1.bf16.msra.mxu1 %v6264_v42  ;;  %v217_v41 = vld [vmem:[#allocation2 + $0x228] sm:$0xff] }
  0xf1   :  { %1790 = vmatprep.subr.bf16.mxu0 %v6279_v43  ;;  %1831 = vmatprep.subr.bf16.mxu1 %v6281_v47  ;;  %v225_v42 = vld [vmem:[#allocation2 + $0x268] sm:$0xff]  ;;  %v6138_v43 = vcombine.low %v200_v31, %v208_v32  ;;  %v232_v47 = vld [vmem:[#allocation2 + $0x2a0] sm:$0xff]  ;;  %v6251_v31 = vcombine.high %v312_v25, %v320_v26 }
  0xf2   :  { %v6157_v46 = vcombine.high %v217_v41, %v225_v42  ;;  %v6171_v54 = vcombine.high %v232_v47, %v240_v48 }
  0xf4   :  { %1791 = vmatpush1.bf16.msra.mxu0 %v6278_v49  ;;  %1832 = vmatpush1.bf16.msra.mxu1 %v6280_v50  ;;  %v233_v49 = vld [vmem:[#allocation2 + $0x2a8] sm:$0xff] }
  0xf5   :  { %1792 = vmatprep.subr.bf16.mxu0 %v6295_v51  ;;  %1833 = vmatprep.subr.bf16.mxu1 %v6297_v52  ;;  %v241_v50 = vld [vmem:[#allocation2 + $0x2e8] sm:$0xff]  ;;  %v6154_v51 = vcombine.low %v216_v39, %v224_v40  ;;  %v6156_v52 = vcombine.low %v217_v41, %v225_v42  ;;  %v6267_v39 = vcombine.high %v328_v33, %v336_v34  ;;  %v344_v41 = vld [vmem:[#allocation2 + $0x620] sm:$0xff] }
  0xf6   :  { %v6173_v55 = vcombine.high %v233_v49, %v241_v50  ;;  %v352_v42 = vld [vmem:[#allocation2 + $0x660] sm:$0xff] }
  0xf8   :  { %1793 = vmatpush1.bf16.msra.mxu0 %v6294_v58  ;;  %1834 = vmatpush1.bf16.msra.mxu1 %v6296_v59  ;;  %v249_v58 = vld [vmem:[#allocation2 + $0x328] sm:$0xff] }
  0xf9   :  { %1794 = vmatprep.subr.bf16.mxu0 %v6311_v60  ;;  %1835 = vmatprep.subr.bf16.mxu1 %v6313_v62  ;;  %v257_v59 = vld [vmem:[#allocation2 + $0x368] sm:$0xff]  ;;  %v6170_v60 = vcombine.low %v232_v47, %v240_v48  ;;  %v6172_v62 = vcombine.low %v233_v49, %v241_v50  ;;  %v6283_v47 = vcombine.high %v344_v41, %v352_v42  ;;  %v360_v49 = vld [vmem:[#allocation2 + $0x6a0] sm:$0xff] }
  0xfa   :  { %v6189_v0 = vcombine.high %v249_v58, %v257_v59  ;;  %v368_v50 = vld [vmem:[#allocation2 + $0x6e0] sm:$0xff] }
  0xfc   :  { %1795 = vmatpush1.bf16.msra.mxu0 %v6310_v3  ;;  %1836 = vmatpush1.bf16.msra.mxu1 %v6312_v4  ;;  %v265_v3 = vld [vmem:[#allocation2 + $0x3a8] sm:$0xff] }
  0xfd   :  { %1796 = vmatprep.subr.bf16.mxu0 %v6327_v5  ;;  %1837 = vmatprep.subr.bf16.mxu1 %v6329_v6  ;;  %v273_v4 = vld [vmem:[#allocation2 + $0x3e8] sm:$0xff]  ;;  %v6186_v5 = vcombine.low %v248_v56, %v256_v57  ;;  %v6188_v6 = vcombine.low %v249_v58, %v257_v59  ;;  %v6299_v56 = vcombine.high %v360_v49, %v368_v50  ;;  %v376_v58 = vld [vmem:[#allocation2 + $0x720] sm:$0xff] }
  0xfe   :  { %v6205_v8 = vcombine.high %v265_v3, %v273_v4  ;;  %v384_v59 = vld [vmem:[#allocation2 + $0x760] sm:$0xff] }
 0x100   :  { %1797 = vmatpush1.bf16.msra.mxu0 %v6326_v11  ;;  %1838 = vmatpush1.bf16.msra.mxu1 %v6328_v12  ;;  %v281_v11 = vld [vmem:[#allocation2 + $0x428] sm:$0xff] }
 0x101   :  { %1848 = vmatprep.subr.bf16.mxu0 %v6091_v14  ;;  %1889 = vmatprep.subr.bf16.mxu1 %v6093_v15  ;;  %v289_v12 = vld [vmem:[#allocation2 + $0x468] sm:$0xff]  ;;  %v6202_v14 = vcombine.low %v264_v1, %v272_v2  ;;  %v6204_v15 = vcombine.low %v265_v3, %v273_v4  ;;  %v6315_v1 = vcombine.high %v376_v58, %v384_v59  ;;  %v392_v3 = vld [vmem:[#allocation2 + $0x7a0] sm:$0xff] }
 0x102   :  { %v6221_v17 = vcombine.high %v281_v11, %v289_v12  ;;  %v400_v4 = vld [vmem:[#allocation2 + $0x7e0] sm:$0xff] }
 0x103   :  { %1799 = vmatmul.mubr.bf16.vlgmr.msra.gmra.mrb[4].mxu0 %v8014_v13  ;;  %1840 = vmatmul.mubr.bf16.vlgmr.msra.gmra.mrb[4].mxu1 %v8014_v13 }
 0x104   :  { %1849 = vmatpush1.bf16.msra.mxu0 %v6090_v20  ;;  %1890 = vmatpush1.bf16.msra.mxu1 %v6092_v21  ;;  %v297_v20 = vld [vmem:[#allocation2 + $0x4a8] sm:$0xff] }
 0x105   :  { %1850 = vmatprep.subr.bf16.mxu0 %v6107_v22  ;;  %1891 = vmatprep.subr.bf16.mxu1 %v6109_v23  ;;  %v305_v21 = vld [vmem:[#allocation2 + $0x4e8] sm:$0xff]  ;;  %v6218_v22 = vcombine.low %v280_v9, %v288_v10  ;;  %v6220_v23 = vcombine.low %v281_v11, %v289_v12  ;;  %v6331_v9 = vcombine.high %v392_v3, %v400_v4  ;;  %v154_v11 = vld [vmem:[#allocation2 + $0x30] sm:$0xff] }
 0x106   :  { %1880 = vmatprep.mubr.bf16.mxu0 %v8008_v61  ;;  %1921 = vmatprep.mubr.bf16.mxu1 %v8008_v61  ;;  %v6237_v24 = vcombine.high %v297_v20, %v305_v21  ;;  %v162_v12 = vld [vmem:[#allocation2 + $0x70] sm:$0xff] }
 0x108   :  { %1851 = vmatpush1.bf16.msra.mxu0 %v6106_v27  ;;  %1892 = vmatpush1.bf16.msra.mxu1 %v6108_v28  ;;  %v313_v27 = vld [vmem:[#allocation2 + $0x528] sm:$0xff] }
 0x109   :  { %1852 = vmatprep.subr.bf16.mxu0 %v6123_v29  ;;  %1893 = vmatprep.subr.bf16.mxu1 %v6125_v30  ;;  %v321_v28 = vld [vmem:[#allocation2 + $0x568] sm:$0xff]  ;;  %v6234_v29 = vcombine.low %v296_v18, %v304_v19  ;;  %v6236_v30 = vcombine.low %v297_v20, %v305_v21  ;;  %v6095_v18 = vcombine.high %v154_v11, %v162_v12  ;;  %v170_v20 = vld [vmem:[#allocation2 + $0xb0] sm:$0xff] }
 0x10a   :  { %v6253_v32 = vcombine.high %v313_v27, %v321_v28  ;;  %v178_v21 = vld [vmem:[#allocation2 + $0xf0] sm:$0xff] }
 0x10c   :  { %1853 = vmatpush1.bf16.msra.mxu0 %v6122_v35  ;;  %1894 = vmatpush1.bf16.msra.mxu1 %v6124_v36  ;;  %v329_v35 = vld [vmem:[#allocation2 + $0x5a8] sm:$0xff] }
 0x10d   :  { %1854 = vmatprep.subr.bf16.mxu0 %v6139_v37  ;;  %1895 = vmatprep.subr.bf16.mxu1 %v6141_v38  ;;  %v337_v36 = vld [vmem:[#allocation2 + $0x5e8] sm:$0xff]  ;;  %v6250_v37 = vcombine.low %v312_v25, %v320_v26  ;;  %v6252_v38 = vcombine.low %v313_v27, %v321_v28  ;;  %v6111_v25 = vcombine.high %v170_v20, %v178_v21  ;;  %v186_v27 = vld [vmem:[#allocation2 + $0x130] sm:$0xff] }
 0x10e   :  { %v6269_v40 = vcombine.high %v329_v35, %v337_v36  ;;  %v194_v28 = vld [vmem:[#allocation2 + $0x170] sm:$0xff] }
 0x110   :  { %1855 = vmatpush1.bf16.msra.mxu0 %v6138_v43  ;;  %1896 = vmatpush1.bf16.msra.mxu1 %v6140_v44  ;;  %v345_v43 = vld [vmem:[#allocation2 + $0x628] sm:$0xff] }
 0x111   :  { %1856 = vmatprep.subr.bf16.mxu0 %v6155_v45  ;;  %1897 = vmatprep.subr.bf16.mxu1 %v6157_v46  ;;  %v353_v44 = vld [vmem:[#allocation2 + $0x668] sm:$0xff]  ;;  %v6266_v45 = vcombine.low %v328_v33, %v336_v34  ;;  %v6268_v46 = vcombine.low %v329_v35, %v337_v36  ;;  %v6127_v33 = vcombine.high %v186_v27, %v194_v28  ;;  %v202_v35 = vld [vmem:[#allocation2 + $0x1b0] sm:$0xff] }
 0x112   :  { %v6285_v48 = vcombine.high %v345_v43, %v353_v44  ;;  %v210_v36 = vld [vmem:[#allocation2 + $0x1f0] sm:$0xff] }
 0x114   :  { %1857 = vmatpush1.bf16.msra.mxu0 %v6154_v51  ;;  %1898 = vmatpush1.bf16.msra.mxu1 %v6156_v52  ;;  %v361_v51 = vld [vmem:[#allocation2 + $0x6a8] sm:$0xff] }
 0x115   :  { %1858 = vmatprep.subr.bf16.mxu0 %v6171_v54  ;;  %1899 = vmatprep.subr.bf16.mxu1 %v6173_v55  ;;  %v369_v52 = vld [vmem:[#allocation2 + $0x6e8] sm:$0xff]  ;;  %v6282_v54 = vcombine.low %v344_v41, %v352_v42  ;;  %v6284_v55 = vcombine.low %v345_v43, %v353_v44  ;;  %v6143_v41 = vcombine.high %v202_v35, %v210_v36  ;;  %v218_v43 = vld [vmem:[#allocation2 + $0x230] sm:$0xff] }
 0x116   :  { %v6301_v57 = vcombine.high %v361_v51, %v369_v52  ;;  %v226_v44 = vld [vmem:[#allocation2 + $0x270] sm:$0xff] }
 0x118   :  { %1859 = vmatpush1.bf16.msra.mxu0 %v6170_v60  ;;  %1900 = vmatpush1.bf16.msra.mxu1 %v6172_v62  ;;  %v377_v60 = vld [vmem:[#allocation2 + $0x728] sm:$0xff] }
 0x119   :  { %1860 = vmatprep.subr.bf16.mxu0 %v6187_v63  ;;  %1901 = vmatprep.subr.bf16.mxu1 %v6189_v0  ;;  %v385_v62 = vld [vmem:[#allocation2 + $0x768] sm:$0xff]  ;;  %v6298_v63 = vcombine.low %v360_v49, %v368_v50  ;;  %v6300_v0 = vcombine.low %v361_v51, %v369_v52  ;;  %v6159_v49 = vcombine.high %v218_v43, %v226_v44  ;;  %v234_v50 = vld [vmem:[#allocation2 + $0x2b0] sm:$0xff]  ;;  %v235_v52 = vld [vmem:[#allocation2 + $0x2b8] sm:$0xff] }
 0x11a   :  { %v6317_v2 = vcombine.high %v377_v60, %v385_v62  ;;  %v242_v51 = vld [vmem:[#allocation2 + $0x2f0] sm:$0xff] }
 0x11c   :  { %1861 = vmatpush1.bf16.msra.mxu0 %v6186_v5  ;;  %1902 = vmatpush1.bf16.msra.mxu1 %v6188_v6  ;;  %v393_v5 = vld [vmem:[#allocation2 + $0x7a8] sm:$0xff] }
 0x11d   :  { %1862 = vmatprep.subr.bf16.mxu0 %v6203_v7  ;;  %1903 = vmatprep.subr.bf16.mxu1 %v6205_v8  ;;  %v401_v6 = vld [vmem:[#allocation2 + $0x7e8] sm:$0xff]  ;;  %v6314_v7 = vcombine.low %v376_v58, %v384_v59  ;;  %v6316_v8 = vcombine.low %v377_v60, %v385_v62  ;;  %v250_v59 = vld [vmem:[#allocation2 + $0x330] sm:$0xff]  ;;  %v251_v62 = vld [vmem:[#allocation2 + $0x338] sm:$0xff] }
 0x11e   :  { %v6333_v10 = vcombine.high %v393_v5, %v401_v6  ;;  %v258_v60 = vld [vmem:[#allocation2 + $0x370] sm:$0xff] }
 0x120   :  { %1863 = vmatpush1.bf16.msra.mxu0 %v6202_v14  ;;  %1904 = vmatpush1.bf16.msra.mxu1 %v6204_v15  ;;  %v155_v14 = vld [vmem:[#allocation2 + $0x38] sm:$0xff] }
 0x121   :  { %1864 = vmatprep.subr.bf16.mxu0 %v6219_v16  ;;  %1905 = vmatprep.subr.bf16.mxu1 %v6221_v17  ;;  %v163_v15 = vld [vmem:[#allocation2 + $0x78] sm:$0xff]  ;;  %v6330_v16 = vcombine.low %v392_v3, %v400_v4  ;;  %v6332_v17 = vcombine.low %v393_v5, %v401_v6  ;;  %v266_v4 = vld [vmem:[#allocation2 + $0x3b0] sm:$0xff] }
 0x122   :  { %v6097_v19 = vcombine.high %v155_v14, %v163_v15  ;;  %v274_v5 = vld [vmem:[#allocation2 + $0x3f0] sm:$0xff]  ;;  %v267_v6 = vld [vmem:[#allocation2 + $0x3b8] sm:$0xff] }
 0x124   :  { %1865 = vmatpush1.bf16.msra.mxu0 %v6218_v22  ;;  %1906 = vmatpush1.bf16.msra.mxu1 %v6220_v23  ;;  %v171_v22 = vld [vmem:[#allocation2 + $0xb8] sm:$0xff] }
 0x125   :  { %1866 = vmatprep.subr.bf16.mxu0 %v6235_v53  ;;  %1907 = vmatprep.subr.bf16.mxu1 %v6237_v24  ;;  %v179_v23 = vld [vmem:[#allocation2 + $0xf8] sm:$0xff]  ;;  %v6094_v53 = vcombine.low %v154_v11, %v162_v12  ;;  %v6096_v24 = vcombine.low %v155_v14, %v163_v15  ;;  %v282_v12 = vld [vmem:[#allocation2 + $0x430] sm:$0xff] }
 0x126   :  { %v6113_v26 = vcombine.high %v171_v22, %v179_v23  ;;  %v290_v14 = vld [vmem:[#allocation2 + $0x470] sm:$0xff]  ;;  %v283_v15 = vld [vmem:[#allocation2 + $0x438] sm:$0xff] }
 0x128   :  { %1867 = vmatpush1.bf16.msra.mxu0 %v6234_v29  ;;  %1908 = vmatpush1.bf16.msra.mxu1 %v6236_v30  ;;  %v187_v29 = vld [vmem:[#allocation2 + $0x138] sm:$0xff] }
 0x129   :  { %1868 = vmatprep.subr.bf16.mxu0 %v6251_v31  ;;  %1909 = vmatprep.subr.bf16.mxu1 %v6253_v32  ;;  %v195_v30 = vld [vmem:[#allocation2 + $0x178] sm:$0xff]  ;;  %v6110_v31 = vcombine.low %v170_v20, %v178_v21  ;;  %v6112_v32 = vcombine.low %v171_v22, %v179_v23  ;;  %v298_v21 = vld [vmem:[#allocation2 + $0x4b0] sm:$0xff] }
 0x12a   :  { %v6129_v34 = vcombine.high %v187_v29, %v195_v30  ;;  %v306_v22 = vld [vmem:[#allocation2 + $0x4f0] sm:$0xff]  ;;  %v299_v23 = vld [vmem:[#allocation2 + $0x4b8] sm:$0xff] }
 0x12c   :  { %1869 = vmatpush1.bf16.msra.mxu0 %v6250_v37  ;;  %1910 = vmatpush1.bf16.msra.mxu1 %v6252_v38  ;;  %v203_v37 = vld [vmem:[#allocation2 + $0x1b8] sm:$0xff] }
 0x12d   :  { %1870 = vmatprep.subr.bf16.mxu0 %v6267_v39  ;;  %1911 = vmatprep.subr.bf16.mxu1 %v6269_v40  ;;  %v211_v38 = vld [vmem:[#allocation2 + $0x1f8] sm:$0xff]  ;;  %v6126_v39 = vcombine.low %v186_v27, %v194_v28  ;;  %v6128_v40 = vcombine.low %v187_v29, %v195_v30  ;;  %v314_v28 = vld [vmem:[#allocation2 + $0x530] sm:$0xff] }
 0x12e   :  { %v6145_v42 = vcombine.high %v203_v37, %v211_v38  ;;  %v322_v29 = vld [vmem:[#allocation2 + $0x570] sm:$0xff]  ;;  %v315_v30 = vld [vmem:[#allocation2 + $0x538] sm:$0xff] }
 0x130   :  { %1871 = vmatpush1.bf16.msra.mxu0 %v6266_v45  ;;  %1912 = vmatpush1.bf16.msra.mxu1 %v6268_v46  ;;  %v219_v45 = vld [vmem:[#allocation2 + $0x238] sm:$0xff] }
 0x131   :  { %1872 = vmatprep.subr.bf16.mxu0 %v6283_v47  ;;  %1913 = vmatprep.subr.bf16.mxu1 %v6285_v48  ;;  %v227_v46 = vld [vmem:[#allocation2 + $0x278] sm:$0xff]  ;;  %v6142_v47 = vcombine.low %v202_v35, %v210_v36  ;;  %v6144_v48 = vcombine.low %v203_v37, %v211_v38  ;;  %v330_v36 = vld [vmem:[#allocation2 + $0x5b0] sm:$0xff] }
 0x132   :  { %v338_v37 = vld [vmem:[#allocation2 + $0x5f0] sm:$0xff]  ;;  %v331_v38 = vld [vmem:[#allocation2 + $0x5b8] sm:$0xff] }
 0x134   :  { %1873 = vmatpush1.bf16.msra.mxu0 %v6282_v54  ;;  %1914 = vmatpush1.bf16.msra.mxu1 %v6284_v55  ;;  %v243_v54 = vld [vmem:[#allocation2 + $0x2f8] sm:$0xff]  ;;  %v6158_v55 = vcombine.low %v218_v43, %v226_v44  ;;  %v346_v44 = vld [vmem:[#allocation2 + $0x630] sm:$0xff] }
 0x135   :  { %1874 = vmatprep.subr.bf16.mxu0 %v6299_v56  ;;  %1915 = vmatprep.subr.bf16.mxu1 %v6301_v57  ;;  %v6160_v56 = vcombine.low %v219_v45, %v227_v46  ;;  %v6175_v57 = vcombine.high %v234_v50, %v242_v51  ;;  %v6177_v58 = vcombine.high %v235_v52, %v243_v54 }
 0x138   :  { %1875 = vmatpush1.bf16.msra.mxu0 %v6298_v63  ;;  %1916 = vmatpush1.bf16.msra.mxu1 %v6300_v0  ;;  %v259_v63 = vld [vmem:[#allocation2 + $0x378] sm:$0xff]  ;;  %v6174_v0 = vcombine.low %v234_v50, %v242_v51  ;;  %v362_v51 = vld [vmem:[#allocation2 + $0x6b0] sm:$0xff] }
 0x139   :  { %1876 = vmatprep.subr.bf16.mxu0 %v6315_v1  ;;  %1917 = vmatprep.subr.bf16.mxu1 %v6317_v2  ;;  %v6176_v1 = vcombine.low %v235_v52, %v243_v54  ;;  %v6191_v2 = vcombine.high %v250_v59, %v258_v60  ;;  %v6193_v3 = vcombine.high %v251_v62, %v259_v63  ;;  %v370_v52 = vld [vmem:[#allocation2 + $0x6f0] sm:$0xff]  ;;  %v363_v54 = vld [vmem:[#allocation2 + $0x6b8] sm:$0xff] }
 0x13c   :  { %1877 = vmatpush1.bf16.msra.mxu0 %v6314_v7  ;;  %1918 = vmatpush1.bf16.msra.mxu1 %v6316_v8  ;;  %v275_v7 = vld [vmem:[#allocation2 + $0x3f8] sm:$0xff]  ;;  %v6190_v8 = vcombine.low %v250_v59, %v258_v60  ;;  %v378_v60 = vld [vmem:[#allocation2 + $0x730] sm:$0xff] }
 0x13d   :  { %1878 = vmatprep.subr.bf16.mxu0 %v6331_v9  ;;  %1919 = vmatprep.subr.bf16.mxu1 %v6333_v10  ;;  %v6192_v9 = vcombine.low %v251_v62, %v259_v63  ;;  %v6207_v10 = vcombine.high %v266_v4, %v274_v5  ;;  %v6209_v11 = vcombine.high %v267_v6, %v275_v7  ;;  %v386_v62 = vld [vmem:[#allocation2 + $0x770] sm:$0xff]  ;;  %v379_v63 = vld [vmem:[#allocation2 + $0x738] sm:$0xff] }
 0x140   :  { %1879 = vmatpush1.bf16.msra.mxu0 %v6330_v16  ;;  %1920 = vmatpush1.bf16.msra.mxu1 %v6332_v17  ;;  %v291_v16 = vld [vmem:[#allocation2 + $0x478] sm:$0xff]  ;;  %v6206_v17 = vcombine.low %v266_v4, %v274_v5  ;;  %v394_v5 = vld [vmem:[#allocation2 + $0x7b0] sm:$0xff] }
 0x141   :  { %1930 = vmatprep.subr.bf16.mxu0 %v6095_v18  ;;  %1971 = vmatprep.subr.bf16.mxu1 %v6097_v19  ;;  %v6208_v18 = vcombine.low %v267_v6, %v275_v7  ;;  %v6223_v19 = vcombine.high %v282_v12, %v290_v14  ;;  %v6225_v20 = vcombine.high %v283_v15, %v291_v16  ;;  %v402_v6 = vld [vmem:[#allocation2 + $0x7f0] sm:$0xff]  ;;  %v395_v7 = vld [vmem:[#allocation2 + $0x7b8] sm:$0xff] }
 0x143   :  { %1881 = vmatmul.mubr.bf16.vlgmr.msra.gmra.mrb[8].mxu0 %v8014_v13  ;;  %1922 = vmatmul.mubr.bf16.vlgmr.msra.gmra.mrb[8].mxu1 %v8014_v13 }
 0x144   :  { %1931 = vmatpush1.bf16.msra.mxu0 %v6094_v53  ;;  %1972 = vmatpush1.bf16.msra.mxu1 %v6096_v24  ;;  %v307_v53 = vld [vmem:[#allocation2 + $0x4f8] sm:$0xff]  ;;  %v6222_v24 = vcombine.low %v282_v12, %v290_v14  ;;  %v6334_v14 = vcombine.low %v394_v5, %v402_v6 }
 0x145   :  { %1932 = vmatprep.subr.bf16.mxu0 %v6111_v25  ;;  %1973 = vmatprep.subr.bf16.mxu1 %v6113_v26  ;;  %v6224_v25 = vcombine.low %v283_v15, %v291_v16  ;;  %v6239_v26 = vcombine.high %v298_v21, %v306_v22  ;;  %v6241_v27 = vcombine.high %v299_v23, %v307_v53 }
 0x146   :  { %1962 = vmatprep.mubr.bf16.mxu0 %v8008_v61  ;;  %2003 = vmatprep.mubr.bf16.mxu1 %v8008_v61  ;;  %v6161_v61 = vcombine.high %v219_v45, %v227_v46  ;;  %v354_v45 = vld [vmem:[#allocation2 + $0x670] sm:$0xff]  ;;  %v347_v46 = vld [vmem:[#allocation2 + $0x638] sm:$0xff] }
 0x148   :  { %1933 = vmatpush1.bf16.msra.mxu0 %v6110_v31  ;;  %1974 = vmatpush1.bf16.msra.mxu1 %v6112_v32  ;;  %v323_v31 = vld [vmem:[#allocation2 + $0x578] sm:$0xff]  ;;  %v6238_v32 = vcombine.low %v298_v21, %v306_v22 }
 0x149   :  { %1934 = vmatprep.subr.bf16.mxu0 %v6127_v33  ;;  %1975 = vmatprep.subr.bf16.mxu1 %v6129_v34  ;;  %v6240_v33 = vcombine.low %v299_v23, %v307_v53  ;;  %v6255_v34 = vcombine.high %v314_v28, %v322_v29  ;;  %v6257_v35 = vcombine.high %v315_v30, %v323_v31  ;;  %v2061_v53 = vld [vmem:[#allocation10 + $0x80] sm:$0xff] }
 0x14c   :  { %1935 = vmatpush1.bf16.msra.mxu0 %v6126_v39  ;;  %1976 = vmatpush1.bf16.msra.mxu1 %v6128_v40  ;;  %v339_v39 = vld [vmem:[#allocation2 + $0x5f8] sm:$0xff]  ;;  %v6254_v40 = vcombine.low %v314_v28, %v322_v29  ;;  %v2045_v28 = vld [vmem:[#allocation10] sm:$0xff]  ;;  %v2046_v29 = vld [vmem:[#allocation10 + $0x8] sm:$0xff] }
 0x14d   :  { %1936 = vmatprep.subr.bf16.mxu0 %v6143_v41  ;;  %1977 = vmatprep.subr.bf16.mxu1 %v6145_v42  ;;  %v6256_v41 = vcombine.low %v315_v30, %v323_v31  ;;  %v6271_v42 = vcombine.high %v330_v36, %v338_v37  ;;  %v6273_v43 = vcombine.high %v331_v38, %v339_v39  ;;  %v2077_v31 = vld [vmem:[#allocation10 + $0x100] sm:$0xff] }
 0x14e   :  { %v7109_v30 = vpack.c.bf16 %v2046_v29, %v2045_v28  ;;  %v2055_v28 = vld [vmem:[#allocation10 + $0x50] sm:$0xff]  ;;  %v2056_v29 = vld [vmem:[#allocation10 + $0x58] sm:$0xff] }
 0x150   :  { %1937 = vmatpush1.bf16.msra.mxu0 %v6142_v47  ;;  %1978 = vmatpush1.bf16.msra.mxu1 %v6144_v48  ;;  %v355_v47 = vld [vmem:[#allocation2 + $0x678] sm:$0xff]  ;;  %v6270_v48 = vcombine.low %v330_v36, %v338_v37  ;;  %v2095_v36 = vld [vmem:[#allocation10 + $0x190] sm:$0xff] }
 0x151   :  { %1938 = vmatprep.subr.bf16.mxu0 %v6159_v49  ;;  %1979 = vmatprep.subr.bf16.mxu1 %v6161_v61  ;;  %v6272_v49 = vcombine.low %v331_v38, %v339_v39  ;;  %v6287_v61 = vcombine.high %v346_v44, %v354_v45  ;;  %v6289_v50 = vcombine.high %v347_v46, %v355_v47  ;;  %v2096_v37 = vld [vmem:[#allocation10 + $0x198] sm:$0xff] }
 0x152   :  { %v7143_v39 = vpack.c.bf16 %v2096_v37, %v2095_v36 }
 0x154   :  { %1939 = vmatpush1.bf16.msra.mxu0 %v6158_v55  ;;  %1980 = vmatpush1.bf16.msra.mxu1 %v6160_v56  ;;  %v371_v55 = vld [vmem:[#allocation2 + $0x6f8] sm:$0xff]  ;;  %v6286_v56 = vcombine.low %v346_v44, %v354_v45  ;;  %v2065_v45 = vld [vmem:[#allocation10 + $0xa0] sm:$0xff] }
 0x155   :  { %1940 = vmatprep.subr.bf16.mxu0 %v6175_v57  ;;  %1981 = vmatprep.subr.bf16.mxu1 %v6177_v58  ;;  %v6288_v57 = vcombine.low %v347_v46, %v355_v47  ;;  %v6303_v58 = vcombine.high %v362_v51, %v370_v52  ;;  %v6305_v59 = vcombine.high %v363_v54, %v371_v55  ;;  %v2080_v44 = vld [vmem:[#allocation10 + $0x118] sm:$0xff]  ;;  %v2066_v46 = vld [vmem:[#allocation10 + $0xa8] sm:$0xff] }
 0x158   :  { %1941 = vmatpush1.bf16.msra.mxu0 %v6174_v0  ;;  %1982 = vmatpush1.bf16.msra.mxu1 %v6176_v1  ;;  %v387_v0 = vld [vmem:[#allocation2 + $0x778] sm:$0xff]  ;;  %v6302_v1 = vcombine.low %v362_v51, %v370_v52  ;;  %v2050_v52 = vld [vmem:[#allocation10 + $0x28] sm:$0xff] }
 0x159   :  { %1942 = vmatprep.subr.bf16.mxu0 %v6191_v2  ;;  %1983 = vmatprep.subr.bf16.mxu1 %v6193_v3  ;;  %v6304_v2 = vcombine.low %v363_v54, %v371_v55  ;;  %v6319_v3 = vcombine.high %v378_v60, %v386_v62  ;;  %v6321_v4 = vcombine.high %v379_v63, %v387_v0  ;;  %v2081_v54 = vld [vmem:[#allocation10 + $0x120] sm:$0xff]  ;;  %v2082_v55 = vld [vmem:[#allocation10 + $0x128] sm:$0xff] }
 0x15c   :  { %1943 = vmatpush1.bf16.msra.mxu0 %v6190_v8  ;;  %1984 = vmatpush1.bf16.msra.mxu1 %v6192_v9  ;;  %v403_v8 = vld [vmem:[#allocation2 + $0x7f8] sm:$0xff]  ;;  %v6318_v9 = vcombine.low %v378_v60, %v386_v62  ;;  %v7149_v60 = vpack.c.bf16 %v2082_v55, %v2081_v54  ;;  %v2089_v55 = vld [vmem:[#allocation10 + $0x160] sm:$0xff] }
 0x15d   :  { %1944 = vmatprep.subr.bf16.mxu0 %v6207_v10  ;;  %1985 = vmatprep.subr.bf16.mxu1 %v6209_v11  ;;  %v6320_v10 = vcombine.low %v379_v63, %v387_v0  ;;  %v6335_v11 = vcombine.high %v394_v5, %v402_v6  ;;  %v6337_v12 = vcombine.high %v395_v7, %v403_v8  ;;  %v2100_v63 = vld [vmem:[#allocation10 + $0x1b8] sm:$0xff]  ;;  %v2051_v0 = vld [vmem:[#allocation10 + $0x30] sm:$0xff]  ;;  %v2069_v5 = vld [vmem:[#allocation10 + $0xc0] sm:$0xff] }
 0x15e   :  { %v6336_v15 = vcombine.low %v395_v7, %v403_v8  ;;  %v2070_v6 = vld [vmem:[#allocation10 + $0xc8] sm:$0xff]  ;;  %v2101_v7 = vld [vmem:[#allocation10 + $0x1c0] sm:$0xff] }
 0x15f   :  { %v2102_v8 = vld [vmem:[#allocation10 + $0x1c8] sm:$0xff] }
 0x160   :  { %1945 = vmatpush1.bf16.msra.mxu0 %v6206_v17  ;;  %1986 = vmatpush1.bf16.msra.mxu1 %v6208_v18 }
 0x161   :  { %1946 = vmatprep.subr.bf16.mxu0 %v6223_v19  ;;  %1987 = vmatprep.subr.bf16.mxu1 %v6225_v20 }
 0x164   :  { %1947 = vmatpush1.bf16.msra.mxu0 %v6222_v24  ;;  %1988 = vmatpush1.bf16.msra.mxu1 %v6224_v25  ;;  %v2062_v24 = vld [vmem:[#allocation10 + $0x88] sm:$0xff]  ;;  %v2093_v25 = vld [vmem:[#allocation10 + $0x180] sm:$0xff] }
 0x165   :  { %1948 = vmatprep.subr.bf16.mxu0 %v6239_v26  ;;  %1989 = vmatprep.subr.bf16.mxu1 %v6241_v27  ;;  %v7107_v26 = vpack.c.bf16 %v2062_v24, %v2061_v53  ;;  %v2094_v27 = vld [vmem:[#allocation10 + $0x188] sm:$0xff]  ;;  %v2071_v53 = vld [vmem:[#allocation10 + $0xd0] sm:$0xff]  ;;  %v2072_v24 = vld [vmem:[#allocation10 + $0xd8] sm:$0xff] }
 0x168   :  { %1949 = vmatpush1.bf16.msra.mxu0 %v6238_v32  ;;  %1990 = vmatpush1.bf16.msra.mxu1 %v6240_v33  ;;  %v2078_v32 = vld [vmem:[#allocation10 + $0x108] sm:$0xff]  ;;  %v2063_v33 = vld [vmem:[#allocation10 + $0x90] sm:$0xff] }
 0x169   :  { %1950 = vmatprep.subr.bf16.mxu0 %v6255_v34  ;;  %1991 = vmatprep.subr.bf16.mxu1 %v6257_v35  ;;  %v7141_v34 = vpack.c.bf16 %v2078_v32, %v2077_v31  ;;  %v2064_v35 = vld [vmem:[#allocation10 + $0x98] sm:$0xff]  ;;  %v7129_v31 = vpack.c.bf16 %v2056_v29, %v2055_v28  ;;  %v2087_v32 = vld [vmem:[#allocation10 + $0x150] sm:$0xff] }
 0x16a   :  { %v7111_v38 = vpack.c.bf16 %v2064_v35, %v2063_v33  ;;  %v2088_v33 = vld [vmem:[#allocation10 + $0x158] sm:$0xff] }
 0x16b   :  { %v7161_v37 = vpack.c.bf16 %v2088_v33, %v2087_v32 }
 0x16c   :  { %1951 = vmatpush1.bf16.msra.mxu0 %v6254_v40  ;;  %1992 = vmatpush1.bf16.msra.mxu1 %v6256_v41  ;;  %v2047_v40 = vld [vmem:[#allocation10 + $0x10] sm:$0xff]  ;;  %v2048_v41 = vld [vmem:[#allocation10 + $0x18] sm:$0xff] }
 0x16d   :  { %1952 = vmatprep.subr.bf16.mxu0 %v6271_v42  ;;  %1993 = vmatprep.subr.bf16.mxu1 %v6273_v43  ;;  %v2079_v42 = vld [vmem:[#allocation10 + $0x110] sm:$0xff]  ;;  %v7113_v43 = vpack.c.bf16 %v2048_v41, %v2047_v40 }
 0x16e   :  { %v7145_v47 = vpack.c.bf16 %v2080_v44, %v2079_v42  ;;  %v2073_v42 = vld [vmem:[#allocation10 + $0xe0] sm:$0xff] }
 0x16f   :  { %v2105_v44 = vld [vmem:[#allocation10 + $0x1e0] sm:$0xff] }
 0x170   :  { %1953 = vmatpush1.bf16.msra.mxu0 %v6270_v48  ;;  %1994 = vmatpush1.bf16.msra.mxu1 %v6272_v49  ;;  %v7115_v48 = vpack.c.bf16 %v2066_v46, %v2065_v45  ;;  %v2097_v49 = vld [vmem:[#allocation10 + $0x1a0] sm:$0xff] }
 0x171   :  { %1954 = vmatprep.subr.bf16.mxu0 %v6287_v61  ;;  %1995 = vmatprep.subr.bf16.mxu1 %v6289_v50  ;;  %v2098_v61 = vld [vmem:[#allocation10 + $0x1a8] sm:$0xff]  ;;  %v2049_v50 = vld [vmem:[#allocation10 + $0x20] sm:$0xff] }
 0x172   :  { %v7147_v51 = vpack.c.bf16 %v2098_v61, %v2097_v49  ;;  %v2106_v49 = vld [vmem:[#allocation10 + $0x1e8] sm:$0xff]  ;;  %v2057_v61 = vld [vmem:[#allocation10 + $0x60] sm:$0xff] }
 0x174   :  { %1955 = vmatpush1.bf16.msra.mxu0 %v6286_v56  ;;  %1996 = vmatpush1.bf16.msra.mxu1 %v6288_v57  ;;  %v7117_v56 = vpack.c.bf16 %v2050_v52, %v2049_v50  ;;  %v2067_v57 = vld [vmem:[#allocation10 + $0xb0] sm:$0xff]  ;;  %v2058_v50 = vld [vmem:[#allocation10 + $0x68] sm:$0xff]  ;;  %v7163_v52 = vpack.c.bf16 %v2106_v49, %v2105_v44  ;;  %v2282_v44 = vld [vmem:[#allocation11 + $0x18] sm:$0xff] }
 0x175   :  { %1956 = vmatprep.subr.bf16.mxu0 %v6303_v58  ;;  %1997 = vmatprep.subr.bf16.mxu1 %v6305_v59  ;;  %v2068_v58 = vld [vmem:[#allocation10 + $0xb8] sm:$0xff]  ;;  %v2099_v59 = vld [vmem:[#allocation10 + $0x1b0] sm:$0xff]  ;;  %v7133_v54 = vpack.c.bf16 %v2058_v50, %v2057_v61 }
 0x176   :  { %v7119_v62 = vpack.c.bf16 %v2068_v58, %v2067_v57  ;;  %v2075_v58 = vld [vmem:[#allocation10 + $0xf0] sm:$0xff] }
 0x177   :  { %v2281_v50 = vld [vmem:[#allocation11 + $0x10] sm:$0xff] }
 0x178   :  { %1957 = vmatpush1.bf16.msra.mxu0 %v6302_v1  ;;  %1998 = vmatpush1.bf16.msra.mxu1 %v6304_v2  ;;  %v2052_v1 = vld [vmem:[#allocation10 + $0x38] sm:$0xff]  ;;  %v7151_v2 = vpack.c.bf16 %v2100_v63, %v2099_v59  ;;  %v2059_v63 = vld [vmem:[#allocation10 + $0x70] sm:$0xff] }
 0x179   :  { %1958 = vmatprep.subr.bf16.mxu0 %v6319_v3  ;;  %1999 = vmatprep.subr.bf16.mxu1 %v6321_v4  ;;  %v2083_v3 = vld [vmem:[#allocation10 + $0x130] sm:$0xff]  ;;  %v2084_v4 = vld [vmem:[#allocation10 + $0x138] sm:$0xff] }
 0x17a   :  { %v2076_v59 = vld [vmem:[#allocation10 + $0xf8] sm:$0xff] }
 0x17c   :  { %1959 = vmatpush1.bf16.msra.mxu0 %v6318_v9  ;;  %2000 = vmatpush1.bf16.msra.mxu1 %v6320_v10  ;;  %v7121_v9 = vpack.c.bf16 %v2052_v1, %v2051_v0  ;;  %v7153_v10 = vpack.c.bf16 %v2084_v4, %v2083_v3  ;;  %v2060_v0 = vld [vmem:[#allocation10 + $0x78] sm:$0xff]  ;;  %v2091_v3 = vld [vmem:[#allocation10 + $0x170] sm:$0xff] }
 0x17d   :  { %1960 = vmatprep.subr.bf16.mxu0 %v6335_v11  ;;  %2001 = vmatprep.subr.bf16.mxu1 %v6337_v12  ;;  %v7123_v11 = vpack.c.bf16 %v2070_v6, %v2069_v5  ;;  %v2053_v12 = vld [vmem:[#allocation10 + $0x40] sm:$0xff]  ;;  %v2092_v4 = vld [vmem:[#allocation10 + $0x178] sm:$0xff] }
 0x17e   :  { %v7169_v5 = vpack.c.bf16 %v2092_v4, %v2091_v3  ;;  %v2300_v3 = vld [vmem:[#allocation11 + $0x148] sm:$0xff]  ;;  %v2298_v4 = vld [vmem:[#allocation11 + $0x118] sm:$0xff] }
 0x180   :  { %1961 = vmatpush1.bf16.msra.mxu0 %v6334_v14  ;;  %2002 = vmatpush1.bf16.msra.mxu1 %v6336_v15  ;;  %v2054_v14 = vld [vmem:[#allocation10 + $0x48] sm:$0xff]  ;;  %v7155_v15 = vpack.c.bf16 %v2102_v8, %v2101_v7 }
 0x181   :  { %7108 = vmatprep.subr.bf16.mxu0 %v7107_v26  ;;  %v7127_v26 = vpack.c.bf16 %v2072_v24, %v2071_v53 }
 0x183   :  { %1963 = vmatmul.mubr.bf16.vlgmr.msra.gmra.mrb[12].mxu0 %v8014_v13  ;;  %2004 = vmatmul.mubr.bf16.vlgmr.msra.gmra.mrb[12].mxu1 %v8014_v13  ;;  %v7139_v13 = vpack.c.bf16 %v2094_v27, %v2093_v25  ;;  %v2103_v25 = vld [vmem:[#allocation10 + $0x1d0] sm:$0xff]  ;;  %v2104_v27 = vld [vmem:[#allocation10 + $0x1d8] sm:$0xff] }
 0x184   :  { %7110 = vmatpush3.bf16.msra.mxu0 %v7109_v30  ;;  %v7159_v30 = vpack.c.bf16 %v2104_v27, %v2103_v25 }
 0x185   :  { %7140 = vmatprep.subr.bf16.mxu1 %v7139_v13  ;;  %7112 = vmatprep.subr.bf16.mxu0 %v7111_v38 }
 0x186   :  { %7142 = vmatpush3.bf16.msra.mxu1 %v7141_v34 }
 0x187   :  { %7144 = vmatprep.subr.bf16.mxu1 %v7143_v39 }
 0x188   :  { %7114 = vmatpush3.bf16.msra.mxu0 %v7113_v43  ;;  %v2074_v43 = vld [vmem:[#allocation10 + $0xe8] sm:$0xff] }
 0x189   :  { %7116 = vmatprep.subr.bf16.mxu0 %v7115_v48  ;;  %v7131_v48 = vpack.c.bf16 %v2074_v43, %v2073_v42  ;;  %v2280_v42 = vld [vmem:[#allocation11 + $0x8] sm:$0xff] }
 0x18a   :  { %7146 = vmatpush3.bf16.msra.mxu1 %v7145_v47  ;;  %v2284_v43 = vld [vmem:[#allocation11 + $0x48] sm:$0xff] }
 0x18b   :  { %7148 = vmatprep.subr.bf16.mxu1 %v7147_v51 }
 0x18c   :  { %7118 = vmatpush3.bf16.msra.mxu0 %v7117_v56  ;;  %v2090_v56 = vld [vmem:[#allocation10 + $0x168] sm:$0xff] }
 0x18d   :  { %7120 = vmatprep.subr.bf16.mxu0 %v7119_v62  ;;  %v7165_v57 = vpack.c.bf16 %v2090_v56, %v2089_v55  ;;  %v2108_v62 = vld [vmem:[#allocation10 + $0x1f8] sm:$0xff]  ;;  %v2292_v55 = vld [vmem:[#allocation11 + $0xc8] sm:$0xff] }
 0x18e   :  { %7150 = vmatpush3.bf16.msra.mxu1 %v7149_v60  ;;  %v2107_v60 = vld [vmem:[#allocation10 + $0x1f0] sm:$0xff]  ;;  %v2290_v56 = vld [vmem:[#allocation11 + $0x98] sm:$0xff] }
 0x18f   :  { %7152 = vmatprep.subr.bf16.mxu1 %v7151_v2  ;;  %v7167_v1 = vpack.c.bf16 %v2108_v62, %v2107_v60  ;;  %v7137_v2 = vpack.c.bf16 %v2060_v0, %v2059_v63  ;;  %v2291_v60 = vld [vmem:[#allocation11 + $0xc0] sm:$0xff]  ;;  %v2289_v63 = vld [vmem:[#allocation11 + $0x90] sm:$0xff] }
 0x190   :  { %7122 = vmatpush3.bf16.msra.mxu0 %v7121_v9  ;;  %v2293_v0 = vld [vmem:[#allocation11 + $0xd0] sm:$0xff] }
 0x191   :  { %7124 = vmatprep.subr.bf16.mxu0 %v7123_v11 }
 0x192   :  { %7154 = vmatpush3.bf16.msra.mxu1 %v7153_v10 }
 0x193   :  { %7156 = vmatprep.subr.bf16.mxu1 %v7155_v15 }
 0x196   :  { %v8030_v16 = vpop.f32.mrb[0].mxu0  ;;  %v8032_v17 = vpop.f32.mrb[0].mxu1 }
 0x197   :  { %v8034_v18 = vpop.f32.mrb[1].mxu0  ;;  %v8036_v19 = vpop.f32.mrb[1].mxu1 }
 0x198   :  { %v1722_v20 = vpop.f32.mrb[2].mxu0  ;;  %v1763_v21 = vpop.f32.mrb[2].mxu1 }
 0x199   :  { %v1723_v22 = vpop.f32.mrb[3].mxu0  ;;  %v1764_v23 = vpop.f32.mrb[3].mxu1  ;;  %v2085_v20 = vld [vmem:[#allocation10 + $0x140] sm:$0xff]  ;;  %v2086_v21 = vld [vmem:[#allocation10 + $0x148] sm:$0xff] }
 0x19a   :  { %v7125_v22 = vpack.c.bf16 %v2054_v14, %v2053_v12  ;;  %v7157_v23 = vpack.c.bf16 %v2086_v21, %v2085_v20 }
 0x19c   :  { %7126 = vmatpush3.bf16.msra.mxu0 %v7125_v22  ;;  %7158 = vmatpush3.bf16.msra.mxu1 %v7157_v23 }
 0x19d   :  { %7128 = vmatprep.subr.bf16.mxu0 %v7127_v26  ;;  %7160 = vmatprep.subr.bf16.mxu1 %v7159_v30 }
 0x1a0   :  { %7130 = vmatpush3.bf16.msra.mxu0 %v7129_v31  ;;  %7162 = vmatpush3.bf16.msra.mxu1 %v7161_v37 }
 0x1a1   :  { %7132 = vmatprep.subr.bf16.mxu0 %v7131_v48  ;;  %7164 = vmatprep.subr.bf16.mxu1 %v7163_v52  ;;  %v2283_v48 = vld [vmem:[#allocation11 + $0x40] sm:$0xff] }
 0x1a4   :  { %7134 = vmatpush3.bf16.msra.mxu0 %v7133_v54  ;;  %7166 = vmatpush3.bf16.msra.mxu1 %v7165_v57  ;;  %v2288_v54 = vld [vmem:[#allocation11 + $0x88] sm:$0xff] }
 0x1a5   :  { %7168 = vmatprep.subr.bf16.mxu1 %v7167_v1  ;;  %v7175_v57 = vpack.c.bf16 %v2292_v55, %v2288_v54  ;;  %v7209_v1 = vpack.c.bf16 %v2293_v0, %v2289_v63  ;;  %v2328_v54 = vld [vmem:[#allocation11 + $0x308] sm:$0xff]  ;;  %v2329_v63 = vld [vmem:[#allocation11 + $0x310] sm:$0xff] }
 0x1a6   :  { %v2332_v55 = vld [vmem:[#allocation11 + $0x348] sm:$0xff]  ;;  %v2333_v0 = vld [vmem:[#allocation11 + $0x350] sm:$0xff] }
 0x1a8   :  { %7170 = vmatpush3.bf16.msra.mxu1 %v7169_v5 }
 0x1d6   :  { %v8038_v13 = vpop.f32.mrb[4].mxu0  ;;  %v8042_v35 = vpop.f32.mrb[4].mxu1 }
 0x1d7   :  { %v2012_v34 = vmax.f32 %v8030_v16, %v8038_v13  ;;  %v8044_v36 = vpop.f32.mrb[5].mxu0  ;;  %v2014_v38 = vmax.f32 %v8032_v17, %v8042_v35  ;;  %v8050_v40 = vpop.f32.mrb[5].mxu1 }
 0x1d8   :  { %v2013_v39 = vmax.f32 %v8034_v18, %v8044_v36  ;;  %v1804_v41 = vpop.f32.mrb[6].mxu0  ;;  %v2015_v45 = vmax.f32 %v8036_v19, %v8050_v40  ;;  %v1845_v46 = vpop.f32.mrb[6].mxu1  ;;  %v7135_v19 = vpack.c.bf16 %v2076_v59, %v2075_v58  ;;  %v2294_v58 = vld [vmem:[#allocation11 + $0xd8] sm:$0xff]  ;;  %v2287_v59 = vld [vmem:[#allocation11 + $0x80] sm:$0xff] }
 0x1d9   :  { %v1805_v47 = vpop.f32.mrb[7].mxu0  ;;  %v1846_v51 = vpop.f32.mrb[7].mxu1  ;;  %v2286_v46 = vld [vmem:[#allocation11 + $0x58] sm:$0xff]  ;;  %v7177_v62 = vpack.c.bf16 %v2291_v60, %v2287_v59  ;;  %v2327_v60 = vld [vmem:[#allocation11 + $0x300] sm:$0xff] }
 0x1da   :  { %7136 = vmatprep.subr.bf16.mxu0 %v7135_v19  ;;  %v2279_v47 = vld [vmem:[#allocation11] sm:$0xff]  ;;  %v7203_v49 = vpack.c.bf16 %v2286_v46, %v2282_v44  ;;  %v2285_v51 = vld [vmem:[#allocation11 + $0x50] sm:$0xff]  ;;  %v7207_v19 = vpack.c.bf16 %v2294_v58, %v2290_v56  ;;  %v2324_v44 = vld [vmem:[#allocation11 + $0x2c8] sm:$0xff] }
 0x1db   :  { %7138 = vmatpush3.bf16.msra.mxu0 %v7137_v2  ;;  %v7173_v61 = vpack.c.bf16 %v2283_v48, %v2279_v47  ;;  %v7205_v52 = vpack.c.bf16 %v2285_v51, %v2281_v50  ;;  %v2296_v2 = vld [vmem:[#allocation11 + $0x108] sm:$0xff]  ;;  %v2326_v46 = vld [vmem:[#allocation11 + $0x2d8] sm:$0xff]  ;;  %v2321_v50 = vld [vmem:[#allocation11 + $0x290] sm:$0xff] }
 0x1dc   :  { %7204 = vmatprep.subr.bf16.mxu1 %v7203_v49  ;;  %v7179_v5 = vpack.c.bf16 %v2300_v3, %v2296_v2  ;;  %v2319_v49 = vld [vmem:[#allocation11 + $0x280] sm:$0xff]  ;;  %v2330_v58 = vld [vmem:[#allocation11 + $0x318] sm:$0xff]  ;;  %v2340_v2 = vld [vmem:[#allocation11 + $0x3c8] sm:$0xff] }
 0x1dd   :  { %v2334_v59 = vld [vmem:[#allocation11 + $0x358] sm:$0xff] }
 0x1de   :  { %v2338_v3 = vld [vmem:[#allocation11 + $0x398] sm:$0xff] }
 0x216   :  { %v1882_v6 = vpop.f32.mrb[8].mxu0  ;;  %v1923_v7 = vpop.f32.mrb[8].mxu1 }
 0x217   :  { %v1884_v8 = vpop.f32.mrb[9].mxu0  ;;  %v1925_v9 = vpop.f32.mrb[9].mxu1 }
 0x218   :  { %v1886_v10 = vpop.f32.mrb[10].mxu0  ;;  %v1927_v11 = vpop.f32.mrb[10].mxu1 }
 0x219   :  { %v1887_v12 = vpop.f32.mrb[11].mxu0  ;;  %v1928_v14 = vpop.f32.mrb[11].mxu1  ;;  %v2297_v11 = vld [vmem:[#allocation11 + $0x110] sm:$0xff] }
 0x21a   :  { %v2301_v12 = vld [vmem:[#allocation11 + $0x150] sm:$0xff] }
 0x21b   :  { %v7213_v14 = vpack.c.bf16 %v2301_v12, %v2297_v11  ;;  %v2337_v11 = vld [vmem:[#allocation11 + $0x390] sm:$0xff] }
 0x21c   :  { %v2341_v12 = vld [vmem:[#allocation11 + $0x3d0] sm:$0xff] }
 0x256   :  { %v1964_v15 = vpop.f32.mrb[12].mxu0  ;;  %v2005_v21 = vpop.f32.mrb[12].mxu1 }
 0x257   :  { %v2016_v20 = vmax.f32 %v1882_v6, %v1964_v15  ;;  %v1966_v22 = vpop.f32.mrb[13].mxu0  ;;  %v2018_v23 = vmax.f32 %v1923_v7, %v2005_v21  ;;  %v2007_v24 = vpop.f32.mrb[13].mxu1  ;;  %v2302_v6 = vld [vmem:[#allocation11 + $0x158] sm:$0xff]  ;;  %v2295_v7 = vld [vmem:[#allocation11 + $0x100] sm:$0xff]  ;;  %v2304_v15 = vld [vmem:[#allocation11 + $0x188] sm:$0xff] }
 0x258   :  { %v2017_v53 = vmax.f32 %v1884_v8, %v1966_v22  ;;  %v1968_v25 = vpop.f32.mrb[14].mxu0  ;;  %v2019_v27 = vmax.f32 %v1925_v9, %v2007_v24  ;;  %v2009_v28 = vpop.f32.mrb[14].mxu1  ;;  %v2299_v8 = vld [vmem:[#allocation11 + $0x140] sm:$0xff]  ;;  %v7211_v9 = vpack.c.bf16 %v2302_v6, %v2298_v4  ;;  %v2306_v21 = vld [vmem:[#allocation11 + $0x198] sm:$0xff]  ;;  %v7229_v6 = vpack.c.bf16 %v2333_v0, %v2329_v63 }
 0x259   :  { %v8057_v26 = vmax.f32 %v2012_v34, %v2016_v20  ;;  %v1969_v29 = vpop.f32.mrb[15].mxu0  ;;  %v8062_v30 = vmax.f32 %v2014_v38, %v2018_v23  ;;  %v2010_v32 = vpop.f32.mrb[15].mxu1  ;;  %v7181_v10 = vpack.c.bf16 %v2299_v8, %v2295_v7  ;;  %v2308_v20 = vld [vmem:[#allocation11 + $0x1c8] sm:$0xff]  ;;  %v2310_v23 = vld [vmem:[#allocation11 + $0x1d8] sm:$0xff]  ;;  %v2307_v24 = vld [vmem:[#allocation11 + $0x1c0] sm:$0xff] }
 0x25a   :  { %v8067_v31 = vmax.f32 %v2013_v39, %v2017_v53  ;;  %v8071_v16 = vmax.f32 %v2015_v45, %v2019_v27  ;;  %v7171_v45 = vpack.c.bf16 %v2284_v43, %v2280_v42  ;;  %v7183_v22 = vpack.c.bf16 %v2308_v20, %v2304_v15  ;;  %v2303_v53 = vld [vmem:[#allocation11 + $0x180] sm:$0xff]  ;;  %v2305_v28 = vld [vmem:[#allocation11 + $0x190] sm:$0xff] }
 0x25b   :  { %v2024_v33 = vmul.f32 %v8057_v26, %v8057_v26  ;;  %v2026_v13 = vmul.f32 %v8062_v30, %v8062_v30  ;;  %v7215_v25 = vpack.c.bf16 %v2310_v23, %v2306_v21  ;;  %v7185_v27 = vpack.c.bf16 %v2307_v24, %v2303_v53  ;;  %v2309_v29 = vld [vmem:[#allocation11 + $0x1d0] sm:$0xff]  ;;  %v2335_v8 = vld [vmem:[#allocation11 + $0x380] sm:$0xff]  ;;  %v2538_v24 = vld [vmem:[#allocation5 + $0x28] sm:$0xff] }
 0x25c   :  { %v2025_v34 = vmul.f32 %v8067_v31, %v8067_v31  ;;  %v2027_v35 = vmul.f32 %v8071_v16, %v8071_v16  ;;  %7172 = vmatprep.subr.bf16.mxu0 %v7171_v45  ;;  %v7217_v32 = vpack.c.bf16 %v2309_v29, %v2305_v28  ;;  %v7837_v42 = vmov 0.0   ;;  %v2322_v45 = vld [vmem:[#allocation11 + $0x298] sm:$0xff]  ;;  %v2533_v20 = vld [vmem:[#allocation5] sm:$0xff] }
 0x25d   :  { %v2032_v17 = vrot.slane %v2024_v33, 6  ;;  %v2034_v18 = vrot.slane %v2026_v13, 6  ;;  %v2312_v33 = vld [vmem:[#allocation11 + $0x208] sm:$0xff]  ;;  %v7223_v48 = vpack.c.bf16 %v2326_v46, %v2322_v45  ;;  %v7233_v15 = vpack.c.bf16 %v2341_v12, %v2337_v11  ;;  %v2537_v21 = vld [vmem:[#allocation5 + $0x20] sm:$0xff] }
 0x25e   :  { %v2033_v36 = vrot.slane %v2025_v34, 6  ;;  %v2035_v37 = vrot.slane %v2027_v35, 6  ;;  %v2316_v13 = vld [vmem:[#allocation11 + $0x248] sm:$0xff]  ;;  %v2314_v34 = vld [vmem:[#allocation11 + $0x218] sm:$0xff]  ;;  %v6338_v23 = vcombine.low %v2533_v20, %v2537_v21  ;;  %v6339_v53 = vcombine.high %v2533_v20, %v2537_v21  ;;  %v2557_v11 = vld [vmem:[#allocation5 + $0xc0] sm:$0xff] }
 0x25f   :  { %v2041_v40 = vsel %vm2040_vm0, %v8057_v26, %v2032_v17  ;;  %v2043_v41 = vsel %vm2040_vm0, %v8062_v30, %v2034_v18  ;;  %v7187_v17 = vpack.c.bf16 %v2316_v13, %v2312_v33  ;;  %v2318_v35 = vld [vmem:[#allocation11 + $0x258] sm:$0xff]  ;;  %v2311_v18 = vld [vmem:[#allocation11 + $0x200] sm:$0xff] }
 0x260   :  { %v2042_v38 = vsel %vm2040_vm0, %v8067_v31, %v2033_v36  ;;  %v2044_v39 = vsel %vm2040_vm0, %v8071_v16, %v2035_v37  ;;  %v2315_v36 = vld [vmem:[#allocation11 + $0x240] sm:$0xff]  ;;  %v7219_v37 = vpack.c.bf16 %v2318_v35, %v2314_v34 }
 0x261   :  { %2173 = vmatprep.mubr.f32.mxu0 %v2042_v38  ;;  %2243 = vmatprep.mubr.f32.mxu1 %v2044_v39  ;;  %v7189_v38 = vpack.c.bf16 %v2315_v36, %v2311_v18  ;;  %v2313_v39 = vld [vmem:[#allocation11 + $0x210] sm:$0xff]  ;;  %v2561_v12 = vld [vmem:[#allocation5 + $0xe0] sm:$0xff] }
 0x262   :  { %2174 = vmatmul.mubr.f32.vlgmr.msra.gmra.mrb[16].mxu0 %v2041_v40  ;;  %2244 = vmatmul.mubr.f32.vlgmr.msra.gmra.mrb[16].mxu1 %v2043_v41  ;;  %v2317_v40 = vld [vmem:[#allocation11 + $0x250] sm:$0xff]  ;;  %v2320_v41 = vld [vmem:[#allocation11 + $0x288] sm:$0xff] }
 0x263   :  { %7174 = vmatpush1.bf16.msra.mxu0 %v7173_v61  ;;  %7206 = vmatpush1.bf16.msra.mxu1 %v7205_v52  ;;  %v7221_v43 = vpack.c.bf16 %v2317_v40, %v2313_v39  ;;  %v7191_v47 = vpack.c.bf16 %v2324_v44, %v2320_v41  ;;  %v2323_v61 = vld [vmem:[#allocation11 + $0x2c0] sm:$0xff]  ;;  %v2325_v52 = vld [vmem:[#allocation11 + $0x2d0] sm:$0xff] }
 0x264   :  { %7176 = vmatprep.subr.bf16.mxu0 %v7175_v57  ;;  %7208 = vmatprep.subr.bf16.mxu1 %v7207_v19  ;;  %v7193_v51 = vpack.c.bf16 %v2323_v61, %v2319_v49  ;;  %v7225_v56 = vpack.c.bf16 %v2325_v52, %v2321_v50  ;;  %v7195_v57 = vpack.c.bf16 %v2332_v55, %v2328_v54  ;;  %v132_v54 = vld [vmem:[%s8282_s7] sm:$0xff] }
 0x265   :  { %2407 = vmatprep.mubr.f32.mxu0 %v7837_v42  ;;  %2478 = vmatprep.mubr.f32.mxu1 %v7837_v42  ;;  %v7227_v19 = vpack.c.bf16 %v2334_v59, %v2330_v58  ;;  %v2541_v58 = vld [vmem:[#allocation5 + $0x40] sm:$0xff] }
 0x267   :  { %7178 = vmatpush1.bf16.msra.mxu0 %v7177_v62  ;;  %7210 = vmatpush1.bf16.msra.mxu1 %v7209_v1  ;;  %v2331_v62 = vld [vmem:[#allocation11 + $0x340] sm:$0xff]  ;;  %v2336_v1 = vld [vmem:[#allocation11 + $0x388] sm:$0xff] }
 0x268   :  { %7180 = vmatprep.subr.bf16.mxu0 %v7179_v5  ;;  %7212 = vmatprep.subr.bf16.mxu1 %v7211_v9  ;;  %v7197_v4 = vpack.c.bf16 %v2331_v62, %v2327_v60  ;;  %v2342_v5 = vld [vmem:[#allocation11 + $0x3d8] sm:$0xff]  ;;  %v7199_v7 = vpack.c.bf16 %v2340_v2, %v2336_v1  ;;  %v2339_v9 = vld [vmem:[#allocation11 + $0x3c0] sm:$0xff]  ;;  %v2546_v62 = vld [vmem:[#allocation5 + $0x68] sm:$0xff] }
 0x269   :  { %v2545_v60 = vld [vmem:[#allocation5 + $0x60] sm:$0xff] }
 0x26a   :  { %v6347_v0 = vcombine.high %v2541_v58, %v2545_v60  ;;  %v2549_v2 = vld [vmem:[#allocation5 + $0x80] sm:$0xff] }
 0x26b   :  { %7182 = vmatpush1.bf16.msra.mxu0 %v7181_v10  ;;  %7214 = vmatpush1.bf16.msra.mxu1 %v7213_v14  ;;  %v7231_v10 = vpack.c.bf16 %v2342_v5, %v2338_v3  ;;  %v7201_v14 = vpack.c.bf16 %v2339_v9, %v2335_v8  ;;  %v2550_v5 = vld [vmem:[#allocation5 + $0x88] sm:$0xff] }
 0x26c   :  { %7184 = vmatprep.subr.bf16.mxu0 %v7183_v22  ;;  %7216 = vmatprep.subr.bf16.mxu1 %v7215_v25  ;;  %v2534_v22 = vld [vmem:[#allocation5 + $0x8] sm:$0xff] }
 0x26d   :  { %v6340_v25 = vcombine.low %v2534_v22, %v2538_v24 }
 0x26f   :  { %7186 = vmatpush1.bf16.msra.mxu0 %v7185_v27  ;;  %7218 = vmatpush1.bf16.msra.mxu1 %v7217_v32  ;;  %v6341_v27 = vcombine.high %v2534_v22, %v2538_v24  ;;  %v6363_v22 = vcombine.high %v2557_v11, %v2561_v12  ;;  %v2569_v24 = vld [vmem:[#allocation5 + $0x120] sm:$0xff] }
 0x270   :  { %7188 = vmatprep.subr.bf16.mxu0 %v7187_v17  ;;  %7220 = vmatprep.subr.bf16.mxu1 %v7219_v37 }
 0x273   :  { %7190 = vmatpush1.bf16.msra.mxu0 %v7189_v38  ;;  %7222 = vmatpush1.bf16.msra.mxu1 %v7221_v43 }
 0x274   :  { %7192 = vmatprep.subr.bf16.mxu0 %v7191_v47  ;;  %7224 = vmatprep.subr.bf16.mxu1 %v7223_v48 }
 0x277   :  { %7194 = vmatpush1.bf16.msra.mxu0 %v7193_v51  ;;  %7226 = vmatpush1.bf16.msra.mxu1 %v7225_v56 }
 0x278   :  { %7196 = vmatprep.subr.bf16.mxu0 %v7195_v57  ;;  %7228 = vmatprep.subr.bf16.mxu1 %v7227_v19  ;;  %v2542_v19 = vld [vmem:[#allocation5 + $0x48] sm:$0xff] }
 0x279   :  { %v6349_v1 = vcombine.high %v2542_v19, %v2546_v62  ;;  %v6348_v8 = vcombine.low %v2542_v19, %v2546_v62 }
 0x27b   :  { %7198 = vmatpush1.bf16.msra.mxu0 %v7197_v4  ;;  %7230 = vmatpush1.bf16.msra.mxu1 %v7229_v6  ;;  %v2553_v4 = vld [vmem:[#allocation5 + $0xa0] sm:$0xff]  ;;  %v2554_v6 = vld [vmem:[#allocation5 + $0xa8] sm:$0xff] }
 0x27c   :  { %7200 = vmatprep.subr.bf16.mxu0 %v7199_v7  ;;  %7232 = vmatprep.subr.bf16.mxu1 %v7231_v10  ;;  %v6346_v7 = vcombine.low %v2541_v58, %v2545_v60  ;;  %v6355_v9 = vcombine.high %v2549_v2, %v2553_v4  ;;  %v6357_v10 = vcombine.high %v2550_v5, %v2554_v6  ;;  %v2598_v58 = vld [vmem:[#allocation5 + $0x208] sm:$0xff] }
 0x27d   :  { %v6354_v20 = vcombine.low %v2549_v2, %v2553_v4  ;;  %v6356_v21 = vcombine.low %v2550_v5, %v2554_v6  ;;  %v2606_v2 = vld [vmem:[#allocation5 + $0x248] sm:$0xff] }
 0x27f   :  { %7202 = vmatpush1.bf16.msra.mxu0 %v7201_v14  ;;  %7234 = vmatpush1.bf16.msra.mxu1 %v7233_v15  ;;  %v2558_v14 = vld [vmem:[#allocation5 + $0xc8] sm:$0xff] }
 0x280   :  { %4069 = vmatprep.subr.bf16.mxu0 %v6339_v53  ;;  %4151 = vmatprep.subr.bf16.mxu1 %v6341_v27  ;;  %v2562_v15 = vld [vmem:[#allocation5 + $0xe8] sm:$0xff] }
 0x281   :  { %v6365_v53 = vcombine.high %v2558_v14, %v2562_v15  ;;  %v2570_v27 = vld [vmem:[#allocation5 + $0x128] sm:$0xff] }
 0x335   :  { %v6722_v28 = vpop.f32.mrb[16].mxu0  ;;  %v6757_v29 = vpop.f32.mrb[16].mxu1 }
 0x336   :  { %v6723_v32 = vpop.f32.mrb[17].mxu0  ;;  %v6758_v13 = vpop.f32.mrb[17].mxu1 }
 0x337   :  { %v6724_v33 = vadd.f32 %v6723_v32, %v6722_v28  ;;  %v6759_v34 = vadd.f32 %v6758_v13, %v6757_v29  ;;  %v6362_v28 = vcombine.low %v2557_v11, %v2561_v12  ;;  %v6364_v29 = vcombine.low %v2558_v14, %v2562_v15  ;;  %v2573_v13 = vld [vmem:[#allocation5 + $0x140] sm:$0xff]  ;;  %v2618_v11 = vld [vmem:[#allocation5 + $0x2a8] sm:$0xff] }
 0x339   :  { %v2246_v17 = vadd.f32 %v6759_v34, %v6724_v33  ;;  %v2577_v34 = vld [vmem:[#allocation5 + $0x160] sm:$0xff] }
 0x33b   :  { %v2249_v35 = vmul.f32 0.5, %v2246_v17  ;;  %v2574_v17 = vld [vmem:[#allocation5 + $0x148] sm:$0xff] }
 0x33d   :  { %v2250_v18 = vsel %vm2040_vm0, %v2249_v35, 0.0  ;;  %v2258_v36 = vrot.slane %v2249_v35, 2  ;;  %v2578_v35 = vld [vmem:[#allocation5 + $0x168] sm:$0xff] }
 0x33e   :  { %v2251_v37 = vrot.slane %v2250_v18, 4 }
 0x33f   :  { %v2260_v38 = vsel %vm2040_vm0, %v2258_v36, 0.0 }
 0x340   :  { %v2252_v39 = vadd.f32 %v2251_v37, %v2250_v18  ;;  %v2261_v40 = vrot.slane %v2260_v38, 4  ;;  %v6379_v37 = vcombine.high %v2573_v13, %v2577_v34 }
 0x342   :  { %v2253_v41 = vrot.slane %v2252_v39, 2  ;;  %v2262_v43 = vadd.f32 %v2261_v40, %v2260_v38  ;;  %v6381_v38 = vcombine.high %v2574_v17, %v2578_v35  ;;  %v2585_v40 = vld [vmem:[#allocation5 + $0x1a0] sm:$0xff] }
 0x344   :  { %v2254_v44 = vadd.f32 %v2253_v41, %v2252_v39  ;;  %v2263_v45 = vrot.slane %v2262_v43, 2  ;;  %v2581_v39 = vld [vmem:[#allocation5 + $0x180] sm:$0xff]  ;;  %v2582_v41 = vld [vmem:[#allocation5 + $0x188] sm:$0xff] }
 0x346   :  { %v2255_v46 = vrot.slane %v2254_v44, 1  ;;  %v2264_v47 = vadd.f32 %v2263_v45, %v2262_v43  ;;  %v2586_v43 = vld [vmem:[#allocation5 + $0x1a8] sm:$0xff]  ;;  %v6380_v45 = vcombine.low %v2574_v17, %v2578_v35 }
 0x348   :  { %v2256_v48 = vadd.f32 %v2255_v46, %v2254_v44  ;;  %v2265_v49 = vrot.slane %v2264_v47, 1  ;;  %v6378_v44 = vcombine.low %v2573_v13, %v2577_v34  ;;  %v6387_v46 = vcombine.high %v2581_v39, %v2585_v40  ;;  %v2634_v13 = vld [vmem:[#allocation5 + $0x328] sm:$0xff] }
 0x34a   :  { %v2266_v61 = vadd.f32 %v2265_v49, %v2264_v47  ;;  %v2267_v50 = vmul.f32 %v2256_v48, %v2256_v48  ;;  %v6389_v47 = vcombine.high %v2582_v41, %v2586_v43  ;;  %v2593_v49 = vld [vmem:[#allocation5 + $0x1e0] sm:$0xff] }
 0x34c   :  { %v2268_v51 = vsub.f32 %v2266_v61, %v2267_v50  ;;  %v2590_v61 = vld [vmem:[#allocation5 + $0x1c8] sm:$0xff] }
 0x34d   :  { %v2594_v50 = vld [vmem:[#allocation5 + $0x1e8] sm:$0xff] }
 0x34e   :  { %v2269_v52 = vadd.f32 1e-05, %v2268_v51  ;;  %v6386_v51 = vcombine.low %v2581_v39, %v2585_v40  ;;  %v6396_v19 = vcombine.low %v2590_v61, %v2594_v50  ;;  %v2641_v39 = vld [vmem:[#allocation5 + $0x360] sm:$0xff]  ;;  %v2638_v40 = vld [vmem:[#allocation5 + $0x348] sm:$0xff] }
 0x350   :  { %7623 = vrsqrt.f32 %v2269_v52  ;;  %v6388_v52 = vcombine.low %v2582_v41, %v2586_v43  ;;  %v2642_v43 = vld [vmem:[#allocation5 + $0x368] sm:$0xff] }
 0x35a   :  { %v7624_v55 = vpop.eup %7623 }
 0x35b   :  { %v2271_v56 = vmul.f32 %v7624_v55, %v132_v54  ;;  %v6397_v55 = vcombine.high %v2590_v61, %v2594_v50  ;;  %v2650_v50 = vld [vmem:[#allocation5 + $0x3a8] sm:$0xff] }
 0x35d   :  { %v2272_v57 = vmul.f32 %v2271_v56, %v2256_v48  ;;  %v2589_v48 = vld [vmem:[#allocation5 + $0x1c0] sm:$0xff] }
 0x35e   :  { %v6394_v60 = vcombine.low %v2589_v48, %v2593_v49 }
 0x35f   :  { %v2274_v59 = vrot.slane %v2272_v57, 7  ;;  %v2601_v57 = vld [vmem:[#allocation5 + $0x220] sm:$0xff] }
 0x361   :  { %v2276_v63 = vsub.f32 %v132_v54, %v2274_v59  ;;  %v6395_v54 = vcombine.high %v2589_v48, %v2593_v49  ;;  %v2602_v59 = vld [vmem:[#allocation5 + $0x228] sm:$0xff]  ;;  %v2649_v48 = vld [vmem:[#allocation5 + $0x3a0] sm:$0xff] }
 0x362   :  { %v6404_v5 = vcombine.low %v2598_v58, %v2602_v59  ;;  %v2646_v49 = vld [vmem:[#allocation5 + $0x388] sm:$0xff] }
 0x363   :  { %v2278_v3 = vsel %vm2277_vm1, %v2271_v56, %v2276_v63  ;;  %v2597_v56 = vld [vmem:[#allocation5 + $0x200] sm:$0xff]  ;;  %v6405_v63 = vcombine.high %v2598_v58, %v2602_v59  ;;  %v2658_v59 = vld [vmem:[#allocation5 + $0x3e8] sm:$0xff] }
 0x364   :  { %2408 = vmatmul.mubr.f32.vlgmr.msra.gmra.mrb[18].mxu0 %v2278_v3  ;;  %2479 = vmatmul.mubr.f32.vlgmr.msra.gmra.mrb[18].mxu1 %v2278_v3  ;;  %v6403_v62 = vcombine.high %v2597_v56, %v2601_v57  ;;  %v2610_v3 = vld [vmem:[#allocation5 + $0x268] sm:$0xff]  ;;  %v6402_v4 = vcombine.low %v2597_v56, %v2601_v57  ;;  %v2657_v56 = vld [vmem:[#allocation5 + $0x3e0] sm:$0xff] }
 0x365   :  { %4070 = vmatpush1.bf16.msra.mxu0 %v6338_v23  ;;  %4152 = vmatpush1.bf16.msra.mxu1 %v6340_v25  ;;  %v2565_v23 = vld [vmem:[#allocation5 + $0x100] sm:$0xff]  ;;  %v2566_v25 = vld [vmem:[#allocation5 + $0x108] sm:$0xff]  ;;  %v6412_v14 = vcombine.low %v2606_v2, %v2610_v3 }
 0x366   :  { %4071 = vmatprep.subr.bf16.mxu0 %v6347_v0  ;;  %4153 = vmatprep.subr.bf16.mxu1 %v6349_v1  ;;  %v6371_v32 = vcombine.high %v2565_v23, %v2569_v24  ;;  %v6373_v33 = vcombine.high %v2566_v25, %v2570_v27  ;;  %v6370_v18 = vcombine.low %v2565_v23, %v2569_v24  ;;  %v2605_v0 = vld [vmem:[#allocation5 + $0x240] sm:$0xff]  ;;  %v2626_v23 = vld [vmem:[#allocation5 + $0x2e8] sm:$0xff] }
 0x367   :  { %v6372_v36 = vcombine.low %v2566_v25, %v2570_v27  ;;  %v2609_v1 = vld [vmem:[#allocation5 + $0x260] sm:$0xff]  ;;  %v2654_v57 = vld [vmem:[#allocation5 + $0x3c8] sm:$0xff] }
 0x368   :  { %v6411_v6 = vcombine.high %v2605_v0, %v2609_v1  ;;  %v6410_v12 = vcombine.low %v2605_v0, %v2609_v1  ;;  %v2665_v0 = vld [vmem:[#allocation5 + $0x420] sm:$0xff]  ;;  %v2662_v1 = vld [vmem:[#allocation5 + $0x408] sm:$0xff] }
 0x369   :  { %4072 = vmatpush1.bf16.msra.mxu0 %v6346_v7  ;;  %4154 = vmatpush1.bf16.msra.mxu1 %v6348_v8  ;;  %v6413_v7 = vcombine.high %v2606_v2, %v2610_v3  ;;  %v2613_v8 = vld [vmem:[#allocation5 + $0x280] sm:$0xff]  ;;  %v2666_v3 = vld [vmem:[#allocation5 + $0x428] sm:$0xff] }
 0x36a   :  { %4073 = vmatprep.subr.bf16.mxu0 %v6355_v9  ;;  %4155 = vmatprep.subr.bf16.mxu1 %v6357_v10  ;;  %v2617_v9 = vld [vmem:[#allocation5 + $0x2a0] sm:$0xff]  ;;  %v2614_v10 = vld [vmem:[#allocation5 + $0x288] sm:$0xff] }
 0x36b   :  { %v6419_v15 = vcombine.high %v2613_v8, %v2617_v9  ;;  %v6418_v24 = vcombine.low %v2613_v8, %v2617_v9  ;;  %v6420_v25 = vcombine.low %v2614_v10, %v2618_v11 }
 0x36d   :  { %4074 = vmatpush1.bf16.msra.mxu0 %v6354_v20  ;;  %4156 = vmatpush1.bf16.msra.mxu1 %v6356_v21  ;;  %v6421_v20 = vcombine.high %v2614_v10, %v2618_v11  ;;  %v2621_v21 = vld [vmem:[#allocation5 + $0x2c0] sm:$0xff] }
 0x36e   :  { %4075 = vmatprep.subr.bf16.mxu0 %v6363_v22  ;;  %4157 = vmatprep.subr.bf16.mxu1 %v6365_v53  ;;  %v2625_v22 = vld [vmem:[#allocation5 + $0x2e0] sm:$0xff]  ;;  %v2622_v53 = vld [vmem:[#allocation5 + $0x2c8] sm:$0xff] }
 0x36f   :  { %v6427_v27 = vcombine.high %v2621_v21, %v2625_v22  ;;  %v6426_v34 = vcombine.low %v2621_v21, %v2625_v22  ;;  %v6428_v17 = vcombine.low %v2622_v53, %v2626_v23 }
 0x371   :  { %4076 = vmatpush1.bf16.msra.mxu0 %v6362_v28  ;;  %4158 = vmatpush1.bf16.msra.mxu1 %v6364_v29  ;;  %v6429_v28 = vcombine.high %v2622_v53, %v2626_v23  ;;  %v2629_v29 = vld [vmem:[#allocation5 + $0x300] sm:$0xff] }
 0x372   :  { %4077 = vmatprep.subr.bf16.mxu0 %v6371_v32  ;;  %4159 = vmatprep.subr.bf16.mxu1 %v6373_v33  ;;  %v2633_v32 = vld [vmem:[#allocation5 + $0x320] sm:$0xff]  ;;  %v2630_v33 = vld [vmem:[#allocation5 + $0x308] sm:$0xff] }
 0x373   :  { %v6435_v35 = vcombine.high %v2629_v29, %v2633_v32 }
 0x375   :  { %4078 = vmatpush1.bf16.msra.mxu0 %v6370_v18  ;;  %4160 = vmatpush1.bf16.msra.mxu1 %v6372_v36  ;;  %v6437_v18 = vcombine.high %v2630_v33, %v2634_v13  ;;  %v6434_v36 = vcombine.low %v2629_v29, %v2633_v32 }
 0x376   :  { %4079 = vmatprep.subr.bf16.mxu0 %v6379_v37  ;;  %4161 = vmatprep.subr.bf16.mxu1 %v6381_v38  ;;  %v6436_v37 = vcombine.low %v2630_v33, %v2634_v13  ;;  %v2637_v38 = vld [vmem:[#allocation5 + $0x340] sm:$0xff] }
 0x377   :  { %v6443_v41 = vcombine.high %v2637_v38, %v2641_v39 }
 0x379   :  { %4080 = vmatpush1.bf16.msra.mxu0 %v6378_v44  ;;  %4162 = vmatpush1.bf16.msra.mxu1 %v6380_v45  ;;  %v6442_v44 = vcombine.low %v2637_v38, %v2641_v39  ;;  %v6444_v45 = vcombine.low %v2638_v40, %v2642_v43 }
 0x37a   :  { %4081 = vmatprep.subr.bf16.mxu0 %v6387_v46  ;;  %4163 = vmatprep.subr.bf16.mxu1 %v6389_v47  ;;  %v6445_v46 = vcombine.high %v2638_v40, %v2642_v43  ;;  %v2645_v47 = vld [vmem:[#allocation5 + $0x380] sm:$0xff]  ;;  %v2682_v43 = vld [vmem:[#allocation5 + $0x4a8] sm:$0xff] }
 0x37b   :  { %v6451_v61 = vcombine.high %v2645_v47, %v2649_v48  ;;  %v2681_v40 = vld [vmem:[#allocation5 + $0x4a0] sm:$0xff] }
 0x37d   :  { %4082 = vmatpush1.bf16.msra.mxu0 %v6386_v51  ;;  %4164 = vmatpush1.bf16.msra.mxu1 %v6388_v52  ;;  %v6450_v51 = vcombine.low %v2645_v47, %v2649_v48  ;;  %v6452_v52 = vcombine.low %v2646_v49, %v2650_v50 }
 0x37e   :  { %4083 = vmatprep.subr.bf16.mxu0 %v6395_v54  ;;  %4165 = vmatprep.subr.bf16.mxu1 %v6397_v55  ;;  %v6453_v54 = vcombine.high %v2646_v49, %v2650_v50  ;;  %v2653_v55 = vld [vmem:[#allocation5 + $0x3c0] sm:$0xff]  ;;  %v2686_v50 = vld [vmem:[#allocation5 + $0x4c8] sm:$0xff] }
 0x37f   :  { %v6459_v58 = vcombine.high %v2653_v55, %v2657_v56  ;;  %v2685_v49 = vld [vmem:[#allocation5 + $0x4c0] sm:$0xff] }
 0x381   :  { %4084 = vmatpush1.bf16.msra.mxu0 %v6394_v60  ;;  %4166 = vmatpush1.bf16.msra.mxu1 %v6396_v19  ;;  %v6458_v60 = vcombine.low %v2653_v55, %v2657_v56  ;;  %v6460_v19 = vcombine.low %v2654_v57, %v2658_v59 }
 0x382   :  { %4085 = vmatprep.subr.bf16.mxu0 %v6403_v62  ;;  %4167 = vmatprep.subr.bf16.mxu1 %v6405_v63  ;;  %v6461_v62 = vcombine.high %v2654_v57, %v2658_v59  ;;  %v2661_v63 = vld [vmem:[#allocation5 + $0x400] sm:$0xff]  ;;  %v2694_v59 = vld [vmem:[#allocation5 + $0x508] sm:$0xff] }
 0x383   :  { %v6467_v2 = vcombine.high %v2661_v63, %v2665_v0  ;;  %v2693_v57 = vld [vmem:[#allocation5 + $0x500] sm:$0xff] }
 0x385   :  { %4086 = vmatpush1.bf16.msra.mxu0 %v6402_v4  ;;  %4168 = vmatpush1.bf16.msra.mxu1 %v6404_v5  ;;  %v6466_v4 = vcombine.low %v2661_v63, %v2665_v0  ;;  %v6468_v5 = vcombine.low %v2662_v1, %v2666_v3 }
 0x386   :  { %4087 = vmatprep.subr.bf16.mxu0 %v6411_v6  ;;  %4169 = vmatprep.subr.bf16.mxu1 %v6413_v7  ;;  %v6469_v6 = vcombine.high %v2662_v1, %v2666_v3  ;;  %v2485_v7 = vlaneseq  ;;  %v2701_v1 = vld [vmem:[#allocation5 + $0x540] sm:$0xff]  ;;  %v2702_v3 = vld [vmem:[#allocation5 + $0x548] sm:$0xff] }
 0x388   :  { %v2486_v8 = vshrl.u32 %v2485_v7, 7 }
 0x389   :  { %4088 = vmatpush1.bf16.msra.mxu0 %v6410_v12  ;;  %4170 = vmatpush1.bf16.msra.mxu1 %v6412_v14 }
 0x38a   :  { %4089 = vmatprep.subr.bf16.mxu0 %v6419_v15  ;;  %4171 = vmatprep.subr.bf16.mxu1 %v6421_v20  ;;  %v8095_v9 = vsub.s32 0, %v2486_v8  ;;  %v8097_v10 = vsub.s32 1, %v2486_v8 }
 0x38d   :  { %4090 = vmatpush1.bf16.msra.mxu0 %v6418_v24  ;;  %4172 = vmatpush1.bf16.msra.mxu1 %v6420_v25 }
 0x38e   :  { %4091 = vmatprep.subr.bf16.mxu0 %v6427_v27  ;;  %4173 = vmatprep.subr.bf16.mxu1 %v6429_v28 }
 0x391   :  { %4092 = vmatpush1.bf16.msra.mxu0 %v6426_v34  ;;  %4174 = vmatpush1.bf16.msra.mxu1 %v6428_v17  ;;  %v2669_v17 = vld [vmem:[#allocation5 + $0x440] sm:$0xff] }
 0x392   :  { %4093 = vmatprep.subr.bf16.mxu0 %v6435_v35  ;;  %4175 = vmatprep.subr.bf16.mxu1 %v6437_v18  ;;  %v2673_v18 = vld [vmem:[#allocation5 + $0x460] sm:$0xff] }
 0x395   :  { %4094 = vmatpush1.bf16.msra.mxu0 %v6434_v36  ;;  %4176 = vmatpush1.bf16.msra.mxu1 %v6436_v37  ;;  %v2670_v36 = vld [vmem:[#allocation5 + $0x448] sm:$0xff] }
 0x396   :  { %4095 = vmatprep.subr.bf16.mxu0 %v6443_v41  ;;  %4177 = vmatprep.subr.bf16.mxu1 %v6445_v46  ;;  %v2678_v41 = vld [vmem:[#allocation5 + $0x488] sm:$0xff] }
 0x397   :  { %v6485_v48 = vcombine.high %v2678_v41, %v2682_v43 }
 0x399   :  { %4096 = vmatpush1.bf16.msra.mxu0 %v6442_v44  ;;  %4178 = vmatpush1.bf16.msra.mxu1 %v6444_v45  ;;  %v6474_v45 = vcombine.low %v2669_v17, %v2673_v18 }
 0x39a   :  { %4097 = vmatprep.subr.bf16.mxu0 %v6451_v61  ;;  %4179 = vmatprep.subr.bf16.mxu1 %v6453_v54  ;;  %v2689_v61 = vld [vmem:[#allocation5 + $0x4e0] sm:$0xff]  ;;  %v6484_v54 = vcombine.low %v2678_v41, %v2682_v43  ;;  %v2734_v41 = vld [vmem:[#allocation5 + $0x648] sm:$0xff] }
 0x39b   :  { %v6491_v55 = vcombine.high %v2685_v49, %v2689_v61  ;;  %v2738_v43 = vld [vmem:[#allocation5 + $0x668] sm:$0xff] }
 0x39d   :  { %4098 = vmatpush1.bf16.msra.mxu0 %v6450_v51  ;;  %4180 = vmatpush1.bf16.msra.mxu1 %v6452_v52  ;;  %v2690_v51 = vld [vmem:[#allocation5 + $0x4e8] sm:$0xff] }
 0x39e   :  { %4099 = vmatprep.subr.bf16.mxu0 %v6459_v58  ;;  %4181 = vmatprep.subr.bf16.mxu1 %v6461_v62  ;;  %v6493_v56 = vcombine.high %v2686_v50, %v2690_v51  ;;  %v2697_v58 = vld [vmem:[#allocation5 + $0x520] sm:$0xff]  ;;  %v6492_v62 = vcombine.low %v2686_v50, %v2690_v51  ;;  %v2742_v50 = vld [vmem:[#allocation5 + $0x688] sm:$0xff] }
 0x39f   :  { %v6499_v63 = vcombine.high %v2693_v57, %v2697_v58  ;;  %v2746_v51 = vld [vmem:[#allocation5 + $0x6a8] sm:$0xff] }
 0x3a1   :  { %4100 = vmatpush1.bf16.msra.mxu0 %v6458_v60  ;;  %4182 = vmatpush1.bf16.msra.mxu1 %v6460_v19  ;;  %v2698_v60 = vld [vmem:[#allocation5 + $0x528] sm:$0xff]  ;;  %v6490_v19 = vcombine.low %v2685_v49, %v2689_v61  ;;  %v2741_v49 = vld [vmem:[#allocation5 + $0x680] sm:$0xff] }
 0x3a2   :  { %4110 = vmatprep.subr.bf16.mxu0 %v6467_v2  ;;  %4192 = vmatprep.subr.bf16.mxu1 %v6469_v6  ;;  %v6501_v0 = vcombine.high %v2694_v59, %v2698_v60  ;;  %v2705_v2 = vld [vmem:[#allocation5 + $0x560] sm:$0xff]  ;;  %v6500_v6 = vcombine.low %v2694_v59, %v2698_v60  ;;  %v2750_v59 = vld [vmem:[#allocation5 + $0x6c8] sm:$0xff] }
 0x3a3   :  { %v6507_v7 = vcombine.high %v2701_v1, %v2705_v2  ;;  %v2745_v61 = vld [vmem:[#allocation5 + $0x6a0] sm:$0xff]  ;;  %v2754_v60 = vld [vmem:[#allocation5 + $0x6e8] sm:$0xff] }
 0x437   :  { %v2409_v11 = vpop.f32.mrb[18].mxu0  ;;  %v8099_v12 = vpop.f32.mrb[18].mxu1 }
 0x438   :  { %v2488_v14 = vrot.slane %v2409_v11, %v8095_v9  ;;  %v2411_v15 = vpop.f32.mrb[19].mxu0  ;;  %v2482_v20 = vpop.f32.mrb[19].mxu1  ;;  %v2508_v23 = vrot.slane %v2409_v11, %v8097_v10  ;;  %v2709_v11 = vld [vmem:[#allocation5 + $0x580] sm:$0xff] }
 0x439   :  { %v2492_v21 = vrot.slane %v2411_v15, %v8095_v9  ;;  %v2500_v22 = vrot.slane %v2482_v20, %v8095_v9  ;;  %v2512_v25 = vrot.slane %v2411_v15, %v8097_v10  ;;  %v2520_v28 = vrot.slane %v2482_v20, %v8097_v10  ;;  %v2710_v15 = vld [vmem:[#allocation5 + $0x588] sm:$0xff] }
 0x43a   :  { %v2501_v53 = vmul.f32 %v2488_v14, %v8057_v26  ;;  %v2674_v26 = vld [vmem:[#allocation5 + $0x468] sm:$0xff]  ;;  %v2713_v14 = vld [vmem:[#allocation5 + $0x5a0] sm:$0xff] }
 0x43b   :  { %v2502_v24 = vmul.f32 %v2492_v21, %v8067_v31  ;;  %v2504_v27 = vmul.f32 %v2500_v22, %v8071_v16  ;;  %v2677_v31 = vld [vmem:[#allocation5 + $0x480] sm:$0xff]  ;;  %v6475_v16 = vcombine.high %v2669_v17, %v2673_v18  ;;  %v6477_v39 = vcombine.high %v2670_v36, %v2674_v26  ;;  %v2714_v20 = vld [vmem:[#allocation5 + $0x5a8] sm:$0xff] }
 0x43c   :  { %v2521_v29 = vadd.f32 %v2508_v23, %v2501_v53  ;;  %v6476_v46 = vcombine.low %v2670_v36, %v2674_v26  ;;  %v6483_v47 = vcombine.high %v2677_v31, %v2681_v40  ;;  %v6482_v52 = vcombine.low %v2677_v31, %v2681_v40  ;;  %v2729_v17 = vld [vmem:[#allocation5 + $0x620] sm:$0xff]  ;;  %v2730_v18 = vld [vmem:[#allocation5 + $0x628] sm:$0xff] }
 0x43d   :  { %v2522_v32 = vadd.f32 %v2512_v25, %v2502_v24  ;;  %v2524_v33 = vadd.f32 %v2520_v28, %v2504_v27  ;;  %v6506_v21 = vcombine.low %v2701_v1, %v2705_v2  ;;  %v6515_v53 = vcombine.high %v2709_v11, %v2713_v14  ;;  %v2717_v24 = vld [vmem:[#allocation5 + $0x5c0] sm:$0xff]  ;;  %v2718_v27 = vld [vmem:[#allocation5 + $0x5c8] sm:$0xff] }
 0x43e   :  { %v2525_v13 = vmax.f32 %v2521_v29, 0.0  ;;  %v6517_v23 = vcombine.high %v2710_v15, %v2714_v20  ;;  %v2721_v25 = vld [vmem:[#allocation5 + $0x5e0] sm:$0xff]  ;;  %v2722_v28 = vld [vmem:[#allocation5 + $0x5e8] sm:$0xff]  ;;  %v6514_v29 = vcombine.low %v2709_v11, %v2713_v14 }
 0x43f   :  { %v2526_v34 = vmax.f32 %v2522_v32, 0.0  ;;  %v2528_v35 = vmax.f32 %v2524_v33, 0.0  ;;  %v6516_v32 = vcombine.low %v2710_v15, %v2714_v20  ;;  %v6523_v33 = vcombine.high %v2717_v24, %v2721_v25  ;;  %v2737_v40 = vld [vmem:[#allocation5 + $0x660] sm:$0xff]  ;;  %v2766_v15 = vld [vmem:[#allocation5 + $0x748] sm:$0xff] }
 0x440   :  { %v8112_v38 = vpack.c.bf16 %v2525_v13, %v2525_v13  ;;  %v6525_v13 = vcombine.high %v2718_v27, %v2722_v28  ;;  %v6522_v36 = vcombine.low %v2717_v24, %v2721_v25  ;;  %v6524_v26 = vcombine.low %v2718_v27, %v2722_v28  ;;  %v2757_v1 = vld [vmem:[#allocation5 + $0x700] sm:$0xff]  ;;  %v2770_v20 = vld [vmem:[#allocation5 + $0x768] sm:$0xff] }
 0x441   :  { %v8110_v37 = vpack.c.bf16 %v2526_v34, %v2526_v34  ;;  %v8116_v44 = vpack.c.bf16 %v2528_v35, %v2528_v35  ;;  %v2725_v34 = vld [vmem:[#allocation5 + $0x600] sm:$0xff]  ;;  %v2726_v35 = vld [vmem:[#allocation5 + $0x608] sm:$0xff]  ;;  %v6573_v24 = vcombine.high %v2766_v15, %v2770_v20 }
 0x442   :  { %v6531_v31 = vcombine.high %v2725_v34, %v2729_v17  ;;  %v2761_v2 = vld [vmem:[#allocation5 + $0x720] sm:$0xff]  ;;  %v2774_v28 = vld [vmem:[#allocation5 + $0x788] sm:$0xff] }
 0x443   :  { %4101 = vmatprep.mubr.bf16.mxu0 %v8110_v37  ;;  %4183 = vmatprep.mubr.bf16.mxu1 %v8110_v37  ;;  %v2765_v11 = vld [vmem:[#allocation5 + $0x740] sm:$0xff] }
 0x444   :  { %4102 = vmatmul.mubr.bf16.vlgmr.msra.gmra.mrb[20].mxu0 %v8112_v38  ;;  %4184 = vmatmul.mubr.bf16.vlgmr.msra.gmra.mrb[20].mxu1 %v8112_v38  ;;  %v2769_v14 = vld [vmem:[#allocation5 + $0x760] sm:$0xff] }
 0x445   :  { %4111 = vmatpush1.bf16.msra.mxu0 %v6466_v4  ;;  %4193 = vmatpush1.bf16.msra.mxu1 %v6468_v5  ;;  %v2706_v4 = vld [vmem:[#allocation5 + $0x568] sm:$0xff]  ;;  %v6498_v5 = vcombine.low %v2693_v57, %v2697_v58  ;;  %v2749_v57 = vld [vmem:[#allocation5 + $0x6c0] sm:$0xff] }
 0x446   :  { %4142 = vmatprep.mubr.bf16.mxu0 %v8116_v44  ;;  %4224 = vmatprep.mubr.bf16.mxu1 %v8116_v44  ;;  %v6509_v8 = vcombine.high %v2702_v3, %v2706_v4  ;;  %v6508_v22 = vcombine.low %v2702_v3, %v2706_v4  ;;  %v2753_v58 = vld [vmem:[#allocation5 + $0x6e0] sm:$0xff]  ;;  %v2758_v3 = vld [vmem:[#allocation5 + $0x708] sm:$0xff] }
 0x447   :  { %4112 = vmatprep.subr.bf16.mxu0 %v6475_v16  ;;  %4194 = vmatprep.subr.bf16.mxu1 %v6477_v39  ;;  %v6533_v16 = vcombine.high %v2726_v35, %v2730_v18  ;;  %v2733_v39 = vld [vmem:[#allocation5 + $0x640] sm:$0xff]  ;;  %v2762_v4 = vld [vmem:[#allocation5 + $0x728] sm:$0xff] }
 0x448   :  { %v2773_v25 = vld [vmem:[#allocation5 + $0x780] sm:$0xff] }
 0x449   :  { %4113 = vmatpush1.bf16.msra.mxu0 %v6474_v45  ;;  %4195 = vmatpush1.bf16.msra.mxu1 %v6476_v46  ;;  %v6530_v45 = vcombine.low %v2725_v34, %v2729_v17  ;;  %v6532_v46 = vcombine.low %v2726_v35, %v2730_v18  ;;  %v2777_v27 = vld [vmem:[#allocation5 + $0x7a0] sm:$0xff] }
 0x44a   :  { %4114 = vmatprep.subr.bf16.mxu0 %v6483_v47  ;;  %4196 = vmatprep.subr.bf16.mxu1 %v6485_v48  ;;  %v6539_v47 = vcombine.high %v2733_v39, %v2737_v40  ;;  %v6541_v48 = vcombine.high %v2734_v41, %v2738_v43  ;;  %v6579_v34 = vcombine.high %v2773_v25, %v2777_v27  ;;  %v2781_v35 = vld [vmem:[#allocation5 + $0x7c0] sm:$0xff] }
 0x44b   :  { %v2785_v18 = vld [vmem:[#allocation5 + $0x7e0] sm:$0xff] }
 0x44d   :  { %4115 = vmatpush1.bf16.msra.mxu0 %v6482_v52  ;;  %4197 = vmatpush1.bf16.msra.mxu1 %v6484_v54  ;;  %v6538_v52 = vcombine.low %v2733_v39, %v2737_v40  ;;  %v6540_v54 = vcombine.low %v2734_v41, %v2738_v43  ;;  %v6587_v41 = vcombine.high %v2781_v35, %v2785_v18  ;;  %v2535_v43 = vld [vmem:[#allocation5 + $0x10] sm:$0xff] }
 0x44e   :  { %4116 = vmatprep.subr.bf16.mxu0 %v6491_v55  ;;  %4198 = vmatprep.subr.bf16.mxu1 %v6493_v56  ;;  %v6547_v55 = vcombine.high %v2741_v49, %v2745_v61  ;;  %v6549_v56 = vcombine.high %v2742_v50, %v2746_v51 }
 0x451   :  { %4117 = vmatpush1.bf16.msra.mxu0 %v6490_v19  ;;  %4199 = vmatpush1.bf16.msra.mxu1 %v6492_v62  ;;  %v6546_v19 = vcombine.low %v2741_v49, %v2745_v61  ;;  %v6548_v62 = vcombine.low %v2742_v50, %v2746_v51  ;;  %v2543_v51 = vld [vmem:[#allocation5 + $0x50] sm:$0xff] }
 0x452   :  { %4118 = vmatprep.subr.bf16.mxu0 %v6499_v63  ;;  %4200 = vmatprep.subr.bf16.mxu1 %v6501_v0  ;;  %v6555_v63 = vcombine.high %v2749_v57, %v2753_v58  ;;  %v6557_v0 = vcombine.high %v2750_v59, %v2754_v60 }
 0x455   :  { %4119 = vmatpush1.bf16.msra.mxu0 %v6498_v5  ;;  %4201 = vmatpush1.bf16.msra.mxu1 %v6500_v6  ;;  %v6554_v5 = vcombine.low %v2749_v57, %v2753_v58  ;;  %v6556_v6 = vcombine.low %v2750_v59, %v2754_v60 }
 0x456   :  { %4120 = vmatprep.subr.bf16.mxu0 %v6507_v7  ;;  %4202 = vmatprep.subr.bf16.mxu1 %v6509_v8  ;;  %v6563_v7 = vcombine.high %v2757_v1, %v2761_v2  ;;  %v6565_v8 = vcombine.high %v2758_v3, %v2762_v4 }
 0x459   :  { %4121 = vmatpush1.bf16.msra.mxu0 %v6506_v21  ;;  %4203 = vmatpush1.bf16.msra.mxu1 %v6508_v22  ;;  %v6562_v21 = vcombine.low %v2757_v1, %v2761_v2  ;;  %v6564_v22 = vcombine.low %v2758_v3, %v2762_v4 }
 0x45a   :  { %4122 = vmatprep.subr.bf16.mxu0 %v6515_v53  ;;  %4204 = vmatprep.subr.bf16.mxu1 %v6517_v23  ;;  %v2496_v53 = vrot.slane %v8099_v12, %v8095_v9  ;;  %v6571_v23 = vcombine.high %v2765_v11, %v2769_v14 }
 0x45d   :  { %4123 = vmatpush1.bf16.msra.mxu0 %v6514_v29  ;;  %4205 = vmatpush1.bf16.msra.mxu1 %v6516_v32  ;;  %v2778_v29 = vld [vmem:[#allocation5 + $0x7a8] sm:$0xff]  ;;  %v6570_v32 = vcombine.low %v2765_v11, %v2769_v14 }
 0x45e   :  { %4124 = vmatprep.subr.bf16.mxu0 %v6523_v33  ;;  %4206 = vmatprep.subr.bf16.mxu1 %v6525_v13  ;;  %v6572_v33 = vcombine.low %v2766_v15, %v2770_v20  ;;  %v2503_v13 = vmul.f32 %v2496_v53, %v8062_v30  ;;  %v6581_v17 = vcombine.high %v2774_v28, %v2778_v29  ;;  %v2572_v53 = vld [vmem:[#allocation5 + $0x138] sm:$0xff] }
 0x45f   :  { %v6580_v39 = vcombine.low %v2774_v28, %v2778_v29  ;;  %v2575_v28 = vld [vmem:[#allocation5 + $0x150] sm:$0xff] }
 0x460   :  { %v2579_v29 = vld [vmem:[#allocation5 + $0x170] sm:$0xff] }
 0x461   :  { %4125 = vmatpush1.bf16.msra.mxu0 %v6522_v36  ;;  %4207 = vmatpush1.bf16.msra.mxu1 %v6524_v26  ;;  %v2782_v36 = vld [vmem:[#allocation5 + $0x7c8] sm:$0xff] }
 0x462   :  { %4126 = vmatprep.subr.bf16.mxu0 %v6531_v31  ;;  %4208 = vmatprep.subr.bf16.mxu1 %v6533_v16  ;;  %v2786_v26 = vld [vmem:[#allocation5 + $0x7e8] sm:$0xff]  ;;  %v2516_v31 = vrot.slane %v8099_v12, %v8097_v10  ;;  %v6578_v16 = vcombine.low %v2773_v25, %v2777_v27 }
 0x463   :  { %v6589_v30 = vcombine.high %v2782_v36, %v2786_v26  ;;  %v6588_v49 = vcombine.low %v2782_v36, %v2786_v26  ;;  %v2587_v36 = vld [vmem:[#allocation5 + $0x1b0] sm:$0xff]  ;;  %v2584_v26 = vld [vmem:[#allocation5 + $0x198] sm:$0xff] }
 0x464   :  { %v2523_v40 = vadd.f32 %v2516_v31, %v2503_v13  ;;  %v2588_v31 = vld [vmem:[#allocation5 + $0x1b8] sm:$0xff] }
 0x465   :  { %4127 = vmatpush1.bf16.msra.mxu0 %v6530_v45  ;;  %4209 = vmatpush1.bf16.msra.mxu1 %v6532_v46  ;;  %v2539_v45 = vld [vmem:[#allocation5 + $0x30] sm:$0xff]  ;;  %v2536_v46 = vld [vmem:[#allocation5 + $0x18] sm:$0xff] }
 0x466   :  { %4128 = vmatprep.subr.bf16.mxu0 %v6539_v47  ;;  %4210 = vmatprep.subr.bf16.mxu1 %v6541_v48  ;;  %v2540_v47 = vld [vmem:[#allocation5 + $0x38] sm:$0xff]  ;;  %v6586_v48 = vcombine.low %v2781_v35, %v2785_v18  ;;  %v2527_v61 = vmax.f32 %v2523_v40, 0.0  ;;  %v6343_v12 = vcombine.high %v2535_v43, %v2539_v45  ;;  %v2583_v18 = vld [vmem:[#allocation5 + $0x190] sm:$0xff] }
 0x467   :  { %v6345_v50 = vcombine.high %v2536_v46, %v2540_v47  ;;  %v6344_v58 = vcombine.low %v2536_v46, %v2540_v47  ;;  %v6391_v40 = vcombine.high %v2583_v18, %v2587_v36  ;;  %v2596_v46 = vld [vmem:[#allocation5 + $0x1f8] sm:$0xff]  ;;  %v6390_v47 = vcombine.low %v2583_v18, %v2587_v36 }
 0x468   :  { %v8127_v57 = vpack.c.bf16 %v2527_v61, %v2527_v61  ;;  %v2640_v18 = vld [vmem:[#allocation5 + $0x358] sm:$0xff] }
 0x469   :  { %4129 = vmatpush1.bf16.msra.mxu0 %v6538_v52  ;;  %4211 = vmatpush1.bf16.msra.mxu1 %v6540_v54  ;;  %v2547_v52 = vld [vmem:[#allocation5 + $0x70] sm:$0xff]  ;;  %v2544_v54 = vld [vmem:[#allocation5 + $0x58] sm:$0xff] }
 0x46a   :  { %4130 = vmatprep.subr.bf16.mxu0 %v6547_v55  ;;  %4212 = vmatprep.subr.bf16.mxu1 %v6549_v56  ;;  %v2548_v55 = vld [vmem:[#allocation5 + $0x78] sm:$0xff]  ;;  %v6342_v56 = vcombine.low %v2535_v43, %v2539_v45  ;;  %v6351_v59 = vcombine.high %v2543_v51, %v2547_v52  ;;  %v6350_v1 = vcombine.low %v2543_v51, %v2547_v52  ;;  %v2595_v43 = vld [vmem:[#allocation5 + $0x1f0] sm:$0xff] }
 0x46b   :  { %v6353_v60 = vcombine.high %v2544_v54, %v2548_v55  ;;  %v6352_v2 = vcombine.low %v2544_v54, %v2548_v55  ;;  %v2592_v45 = vld [vmem:[#allocation5 + $0x1d8] sm:$0xff] }
 0x46c   :  { %v6401_v61 = vcombine.high %v2592_v45, %v2596_v46  ;;  %v2600_v51 = vld [vmem:[#allocation5 + $0x218] sm:$0xff]  ;;  %v6400_v55 = vcombine.low %v2592_v45, %v2596_v46 }
 0x46d   :  { %4131 = vmatpush1.bf16.msra.mxu0 %v6546_v19  ;;  %4213 = vmatpush1.bf16.msra.mxu1 %v6548_v62  ;;  %v2551_v19 = vld [vmem:[#allocation5 + $0x90] sm:$0xff]  ;;  %v2604_v52 = vld [vmem:[#allocation5 + $0x238] sm:$0xff] }
 0x46e   :  { %4132 = vmatprep.subr.bf16.mxu0 %v6555_v63  ;;  %4214 = vmatprep.subr.bf16.mxu1 %v6557_v0  ;;  %v2555_v62 = vld [vmem:[#allocation5 + $0xb0] sm:$0xff]  ;;  %v2552_v63 = vld [vmem:[#allocation5 + $0x98] sm:$0xff] }
 0x46f   :  { %v2556_v0 = vld [vmem:[#allocation5 + $0xb8] sm:$0xff]  ;;  %v6359_v3 = vcombine.high %v2551_v19, %v2555_v62  ;;  %v6358_v11 = vcombine.low %v2551_v19, %v2555_v62 }
 0x470   :  { %v6361_v4 = vcombine.high %v2552_v63, %v2556_v0  ;;  %v6360_v14 = vcombine.low %v2552_v63, %v2556_v0  ;;  %v2608_v19 = vld [vmem:[#allocation5 + $0x258] sm:$0xff]  ;;  %v6408_v0 = vcombine.low %v2600_v51, %v2604_v52 }
 0x471   :  { %4133 = vmatpush1.bf16.msra.mxu0 %v6554_v5  ;;  %4215 = vmatpush1.bf16.msra.mxu1 %v6556_v6  ;;  %v2559_v5 = vld [vmem:[#allocation5 + $0xd0] sm:$0xff]  ;;  %v2612_v62 = vld [vmem:[#allocation5 + $0x278] sm:$0xff] }
 0x472   :  { %4134 = vmatprep.subr.bf16.mxu0 %v6563_v7  ;;  %4216 = vmatprep.subr.bf16.mxu1 %v6565_v8  ;;  %v2563_v6 = vld [vmem:[#allocation5 + $0xf0] sm:$0xff]  ;;  %v2560_v7 = vld [vmem:[#allocation5 + $0xd8] sm:$0xff] }
 0x473   :  { %v2564_v8 = vld [vmem:[#allocation5 + $0xf8] sm:$0xff]  ;;  %v6367_v15 = vcombine.high %v2559_v5, %v2563_v6 }
 0x474   :  { %v6369_v20 = vcombine.high %v2560_v7, %v2564_v8  ;;  %v2644_v36 = vld [vmem:[#allocation5 + $0x378] sm:$0xff] }
 0x475   :  { %4135 = vmatpush1.bf16.msra.mxu0 %v6562_v21  ;;  %4217 = vmatpush1.bf16.msra.mxu1 %v6564_v22  ;;  %v2567_v21 = vld [vmem:[#allocation5 + $0x110] sm:$0xff]  ;;  %v6448_v46 = vcombine.low %v2640_v18, %v2644_v36 }
 0x476   :  { %4136 = vmatprep.subr.bf16.mxu0 %v6571_v23  ;;  %4218 = vmatprep.subr.bf16.mxu1 %v6573_v24  ;;  %v2571_v22 = vld [vmem:[#allocation5 + $0x130] sm:$0xff]  ;;  %v6366_v23 = vcombine.low %v2559_v5, %v2563_v6  ;;  %v6368_v24 = vcombine.low %v2560_v7, %v2564_v8  ;;  %v2616_v5 = vld [vmem:[#allocation5 + $0x298] sm:$0xff]  ;;  %v6416_v8 = vcombine.low %v2608_v19, %v2612_v62 }
 0x477   :  { %v6375_v25 = vcombine.high %v2567_v21, %v2571_v22  ;;  %v6374_v13 = vcombine.low %v2567_v21, %v2571_v22  ;;  %v2620_v6 = vld [vmem:[#allocation5 + $0x2b8] sm:$0xff] }
 0x478   :  { %v2624_v21 = vld [vmem:[#allocation5 + $0x2d8] sm:$0xff] }
 0x479   :  { %4137 = vmatpush1.bf16.msra.mxu0 %v6570_v32  ;;  %4219 = vmatpush1.bf16.msra.mxu1 %v6572_v33  ;;  %v2576_v32 = vld [vmem:[#allocation5 + $0x158] sm:$0xff] }
 0x47a   :  { %4138 = vmatprep.subr.bf16.mxu0 %v6579_v34  ;;  %4220 = vmatprep.subr.bf16.mxu1 %v6581_v17  ;;  %v2580_v33 = vld [vmem:[#allocation5 + $0x178] sm:$0xff]  ;;  %v6383_v17 = vcombine.high %v2575_v28, %v2579_v29 }
 0x47b   :  { %v6385_v35 = vcombine.high %v2576_v32, %v2580_v33  ;;  %v2628_v22 = vld [vmem:[#allocation5 + $0x2f8] sm:$0xff] }
 0x47d   :  { %4139 = vmatpush1.bf16.msra.mxu0 %v6578_v16  ;;  %4221 = vmatpush1.bf16.msra.mxu1 %v6580_v39  ;;  %v6382_v16 = vcombine.low %v2575_v28, %v2579_v29  ;;  %v6384_v39 = vcombine.low %v2576_v32, %v2580_v33  ;;  %v2632_v28 = vld [vmem:[#allocation5 + $0x318] sm:$0xff]  ;;  %v6432_v33 = vcombine.low %v2624_v21, %v2628_v22 }
 0x47e   :  { %4140 = vmatprep.subr.bf16.mxu0 %v6587_v41  ;;  %4222 = vmatprep.subr.bf16.mxu1 %v6589_v30  ;;  %v6393_v41 = vcombine.high %v2584_v26, %v2588_v31  ;;  %v2591_v30 = vld [vmem:[#allocation5 + $0x1d0] sm:$0xff]  ;;  %v2636_v29 = vld [vmem:[#allocation5 + $0x338] sm:$0xff] }
 0x47f   :  { %v6398_v54 = vcombine.low %v2591_v30, %v2595_v43 }
 0x481   :  { %4141 = vmatpush1.bf16.msra.mxu0 %v6586_v48  ;;  %4223 = vmatpush1.bf16.msra.mxu1 %v6588_v49  ;;  %v6392_v48 = vcombine.low %v2584_v26, %v2588_v31  ;;  %v6399_v49 = vcombine.high %v2591_v30, %v2595_v43  ;;  %v6440_v31 = vcombine.low %v2632_v28, %v2636_v29  ;;  %v2648_v30 = vld [vmem:[#allocation5 + $0x398] sm:$0xff] }
 0x482   :  { %4233 = vmatprep.subr.bf16.mxu0 %v6343_v12  ;;  %4315 = vmatprep.subr.bf16.mxu1 %v6345_v50  ;;  %v2599_v12 = vld [vmem:[#allocation5 + $0x210] sm:$0xff]  ;;  %v2652_v43 = vld [vmem:[#allocation5 + $0x3b8] sm:$0xff] }
 0x483   :  { %v2603_v50 = vld [vmem:[#allocation5 + $0x230] sm:$0xff] }
 0x484   :  { %4143 = vmatmul.mubr.bf16.vlgmr.msra.gmra.mrb[20].mxu0 %v8127_v57  ;;  %4225 = vmatmul.mubr.bf16.vlgmr.msra.gmra.mrb[20].mxu1 %v8127_v57  ;;  %v6406_v63 = vcombine.low %v2599_v12, %v2603_v50 }
 0x485   :  { %4234 = vmatpush1.bf16.msra.mxu0 %v6342_v56  ;;  %4265 = vmatprep.mubr.bf16.mxu0 %v8110_v37  ;;  %v6407_v56 = vcombine.high %v2599_v12, %v2603_v50  ;;  %v2656_v12 = vld [vmem:[#allocation5 + $0x3d8] sm:$0xff] }
 0x486   :  { %4316 = vmatpush1.bf16.msra.mxu1 %v6344_v58  ;;  %4347 = vmatprep.mubr.bf16.mxu1 %v8110_v37  ;;  %v2568_v37 = vld [vmem:[#allocation5 + $0x118] sm:$0xff]  ;;  %v6409_v58 = vcombine.high %v2600_v51, %v2604_v52  ;;  %v6456_v52 = vcombine.low %v2648_v30, %v2652_v43 }
 0x487   :  { %4235 = vmatprep.subr.bf16.mxu0 %v6351_v59  ;;  %4317 = vmatprep.subr.bf16.mxu1 %v6353_v60  ;;  %v6377_v27 = vcombine.high %v2568_v37, %v2572_v53  ;;  %v6376_v34 = vcombine.low %v2568_v37, %v2572_v53  ;;  %v2607_v59 = vld [vmem:[#allocation5 + $0x250] sm:$0xff]  ;;  %v6424_v53 = vcombine.low %v2616_v5, %v2620_v6  ;;  %v2660_v50 = vld [vmem:[#allocation5 + $0x3f8] sm:$0xff] }
 0x488   :  { %v2611_v60 = vld [vmem:[#allocation5 + $0x270] sm:$0xff] }
 0x489   :  { %4236 = vmatpush1.bf16.msra.mxu0 %v6350_v1  ;;  %v6415_v1 = vcombine.high %v2607_v59, %v2611_v60  ;;  %v6414_v7 = vcombine.low %v2607_v59, %v2611_v60  ;;  %v2664_v59 = vld [vmem:[#allocation5 + $0x418] sm:$0xff] }
 0x48a   :  { %4318 = vmatpush1.bf16.msra.mxu1 %v6352_v2  ;;  %4237 = vmatprep.subr.bf16.mxu0 %v6359_v3  ;;  %v6417_v2 = vcombine.high %v2608_v19, %v2612_v62  ;;  %v2615_v3 = vld [vmem:[#allocation5 + $0x290] sm:$0xff]  ;;  %v2668_v60 = vld [vmem:[#allocation5 + $0x438] sm:$0xff]  ;;  %v6464_v62 = vcombine.low %v2656_v12, %v2660_v50 }
 0x48b   :  { %4319 = vmatprep.subr.bf16.mxu1 %v6361_v4  ;;  %v2619_v4 = vld [vmem:[#allocation5 + $0x2b0] sm:$0xff] }
 0x48c   :  { %v6422_v37 = vcombine.low %v2615_v3, %v2619_v4 }
 0x48d   :  { %4238 = vmatpush1.bf16.msra.mxu0 %v6358_v11  ;;  %v6423_v11 = vcombine.high %v2615_v3, %v2619_v4  ;;  %v2672_v4 = vld [vmem:[#allocation5 + $0x458] sm:$0xff] }
 0x48e   :  { %4320 = vmatpush1.bf16.msra.mxu1 %v6360_v14  ;;  %4239 = vmatprep.subr.bf16.mxu0 %v6367_v15  ;;  %v6425_v14 = vcombine.high %v2616_v5, %v2620_v6  ;;  %v2623_v15 = vld [vmem:[#allocation5 + $0x2d0] sm:$0xff]  ;;  %v2676_v5 = vld [vmem:[#allocation5 + $0x478] sm:$0xff]  ;;  %v6472_v6 = vcombine.low %v2664_v59, %v2668_v60 }
 0x48f   :  { %4321 = vmatprep.subr.bf16.mxu1 %v6369_v20  ;;  %v2627_v20 = vld [vmem:[#allocation5 + $0x2f0] sm:$0xff] }
 0x490   :  { %v6430_v32 = vcombine.low %v2623_v15, %v2627_v20 }
 0x491   :  { %4240 = vmatpush1.bf16.msra.mxu0 %v6366_v23  ;;  %v6431_v23 = vcombine.high %v2623_v15, %v2627_v20  ;;  %v2680_v15 = vld [vmem:[#allocation5 + $0x498] sm:$0xff] }
 0x492   :  { %4322 = vmatpush1.bf16.msra.mxu1 %v6368_v24  ;;  %4241 = vmatprep.subr.bf16.mxu0 %v6375_v25  ;;  %v6433_v24 = vcombine.high %v2624_v21, %v2628_v22  ;;  %v2631_v25 = vld [vmem:[#allocation5 + $0x310] sm:$0xff]  ;;  %v2684_v20 = vld [vmem:[#allocation5 + $0x4b8] sm:$0xff]  ;;  %v6480_v22 = vcombine.low %v2672_v4, %v2676_v5 }
 0x493   :  { %4323 = vmatprep.subr.bf16.mxu1 %v6377_v27  ;;  %v2635_v27 = vld [vmem:[#allocation5 + $0x330] sm:$0xff] }
 0x494   :  { %v6438_v26 = vcombine.low %v2631_v25, %v2635_v27 }
 0x495   :  { %4242 = vmatpush1.bf16.msra.mxu0 %v6374_v13  ;;  %v6439_v13 = vcombine.high %v2631_v25, %v2635_v27  ;;  %v2688_v25 = vld [vmem:[#allocation5 + $0x4d8] sm:$0xff] }
 0x496   :  { %4324 = vmatpush1.bf16.msra.mxu1 %v6376_v34  ;;  %4243 = vmatprep.subr.bf16.mxu0 %v6383_v17  ;;  %v6441_v34 = vcombine.high %v2632_v28, %v2636_v29  ;;  %v2639_v17 = vld [vmem:[#allocation5 + $0x350] sm:$0xff]  ;;  %v2692_v27 = vld [vmem:[#allocation5 + $0x4f8] sm:$0xff] }
 0x497   :  { %4325 = vmatprep.subr.bf16.mxu1 %v6385_v35  ;;  %v2643_v35 = vld [vmem:[#allocation5 + $0x370] sm:$0xff] }
 0x498   :  { %v6446_v45 = vcombine.low %v2639_v17, %v2643_v35 }
 0x499   :  { %4244 = vmatpush1.bf16.msra.mxu0 %v6382_v16  ;;  %v6447_v16 = vcombine.high %v2639_v17, %v2643_v35  ;;  %v2700_v17 = vld [vmem:[#allocation5 + $0x538] sm:$0xff]  ;;  %v6496_v35 = vcombine.low %v2688_v25, %v2692_v27 }
 0x49a   :  { %4326 = vmatpush1.bf16.msra.mxu1 %v6384_v39  ;;  %4245 = vmatprep.subr.bf16.mxu0 %v6391_v40  ;;  %v6449_v39 = vcombine.high %v2640_v18, %v2644_v36  ;;  %v2647_v40 = vld [vmem:[#allocation5 + $0x390] sm:$0xff] }
 0x49b   :  { %4327 = vmatprep.subr.bf16.mxu1 %v6393_v41  ;;  %v2651_v41 = vld [vmem:[#allocation5 + $0x3b0] sm:$0xff] }
 0x49c   :  { %v6454_v51 = vcombine.low %v2647_v40, %v2651_v41 }
 0x49d   :  { %4246 = vmatpush1.bf16.msra.mxu0 %v6390_v47  ;;  %v6455_v47 = vcombine.high %v2647_v40, %v2651_v41 }
 0x49e   :  { %4328 = vmatpush1.bf16.msra.mxu1 %v6392_v48  ;;  %4247 = vmatprep.subr.bf16.mxu0 %v6399_v49  ;;  %v6457_v48 = vcombine.high %v2648_v30, %v2652_v43  ;;  %v2655_v49 = vld [vmem:[#allocation5 + $0x3d0] sm:$0xff] }
 0x49f   :  { %4329 = vmatprep.subr.bf16.mxu1 %v6401_v61  ;;  %v2659_v61 = vld [vmem:[#allocation5 + $0x3f0] sm:$0xff] }
 0x4a0   :  { %v6462_v19 = vcombine.low %v2655_v49, %v2659_v61 }
 0x4a1   :  { %4248 = vmatpush1.bf16.msra.mxu0 %v6398_v54  ;;  %v6463_v54 = vcombine.high %v2655_v49, %v2659_v61 }
 0x4a2   :  { %4330 = vmatpush1.bf16.msra.mxu1 %v6400_v55  ;;  %4249 = vmatprep.subr.bf16.mxu0 %v6407_v56  ;;  %v6465_v55 = vcombine.high %v2656_v12, %v2660_v50  ;;  %v2663_v56 = vld [vmem:[#allocation5 + $0x410] sm:$0xff] }
 0x4a3   :  { %4331 = vmatprep.subr.bf16.mxu1 %v6409_v58  ;;  %v2667_v58 = vld [vmem:[#allocation5 + $0x430] sm:$0xff] }
 0x4a4   :  { %v6470_v3 = vcombine.low %v2663_v56, %v2667_v58 }
 0x4a5   :  { %4250 = vmatpush1.bf16.msra.mxu0 %v6406_v63  ;;  %v6471_v63 = vcombine.high %v2663_v56, %v2667_v58 }
 0x4a6   :  { %4332 = vmatpush1.bf16.msra.mxu1 %v6408_v0  ;;  %4251 = vmatprep.subr.bf16.mxu0 %v6415_v1  ;;  %v6473_v0 = vcombine.high %v2664_v59, %v2668_v60  ;;  %v2671_v1 = vld [vmem:[#allocation5 + $0x450] sm:$0xff] }
 0x4a7   :  { %4333 = vmatprep.subr.bf16.mxu1 %v6417_v2  ;;  %v2675_v2 = vld [vmem:[#allocation5 + $0x470] sm:$0xff] }
 0x4a8   :  { %v6478_v21 = vcombine.low %v2671_v1, %v2675_v2 }
 0x4a9   :  { %4252 = vmatpush1.bf16.msra.mxu0 %v6414_v7  ;;  %v6479_v7 = vcombine.high %v2671_v1, %v2675_v2 }
 0x4aa   :  { %4334 = vmatpush1.bf16.msra.mxu1 %v6416_v8  ;;  %4253 = vmatprep.subr.bf16.mxu0 %v6423_v11  ;;  %v2679_v8 = vld [vmem:[#allocation5 + $0x490] sm:$0xff] }
 0x4ab   :  { %4335 = vmatprep.subr.bf16.mxu1 %v6425_v14  ;;  %v2683_v11 = vld [vmem:[#allocation5 + $0x4b0] sm:$0xff]  ;;  %v6481_v14 = vcombine.high %v2672_v4, %v2676_v5 }
 0x4ac   :  { %v6486_v28 = vcombine.low %v2679_v8, %v2683_v11  ;;  %v2735_v5 = vld [vmem:[#allocation5 + $0x650] sm:$0xff] }
 0x4ad   :  { %4254 = vmatpush1.bf16.msra.mxu0 %v6422_v37  ;;  %v6487_v37 = vcombine.high %v2679_v8, %v2683_v11  ;;  %v2740_v8 = vld [vmem:[#allocation5 + $0x678] sm:$0xff] }
 0x4ae   :  { %4336 = vmatpush1.bf16.msra.mxu1 %v6424_v53  ;;  %4255 = vmatprep.subr.bf16.mxu0 %v6431_v23  ;;  %v6489_v53 = vcombine.high %v2680_v15, %v2684_v20  ;;  %v2687_v23 = vld [vmem:[#allocation5 + $0x4d0] sm:$0xff] }
 0x4af   :  { %4337 = vmatprep.subr.bf16.mxu1 %v6433_v24  ;;  %v2691_v24 = vld [vmem:[#allocation5 + $0x4f0] sm:$0xff] }
 0x4b0   :  { %v6495_v29 = vcombine.high %v2687_v23, %v2691_v24 }
 0x4b1   :  { %4256 = vmatpush1.bf16.msra.mxu0 %v6430_v32  ;;  %v6497_v32 = vcombine.high %v2688_v25, %v2692_v27 }
 0x4b2   :  { %4338 = vmatpush1.bf16.msra.mxu1 %v6432_v33  ;;  %4257 = vmatprep.subr.bf16.mxu0 %v6439_v13  ;;  %v2695_v33 = vld [vmem:[#allocation5 + $0x510] sm:$0xff] }
 0x4b3   :  { %4339 = vmatprep.subr.bf16.mxu1 %v6441_v34  ;;  %v2699_v13 = vld [vmem:[#allocation5 + $0x530] sm:$0xff]  ;;  %v2696_v34 = vld [vmem:[#allocation5 + $0x518] sm:$0xff] }
 0x4b4   :  { %v6503_v18 = vcombine.high %v2695_v33, %v2699_v13  ;;  %v6505_v36 = vcombine.high %v2696_v34, %v2700_v17  ;;  %v6502_v40 = vcombine.low %v2695_v33, %v2699_v13  ;;  %v6504_v41 = vcombine.low %v2696_v34, %v2700_v17 }
 0x4b5   :  { %4258 = vmatpush1.bf16.msra.mxu0 %v6438_v26  ;;  %v2703_v26 = vld [vmem:[#allocation5 + $0x550] sm:$0xff] }
 0x4b6   :  { %4340 = vmatpush1.bf16.msra.mxu1 %v6440_v31  ;;  %4259 = vmatprep.subr.bf16.mxu0 %v6447_v16  ;;  %v2707_v31 = vld [vmem:[#allocation5 + $0x570] sm:$0xff]  ;;  %v2704_v16 = vld [vmem:[#allocation5 + $0x558] sm:$0xff] }
 0x4b7   :  { %4341 = vmatprep.subr.bf16.mxu1 %v6449_v39  ;;  %v2708_v39 = vld [vmem:[#allocation5 + $0x578] sm:$0xff]  ;;  %v6511_v30 = vcombine.high %v2703_v26, %v2707_v31  ;;  %v6510_v49 = vcombine.low %v2703_v26, %v2707_v31 }
 0x4b8   :  { %v6513_v43 = vcombine.high %v2704_v16, %v2708_v39  ;;  %v6512_v61 = vcombine.low %v2704_v16, %v2708_v39 }
 0x4b9   :  { %4260 = vmatpush1.bf16.msra.mxu0 %v6446_v45  ;;  %v2711_v45 = vld [vmem:[#allocation5 + $0x590] sm:$0xff] }
 0x4ba   :  { %4342 = vmatpush1.bf16.msra.mxu1 %v6448_v46  ;;  %4261 = vmatprep.subr.bf16.mxu0 %v6455_v47  ;;  %v2715_v46 = vld [vmem:[#allocation5 + $0x5b0] sm:$0xff]  ;;  %v2712_v47 = vld [vmem:[#allocation5 + $0x598] sm:$0xff] }
 0x4bb   :  { %4343 = vmatprep.subr.bf16.mxu1 %v6457_v48  ;;  %v2716_v48 = vld [vmem:[#allocation5 + $0x5b8] sm:$0xff]  ;;  %v6519_v12 = vcombine.high %v2711_v45, %v2715_v46  ;;  %v6518_v56 = vcombine.low %v2711_v45, %v2715_v46 }
 0x4bc   :  { %v6521_v50 = vcombine.high %v2712_v47, %v2716_v48  ;;  %v6520_v58 = vcombine.low %v2712_v47, %v2716_v48 }
 0x4bd   :  { %4262 = vmatpush1.bf16.msra.mxu0 %v6454_v51  ;;  %v2719_v51 = vld [vmem:[#allocation5 + $0x5d0] sm:$0xff] }
 0x4be   :  { %4344 = vmatpush1.bf16.msra.mxu1 %v6456_v52  ;;  %4263 = vmatprep.subr.bf16.mxu0 %v6463_v54  ;;  %v2723_v52 = vld [vmem:[#allocation5 + $0x5f0] sm:$0xff]  ;;  %v2720_v54 = vld [vmem:[#allocation5 + $0x5d8] sm:$0xff] }
 0x4bf   :  { %4345 = vmatprep.subr.bf16.mxu1 %v6465_v55  ;;  %v2724_v55 = vld [vmem:[#allocation5 + $0x5f8] sm:$0xff]  ;;  %v6527_v59 = vcombine.high %v2719_v51, %v2723_v52  ;;  %v6526_v1 = vcombine.low %v2719_v51, %v2723_v52 }
 0x4c0   :  { %v6529_v60 = vcombine.high %v2720_v54, %v2724_v55  ;;  %v6528_v2 = vcombine.low %v2720_v54, %v2724_v55 }
 0x4c1   :  { %4264 = vmatpush1.bf16.msra.mxu0 %v6462_v19  ;;  %v2727_v19 = vld [vmem:[#allocation5 + $0x610] sm:$0xff] }
 0x4c2   :  { %4346 = vmatpush1.bf16.msra.mxu1 %v6464_v62  ;;  %4274 = vmatprep.subr.bf16.mxu0 %v6471_v63  ;;  %v2731_v62 = vld [vmem:[#allocation5 + $0x630] sm:$0xff]  ;;  %v2728_v63 = vld [vmem:[#allocation5 + $0x618] sm:$0xff] }
 0x4c3   :  { %4356 = vmatprep.subr.bf16.mxu1 %v6473_v0  ;;  %v2732_v0 = vld [vmem:[#allocation5 + $0x638] sm:$0xff]  ;;  %v6534_v11 = vcombine.low %v2727_v19, %v2731_v62 }
 0x4c4   :  { %4266 = vmatmul.mubr.bf16.vlgmr.msra.gmra.mrb[24].mxu0 %v8112_v38  ;;  %v6537_v4 = vcombine.high %v2728_v63, %v2732_v0 }
 0x4c5   :  { %4348 = vmatmul.mubr.bf16.vlgmr.msra.gmra.mrb[24].mxu1 %v8112_v38  ;;  %4275 = vmatpush1.bf16.msra.mxu0 %v6470_v3  ;;  %v6488_v38 = vcombine.low %v2680_v15, %v2684_v20  ;;  %v6535_v3 = vcombine.high %v2727_v19, %v2731_v62 }
 0x4c6   :  { %4306 = vmatprep.mubr.bf16.mxu0 %v8116_v44  ;;  %4357 = vmatpush1.bf16.msra.mxu1 %v6472_v6  ;;  %v2739_v6 = vld [vmem:[#allocation5 + $0x670] sm:$0xff] }
 0x4c7   :  { %4388 = vmatprep.mubr.bf16.mxu1 %v8116_v44  ;;  %4276 = vmatprep.subr.bf16.mxu0 %v6479_v7  ;;  %v6494_v44 = vcombine.low %v2687_v23, %v2691_v24  ;;  %v2736_v7 = vld [vmem:[#allocation5 + $0x658] sm:$0xff]  ;;  %v6543_v15 = vcombine.high %v2735_v5, %v2739_v6  ;;  %v6542_v23 = vcombine.low %v2735_v5, %v2739_v6  ;;  %v4413_v6 = vld [vmem:[#allocation10 + $0x200] sm:$0xff] }
 0x4c8   :  { %4358 = vmatprep.subr.bf16.mxu1 %v6481_v14  ;;  %v6536_v14 = vcombine.low %v2728_v63, %v2732_v0  ;;  %v6545_v20 = vcombine.high %v2736_v7, %v2740_v8  ;;  %v6544_v24 = vcombine.low %v2736_v7, %v2740_v8  ;;  %v4414_v7 = vld [vmem:[#allocation10 + $0x208] sm:$0xff]  ;;  %v4431_v8 = vld [vmem:[#allocation10 + $0x290] sm:$0xff] }
 0x4c9   :  { %4277 = vmatpush1.bf16.msra.mxu0 %v6478_v21  ;;  %v2743_v21 = vld [vmem:[#allocation5 + $0x690] sm:$0xff] }
 0x4ca   :  { %4359 = vmatpush1.bf16.msra.mxu1 %v6480_v22  ;;  %4278 = vmatprep.subr.bf16.mxu0 %v6487_v37  ;;  %v2747_v22 = vld [vmem:[#allocation5 + $0x6b0] sm:$0xff]  ;;  %v2744_v37 = vld [vmem:[#allocation5 + $0x698] sm:$0xff] }
 0x4cb   :  { %4360 = vmatprep.subr.bf16.mxu1 %v6489_v53  ;;  %v2748_v53 = vld [vmem:[#allocation5 + $0x6b8] sm:$0xff]  ;;  %v6551_v25 = vcombine.high %v2743_v21, %v2747_v22  ;;  %v6550_v33 = vcombine.low %v2743_v21, %v2747_v22  ;;  %v4433_v22 = vld [vmem:[#allocation10 + $0x2a0] sm:$0xff] }
 0x4cc   :  { %v6553_v27 = vcombine.high %v2744_v37, %v2748_v53  ;;  %v6552_v13 = vcombine.low %v2744_v37, %v2748_v53  ;;  %v4416_v21 = vld [vmem:[#allocation10 + $0x218] sm:$0xff]  ;;  %v4434_v37 = vld [vmem:[#allocation10 + $0x2a8] sm:$0xff] }
 0x4cd   :  { %4279 = vmatpush1.bf16.msra.mxu0 %v6486_v28  ;;  %v2751_v28 = vld [vmem:[#allocation5 + $0x6d0] sm:$0xff] }
 0x4ce   :  { %4361 = vmatpush1.bf16.msra.mxu1 %v6488_v38  ;;  %4280 = vmatprep.subr.bf16.mxu0 %v6495_v29  ;;  %v2755_v38 = vld [vmem:[#allocation5 + $0x6f0] sm:$0xff]  ;;  %v2752_v29 = vld [vmem:[#allocation5 + $0x6d8] sm:$0xff] }
 0x4cf   :  { %4362 = vmatprep.subr.bf16.mxu1 %v6497_v32  ;;  %v2756_v32 = vld [vmem:[#allocation5 + $0x6f8] sm:$0xff]  ;;  %v6559_v34 = vcombine.high %v2751_v28, %v2755_v38  ;;  %v6558_v26 = vcombine.low %v2751_v28, %v2755_v38 }
 0x4d0   :  { %v6561_v17 = vcombine.high %v2752_v29, %v2756_v32  ;;  %v6560_v31 = vcombine.low %v2752_v29, %v2756_v32  ;;  %v4436_v28 = vld [vmem:[#allocation10 + $0x2b8] sm:$0xff]  ;;  %v4419_v32 = vld [vmem:[#allocation10 + $0x230] sm:$0xff] }
 0x4d1   :  { %4281 = vmatpush1.bf16.msra.mxu0 %v6494_v44  ;;  %v2759_v44 = vld [vmem:[#allocation5 + $0x710] sm:$0xff] }
 0x4d2   :  { %4363 = vmatpush1.bf16.msra.mxu1 %v6496_v35  ;;  %4282 = vmatprep.subr.bf16.mxu0 %v6503_v18  ;;  %v2763_v35 = vld [vmem:[#allocation5 + $0x730] sm:$0xff]  ;;  %v2760_v18 = vld [vmem:[#allocation5 + $0x718] sm:$0xff] }
 0x4d3   :  { %4364 = vmatprep.subr.bf16.mxu1 %v6505_v36  ;;  %v2764_v36 = vld [vmem:[#allocation5 + $0x738] sm:$0xff]  ;;  %v6567_v16 = vcombine.high %v2759_v44, %v2763_v35  ;;  %v6566_v45 = vcombine.low %v2759_v44, %v2763_v35  ;;  %v4421_v44 = vld [vmem:[#allocation10 + $0x240] sm:$0xff]  ;;  %v4422_v35 = vld [vmem:[#allocation10 + $0x248] sm:$0xff] }
 0x4d4   :  { %v6569_v39 = vcombine.high %v2760_v18, %v2764_v36  ;;  %v6568_v46 = vcombine.low %v2760_v18, %v2764_v36  ;;  %v7253_v18 = vpack.c.bf16 %v4422_v35, %v4421_v44  ;;  %v4439_v36 = vld [vmem:[#allocation10 + $0x2d0] sm:$0xff]  ;;  %v4559_v44 = vld [vmem:[#allocation11 + $0x128] sm:$0xff] }
 0x4d5   :  { %4283 = vmatpush1.bf16.msra.mxu0 %v6502_v40  ;;  %v2767_v40 = vld [vmem:[#allocation5 + $0x750] sm:$0xff]  ;;  %v4561_v35 = vld [vmem:[#allocation11 + $0x168] sm:$0xff] }
 0x4d6   :  { %4365 = vmatpush1.bf16.msra.mxu1 %v6504_v41  ;;  %4284 = vmatprep.subr.bf16.mxu0 %v6511_v30  ;;  %v2771_v41 = vld [vmem:[#allocation5 + $0x770] sm:$0xff]  ;;  %v2768_v30 = vld [vmem:[#allocation5 + $0x758] sm:$0xff] }
 0x4d7   :  { %4366 = vmatprep.subr.bf16.mxu1 %v6513_v43  ;;  %v2772_v43 = vld [vmem:[#allocation5 + $0x778] sm:$0xff]  ;;  %v6575_v47 = vcombine.high %v2767_v40, %v2771_v41  ;;  %v6574_v51 = vcombine.low %v2767_v40, %v2771_v41  ;;  %v4423_v40 = vld [vmem:[#allocation10 + $0x250] sm:$0xff] }
 0x4d8   :  { %v6577_v48 = vcombine.high %v2768_v30, %v2772_v43  ;;  %v6576_v52 = vcombine.low %v2768_v30, %v2772_v43  ;;  %v4424_v41 = vld [vmem:[#allocation10 + $0x258] sm:$0xff] }
 0x4d9   :  { %4285 = vmatpush1.bf16.msra.mxu0 %v6510_v49  ;;  %v2775_v49 = vld [vmem:[#allocation5 + $0x790] sm:$0xff] }
 0x4da   :  { %4367 = vmatpush1.bf16.msra.mxu1 %v6512_v61  ;;  %4286 = vmatprep.subr.bf16.mxu0 %v6519_v12  ;;  %v2779_v61 = vld [vmem:[#allocation5 + $0x7b0] sm:$0xff]  ;;  %v2776_v12 = vld [vmem:[#allocation5 + $0x798] sm:$0xff] }
 0x4db   :  { %4368 = vmatprep.subr.bf16.mxu1 %v6521_v50  ;;  %v2780_v50 = vld [vmem:[#allocation5 + $0x7b8] sm:$0xff]  ;;  %v6583_v54 = vcombine.high %v2775_v49, %v2779_v61  ;;  %v6582_v19 = vcombine.low %v2775_v49, %v2779_v61 }
 0x4dc   :  { %v6585_v55 = vcombine.high %v2776_v12, %v2780_v50  ;;  %v6584_v62 = vcombine.low %v2776_v12, %v2780_v50  ;;  %v4441_v50 = vld [vmem:[#allocation10 + $0x2e0] sm:$0xff] }
 0x4dd   :  { %4287 = vmatpush1.bf16.msra.mxu0 %v6518_v56  ;;  %v2783_v56 = vld [vmem:[#allocation5 + $0x7d0] sm:$0xff] }
 0x4de   :  { %4369 = vmatpush1.bf16.msra.mxu1 %v6520_v58  ;;  %4288 = vmatprep.subr.bf16.mxu0 %v6527_v59  ;;  %v2787_v58 = vld [vmem:[#allocation5 + $0x7f0] sm:$0xff]  ;;  %v2784_v59 = vld [vmem:[#allocation5 + $0x7d8] sm:$0xff] }
 0x4df   :  { %4370 = vmatprep.subr.bf16.mxu1 %v6529_v60  ;;  %v2788_v60 = vld [vmem:[#allocation5 + $0x7f8] sm:$0xff]  ;;  %v6591_v63 = vcombine.high %v2783_v56, %v2787_v58 }
 0x4e0   :  { %v6593_v0 = vcombine.high %v2784_v59, %v2788_v60 }
 0x4e1   :  { %4289 = vmatpush1.bf16.msra.mxu0 %v6526_v1  ;;  %v4429_v1 = vld [vmem:[#allocation10 + $0x280] sm:$0xff] }
 0x4e2   :  { %4371 = vmatpush1.bf16.msra.mxu1 %v6528_v2  ;;  %4290 = vmatprep.subr.bf16.mxu0 %v6535_v3  ;;  %v4430_v2 = vld [vmem:[#allocation10 + $0x288] sm:$0xff]  ;;  %v6590_v3 = vcombine.low %v2783_v56, %v2787_v58  ;;  %v4443_v58 = vld [vmem:[#allocation10 + $0x2f0] sm:$0xff] }
 0x4e3   :  { %4372 = vmatprep.subr.bf16.mxu1 %v6537_v4  ;;  %v6592_v4 = vcombine.low %v2784_v59, %v2788_v60  ;;  %v7235_v5 = vpack.c.bf16 %v4430_v2, %v4429_v1  ;;  %v4444_v59 = vld [vmem:[#allocation10 + $0x2f8] sm:$0xff] }
 0x4e4   :  { %v7263_v60 = vpack.c.bf16 %v4444_v59, %v4443_v58  ;;  %v4577_v58 = vld [vmem:[#allocation11 + $0x368] sm:$0xff] }
 0x4e5   :  { %4291 = vmatpush1.bf16.msra.mxu0 %v6534_v11  ;;  %v4432_v11 = vld [vmem:[#allocation10 + $0x298] sm:$0xff] }
 0x4e6   :  { %4373 = vmatpush1.bf16.msra.mxu1 %v6536_v14  ;;  %4292 = vmatprep.subr.bf16.mxu0 %v6543_v15  ;;  %v7237_v14 = vpack.c.bf16 %v4414_v7, %v4413_v6  ;;  %v7239_v15 = vpack.c.bf16 %v4432_v11, %v4431_v8 }
 0x4e7   :  { %4374 = vmatprep.subr.bf16.mxu1 %v6545_v20  ;;  %v4415_v20 = vld [vmem:[#allocation10 + $0x210] sm:$0xff] }
 0x4e8   :  { %v7241_v53 = vpack.c.bf16 %v4416_v21, %v4415_v20 }
 0x4e9   :  { %4293 = vmatpush1.bf16.msra.mxu0 %v6542_v23  ;;  %v7243_v23 = vpack.c.bf16 %v4434_v37, %v4433_v22 }
 0x4ea   :  { %4375 = vmatpush1.bf16.msra.mxu1 %v6544_v24  ;;  %4294 = vmatprep.subr.bf16.mxu0 %v6551_v25  ;;  %v4417_v24 = vld [vmem:[#allocation10 + $0x220] sm:$0xff]  ;;  %v4418_v25 = vld [vmem:[#allocation10 + $0x228] sm:$0xff] }
 0x4eb   :  { %4376 = vmatprep.subr.bf16.mxu1 %v6553_v27  ;;  %v4435_v27 = vld [vmem:[#allocation10 + $0x2b0] sm:$0xff]  ;;  %v7245_v38 = vpack.c.bf16 %v4418_v25, %v4417_v24  ;;  %v4551_v24 = vld [vmem:[#allocation11 + $0x28] sm:$0xff] }
 0x4ec   :  { %v7247_v29 = vpack.c.bf16 %v4436_v28, %v4435_v27  ;;  %v4553_v25 = vld [vmem:[#allocation11 + $0x68] sm:$0xff]  ;;  %v4550_v28 = vld [vmem:[#allocation11 + $0x20] sm:$0xff] }
 0x4ed   :  { %4295 = vmatpush1.bf16.msra.mxu0 %v6550_v33  ;;  %v4420_v33 = vld [vmem:[#allocation10 + $0x238] sm:$0xff]  ;;  %v7267_v27 = vpack.c.bf16 %v4553_v25, %v4551_v24  ;;  %v7511_v24 = vld [vmem:[#allocation7 + $0xa4] ss:$16 sps:$4 sm:$0xff]   ;;  %v7509_v25 = vld [vmem:[#allocation7 + $0xa0] ss:$16 sps:$4 sm:$0xff]  }
 0x4ee   :  { %4377 = vmatpush1.bf16.msra.mxu1 %v6552_v13  ;;  %4296 = vmatprep.subr.bf16.mxu0 %v6559_v34  ;;  %v4437_v13 = vld [vmem:[#allocation10 + $0x2c0] sm:$0xff]  ;;  %v4438_v34 = vld [vmem:[#allocation10 + $0x2c8] sm:$0xff] }
 0x4ef   :  { %4378 = vmatprep.subr.bf16.mxu1 %v6561_v17  ;;  %v7251_v17 = vpack.c.bf16 %v4438_v34, %v4437_v13  ;;  %v4554_v34 = vld [vmem:[#allocation11 + $0xa0] sm:$0xff] }
 0x4f1   :  { %4297 = vmatpush1.bf16.msra.mxu0 %v6558_v26  ;;  %v4440_v26 = vld [vmem:[#allocation10 + $0x2d8] sm:$0xff] }
 0x4f2   :  { %4379 = vmatpush1.bf16.msra.mxu1 %v6560_v31  ;;  %4298 = vmatprep.subr.bf16.mxu0 %v6567_v16 }
 0x4f3   :  { %4380 = vmatprep.subr.bf16.mxu1 %v6569_v39  ;;  %v7255_v39 = vpack.c.bf16 %v4440_v26, %v4439_v36  ;;  %v4558_v36 = vld [vmem:[#allocation11 + $0x120] sm:$0xff] }
 0x4f4   :  { %v4560_v26 = vld [vmem:[#allocation11 + $0x160] sm:$0xff] }
 0x4f5   :  { %4299 = vmatpush1.bf16.msra.mxu0 %v6566_v45 }
 0x4f6   :  { %4381 = vmatpush1.bf16.msra.mxu1 %v6568_v46  ;;  %4300 = vmatprep.subr.bf16.mxu0 %v6575_v47  ;;  %v7257_v46 = vpack.c.bf16 %v4424_v41, %v4423_v40  ;;  %v4562_v41 = vld [vmem:[#allocation11 + $0x1a0] sm:$0xff] }
 0x4f7   :  { %4382 = vmatprep.subr.bf16.mxu1 %v6577_v48 }
 0x4f9   :  { %4301 = vmatpush1.bf16.msra.mxu0 %v6574_v51  ;;  %v4442_v51 = vld [vmem:[#allocation10 + $0x2e8] sm:$0xff] }
 0x4fa   :  { %4383 = vmatpush1.bf16.msra.mxu1 %v6576_v52  ;;  %4302 = vmatprep.subr.bf16.mxu0 %v6583_v54  ;;  %v7259_v52 = vpack.c.bf16 %v4442_v51, %v4441_v50  ;;  %v4425_v54 = vld [vmem:[#allocation10 + $0x260] sm:$0xff]  ;;  %v4573_v50 = vld [vmem:[#allocation11 + $0x2e8] sm:$0xff] }
 0x4fb   :  { %4384 = vmatprep.subr.bf16.mxu1 %v6585_v55  ;;  %v4426_v55 = vld [vmem:[#allocation10 + $0x268] sm:$0xff] }
 0x4fc   :  { %v7261_v56 = vpack.c.bf16 %v4426_v55, %v4425_v54  ;;  %v4572_v54 = vld [vmem:[#allocation11 + $0x2e0] sm:$0xff] }
 0x4fd   :  { %4303 = vmatpush1.bf16.msra.mxu0 %v6582_v19  ;;  %v4427_v19 = vld [vmem:[#allocation10 + $0x270] sm:$0xff] }
 0x4fe   :  { %4385 = vmatpush1.bf16.msra.mxu1 %v6584_v62  ;;  %4304 = vmatprep.subr.bf16.mxu0 %v6591_v63  ;;  %v4428_v62 = vld [vmem:[#allocation10 + $0x278] sm:$0xff] }
 0x4ff   :  { %4386 = vmatprep.subr.bf16.mxu1 %v6593_v0  ;;  %v7265_v63 = vpack.c.bf16 %v4428_v62, %v4427_v19  ;;  %v4576_v19 = vld [vmem:[#allocation11 + $0x360] sm:$0xff]  ;;  %v4579_v62 = vld [vmem:[#allocation11 + $0x3a8] sm:$0xff] }
 0x501   :  { %4305 = vmatpush1.bf16.msra.mxu0 %v6590_v3 }
 0x502   :  { %4387 = vmatpush1.bf16.msra.mxu1 %v6592_v4  ;;  %7236 = vmatprep.subr.bf16.mxu0 %v7235_v5 }
 0x503   :  { %7268 = vmatprep.subr.bf16.mxu1 %v7267_v27  ;;  %v7517_v27 = vld [vmem:[#allocation7 + $0xc4] ss:$16 sps:$4 sm:$0xff]  }
 0x504   :  { %4307 = vmatmul.mubr.bf16.vlgmr.msra.gmra.mrb[24].mxu0 %v8127_v57 }
 0x505   :  { %4389 = vmatmul.mubr.bf16.vlgmr.msra.gmra.mrb[24].mxu1 %v8127_v57  ;;  %7238 = vmatpush3.bf16.msra.mxu0 %v7237_v14  ;;  %v7249_v57 = vpack.c.bf16 %v4420_v33, %v4419_v32  ;;  %v4555_v32 = vld [vmem:[#allocation11 + $0xa8] sm:$0xff] }
 0x506   :  { %7240 = vmatprep.subr.bf16.mxu0 %v7239_v15  ;;  %4646 = vmatprep.mubr.f32.mxu1 %v7837_v42  ;;  %v4557_v33 = vld [vmem:[#allocation11 + $0xe8] sm:$0xff] }
 0x507   :  { %v7271_v13 = vpack.c.bf16 %v4557_v33, %v4555_v32  ;;  %v7529_v32 = vld [vmem:[#allocation7 + $0x104] ss:$16 sps:$4 sm:$0xff]   ;;  %v7527_v33 = vld [vmem:[#allocation7 + $0x100] ss:$16 sps:$4 sm:$0xff]  }
 0x509   :  { %7242 = vmatpush3.bf16.msra.mxu0 %v7241_v53 }
 0x50a   :  { %7244 = vmatprep.subr.bf16.mxu0 %v7243_v23 }
 0x50d   :  { %7246 = vmatpush3.bf16.msra.mxu0 %v7245_v38  ;;  %v4552_v38 = vld [vmem:[#allocation11 + $0x60] sm:$0xff] }
 0x50e   :  { %7248 = vmatprep.subr.bf16.mxu0 %v7247_v29  ;;  %v7269_v29 = vpack.c.bf16 %v4552_v38, %v4550_v28  ;;  %v7515_v28 = vld [vmem:[#allocation7 + $0xc0] ss:$16 sps:$4 sm:$0xff]   ;;  %v7523_v38 = vld [vmem:[#allocation7 + $0xe4] ss:$16 sps:$4 sm:$0xff]  }
 0x510   :  { %7270 = vmatpush1.bf16.msra.mxu1 %v7269_v29  ;;  %v7521_v29 = vld [vmem:[#allocation7 + $0xe0] ss:$16 sps:$4 sm:$0xff]  }
 0x511   :  { %7250 = vmatpush3.bf16.msra.mxu0 %v7249_v57  ;;  %v4556_v57 = vld [vmem:[#allocation11 + $0xe0] sm:$0xff]  ;;  %7272 = vmatprep.subr.bf16.mxu1 %v7271_v13 }
 0x512   :  { %7252 = vmatprep.subr.bf16.mxu0 %v7251_v17  ;;  %v7273_v17 = vpack.c.bf16 %v4556_v57, %v4554_v34  ;;  %v7535_v13 = vld [vmem:[#allocation7 + $0x124] ss:$16 sps:$4 sm:$0xff]   ;;  %v7533_v34 = vld [vmem:[#allocation7 + $0x120] ss:$16 sps:$4 sm:$0xff]  }
 0x513   :  { %v7541_v57 = vld [vmem:[#allocation7 + $0x144] ss:$16 sps:$4 sm:$0xff]  }
 0x514   :  { %7274 = vmatpush1.bf16.msra.mxu1 %v7273_v17  ;;  %v7539_v17 = vld [vmem:[#allocation7 + $0x140] ss:$16 sps:$4 sm:$0xff]  }
 0x515   :  { %7254 = vmatpush3.bf16.msra.mxu0 %v7253_v18  ;;  %v7275_v18 = vpack.c.bf16 %v4561_v35, %v4559_v44  ;;  %v7547_v44 = vld [vmem:[#allocation7 + $0x164] ss:$16 sps:$4 sm:$0xff]   ;;  %v7545_v35 = vld [vmem:[#allocation7 + $0x160] ss:$16 sps:$4 sm:$0xff]  }
 0x516   :  { %7256 = vmatprep.subr.bf16.mxu0 %v7255_v39  ;;  %v4565_v39 = vld [vmem:[#allocation11 + $0x1e8] sm:$0xff] }
 0x517   :  { %7276 = vmatprep.subr.bf16.mxu1 %v7275_v18  ;;  %v7553_v18 = vld [vmem:[#allocation7 + $0x184] ss:$16 sps:$4 sm:$0xff]  }
 0x519   :  { %7258 = vmatpush3.bf16.msra.mxu0 %v7257_v46  ;;  %v4569_v46 = vld [vmem:[#allocation11 + $0x268] sm:$0xff] }
 0x51a   :  { %7260 = vmatprep.subr.bf16.mxu0 %v7259_v52  ;;  %v4570_v52 = vld [vmem:[#allocation11 + $0x2a0] sm:$0xff] }
 0x51b   :  { %v7289_v55 = vpack.c.bf16 %v4572_v54, %v4570_v52 }
 0x51d   :  { %7262 = vmatpush3.bf16.msra.mxu0 %v7261_v56  ;;  %v4575_v56 = vld [vmem:[#allocation11 + $0x328] sm:$0xff] }
 0x51e   :  { %7264 = vmatprep.subr.bf16.mxu0 %v7263_v60  ;;  %v7291_v59 = vpack.c.bf16 %v4577_v58, %v4575_v56  ;;  %v4574_v60 = vld [vmem:[#allocation11 + $0x320] sm:$0xff] }
 0x521   :  { %7266 = vmatpush3.bf16.msra.mxu0 %v7265_v63  ;;  %v7293_v63 = vpack.c.bf16 %v4576_v19, %v4574_v60  ;;  %v8157_v60 = vld [vmem:[%s8282_s7] sm:$0xff] }
 0x557   :  { %v4144_v31 = vpop.f32.mrb[20].mxu0  ;;  %v4226_v16 = vpop.f32.mrb[20].mxu1 }
 0x558   :  { %v4397_v30 = vmax.f32 %v4144_v31, %v4226_v16  ;;  %v4146_v43 = vpop.f32.mrb[21].mxu0  ;;  %v4228_v45 = vpop.f32.mrb[21].mxu1  ;;  %v7277_v31 = vpack.c.bf16 %v4560_v26, %v4558_v36  ;;  %v4563_v16 = vld [vmem:[#allocation11 + $0x1a8] sm:$0xff]  ;;  %v7551_v36 = vld [vmem:[#allocation7 + $0x180] ss:$16 sps:$4 sm:$0xff]  }
 0x559   :  { %v4398_v47 = vmax.f32 %v4146_v43, %v4228_v45  ;;  %v4148_v48 = vpop.f32.mrb[22].mxu0  ;;  %v4230_v49 = vpop.f32.mrb[22].mxu1  ;;  %v7279_v40 = vpack.c.bf16 %v4565_v39, %v4563_v16  ;;  %v4567_v45 = vld [vmem:[#allocation11 + $0x228] sm:$0xff] }
 0x55a   :  { %v4149_v61 = vpop.f32.mrb[23].mxu0  ;;  %v4231_v12 = vpop.f32.mrb[23].mxu1  ;;  %7278 = vmatpush1.bf16.msra.mxu1 %v7277_v31  ;;  %v4566_v48 = vld [vmem:[#allocation11 + $0x220] sm:$0xff] }
 0x55b   :  { %7280 = vmatprep.subr.bf16.mxu1 %v7279_v40  ;;  %v4568_v49 = vld [vmem:[#allocation11 + $0x260] sm:$0xff]  ;;  %v4571_v12 = vld [vmem:[#allocation11 + $0x2a8] sm:$0xff] }
 0x55c   :  { %v7285_v61 = vpack.c.bf16 %v4568_v49, %v4566_v48  ;;  %v7287_v51 = vpack.c.bf16 %v4573_v50, %v4571_v12 }
 0x5d7   :  { %v4308_v0 = vpop.f32.mrb[24].mxu0 }
 0x5d8   :  { %v4390_v1 = vpop.f32.mrb[24].mxu1  ;;  %v4310_v2 = vpop.f32.mrb[25].mxu0 }
 0x5d9   :  { %v4399_v3 = vmax.f32 %v4308_v0, %v4390_v1  ;;  %v4392_v4 = vpop.f32.mrb[25].mxu1  ;;  %v4312_v5 = vpop.f32.mrb[26].mxu0  ;;  %v4581_v0 = vld [vmem:[#allocation11 + $0x3e8] sm:$0xff]  ;;  %v4578_v1 = vld [vmem:[#allocation11 + $0x3a0] sm:$0xff] }
 0x5da   :  { %v4400_v6 = vmax.f32 %v4310_v2, %v4392_v4  ;;  %v4394_v7 = vpop.f32.mrb[26].mxu1  ;;  %v4313_v8 = vpop.f32.mrb[27].mxu0  ;;  %v4580_v2 = vld [vmem:[#allocation11 + $0x3e0] sm:$0xff] }
 0x5db   :  { %v8140_v11 = vmax.f32 %v4397_v30, %v4399_v3  ;;  %v4395_v14 = vpop.f32.mrb[27].mxu1  ;;  %v4564_v30 = vld [vmem:[#allocation11 + $0x1e0] sm:$0xff]  ;;  %v7295_v3 = vpack.c.bf16 %v4581_v0, %v4579_v62  ;;  %v7297_v4 = vpack.c.bf16 %v4580_v2, %v4578_v1  ;;  %v7484_v7 = vld [vmem:[#allocation7 + $0xc] ss:$16 sps:$4 sm:$0xff]  }
 0x5dc   :  { %v8142_v15 = vmax.f32 %v4398_v47, %v4400_v6  ;;  %v7281_v43 = vpack.c.bf16 %v4564_v30, %v4562_v41  ;;  %v7283_v47 = vpack.c.bf16 %v4569_v46, %v4567_v45  ;;  %v7479_v5 = vld [vmem:[#allocation7] ss:$16 sps:$4 sm:$0xff]   ;;  %v7481_v6 = vld [vmem:[#allocation7 + $0x4] ss:$16 sps:$4 sm:$0xff]  }
 0x5dd   :  { %v4403_v20 = vmul.f32 %v8140_v11, %v8140_v11  ;;  %v7487_v8 = vld [vmem:[#allocation7 + $0x24] ss:$16 sps:$4 sm:$0xff]   ;;  %5061 = vmatprep.subr.bf16.mxu0 %v7481_v6  ;;  %v7485_v14 = vld [vmem:[#allocation7 + $0x20] ss:$16 sps:$4 sm:$0xff]   ;;  %v7488_v6 = vld [vmem:[#allocation7 + $0x28] ss:$16 sps:$4 sm:$0xff]  }
 0x5de   :  { %v4404_v21 = vmul.f32 %v8142_v15, %v8142_v15  ;;  %7282 = vmatpush1.bf16.msra.mxu1 %v7281_v43 }
 0x5df   :  { %v4407_v22 = vrot.slane %v4403_v20, 6  ;;  %7284 = vmatprep.subr.bf16.mxu1 %v7283_v47  ;;  %v7493_v20 = vld [vmem:[#allocation7 + $0x44] ss:$16 sps:$4 sm:$0xff]  }
 0x5e0   :  { %v4408_v37 = vrot.slane %v4404_v21, 6  ;;  %v7491_v21 = vld [vmem:[#allocation7 + $0x40] ss:$16 sps:$4 sm:$0xff]  }
 0x5e1   :  { %v4411_v23 = vsel %vm2040_vm0, %v8140_v11, %v4407_v22  ;;  %v7499_v22 = vld [vmem:[#allocation7 + $0x64] ss:$16 sps:$4 sm:$0xff]  }
 0x5e2   :  { %v4412_v53 = vsel %vm2040_vm0, %v8142_v15, %v4408_v37  ;;  %7286 = vmatpush1.bf16.msra.mxu1 %v7285_v61  ;;  %v7497_v37 = vld [vmem:[#allocation7 + $0x60] ss:$16 sps:$4 sm:$0xff]  }
 0x5e3   :  { %4509 = vmatprep.mubr.f32.mxu0 %v4412_v53  ;;  %7288 = vmatprep.subr.bf16.mxu1 %v7287_v51  ;;  %v7505_v53 = vld [vmem:[#allocation7 + $0x84] ss:$16 sps:$4 sm:$0xff]  }
 0x5e4   :  { %4510 = vmatmul.mubr.f32.vlgmr.msra.gmra.mrb[28].mxu0 %v4411_v23  ;;  %v7503_v23 = vld [vmem:[#allocation7 + $0x80] ss:$16 sps:$4 sm:$0xff]  }
 0x5e5   :  { %5062 = vmatpush1.bf16.msra.mxu0 %v7479_v5 }
 0x5e6   :  { %7290 = vmatpush1.bf16.msra.mxu1 %v7289_v55  ;;  %5063 = vmatprep.subr.bf16.mxu0 %v7487_v8  ;;  %v7494_v8 = vld [vmem:[#allocation7 + $0x48] ss:$16 sps:$4 sm:$0xff]  }
 0x5e7   :  { %7292 = vmatprep.subr.bf16.mxu1 %v7291_v59 }
 0x5e9   :  { %5064 = vmatpush1.bf16.msra.mxu0 %v7485_v14  ;;  %v7502_v14 = vld [vmem:[#allocation7 + $0x6c] ss:$16 sps:$4 sm:$0xff]  }
 0x5ea   :  { %7294 = vmatpush1.bf16.msra.mxu1 %v7293_v63  ;;  %5065 = vmatprep.subr.bf16.mxu0 %v7493_v20  ;;  %v7500_v20 = vld [vmem:[#allocation7 + $0x68] ss:$16 sps:$4 sm:$0xff]  }
 0x5eb   :  { %7296 = vmatprep.subr.bf16.mxu1 %v7295_v3  ;;  %v7482_v3 = vld [vmem:[#allocation7 + $0x8] ss:$16 sps:$4 sm:$0xff]  }
 0x5ed   :  { %5066 = vmatpush1.bf16.msra.mxu0 %v7491_v21  ;;  %v7508_v21 = vld [vmem:[#allocation7 + $0x8c] ss:$16 sps:$4 sm:$0xff]  }
 0x5ee   :  { %7298 = vmatpush1.bf16.msra.mxu1 %v7297_v4  ;;  %5067 = vmatprep.subr.bf16.mxu0 %v7499_v22  ;;  %v7490_v4 = vld [vmem:[#allocation7 + $0x2c] ss:$16 sps:$4 sm:$0xff]   ;;  %v7506_v22 = vld [vmem:[#allocation7 + $0x88] ss:$16 sps:$4 sm:$0xff]  }
 0x5ef   :  { %5102 = vmatprep.subr.bf16.mxu1 %v7484_v7  ;;  %v7496_v7 = vld [vmem:[#allocation7 + $0x4c] ss:$16 sps:$4 sm:$0xff]  }
 0x5f1   :  { %5068 = vmatpush1.bf16.msra.mxu0 %v7497_v37  ;;  %v7514_v37 = vld [vmem:[#allocation7 + $0xac] ss:$16 sps:$4 sm:$0xff]  }
 0x5f2   :  { %5069 = vmatprep.subr.bf16.mxu0 %v7505_v53  ;;  %v7512_v53 = vld [vmem:[#allocation7 + $0xa8] ss:$16 sps:$4 sm:$0xff]  }
 0x5f5   :  { %5070 = vmatpush1.bf16.msra.mxu0 %v7503_v23  ;;  %v7520_v23 = vld [vmem:[#allocation7 + $0xcc] ss:$16 sps:$4 sm:$0xff]  }
 0x5f6   :  { %5071 = vmatprep.subr.bf16.mxu0 %v7511_v24  ;;  %v7518_v24 = vld [vmem:[#allocation7 + $0xc8] ss:$16 sps:$4 sm:$0xff]  }
 0x5f9   :  { %5072 = vmatpush1.bf16.msra.mxu0 %v7509_v25  ;;  %v7526_v25 = vld [vmem:[#allocation7 + $0xec] ss:$16 sps:$4 sm:$0xff]  }
 0x5fa   :  { %5073 = vmatprep.subr.bf16.mxu0 %v7517_v27  ;;  %v7524_v27 = vld [vmem:[#allocation7 + $0xe8] ss:$16 sps:$4 sm:$0xff]  }
 0x5fd   :  { %5074 = vmatpush1.bf16.msra.mxu0 %v7515_v28  ;;  %v7532_v28 = vld [vmem:[#allocation7 + $0x10c] ss:$16 sps:$4 sm:$0xff]  }
 0x5fe   :  { %5075 = vmatprep.subr.bf16.mxu0 %v7523_v38  ;;  %v7530_v38 = vld [vmem:[#allocation7 + $0x108] ss:$16 sps:$4 sm:$0xff]  }
 0x601   :  { %5076 = vmatpush1.bf16.msra.mxu0 %v7521_v29  ;;  %v7538_v29 = vld [vmem:[#allocation7 + $0x12c] ss:$16 sps:$4 sm:$0xff]  }
 0x602   :  { %5077 = vmatprep.subr.bf16.mxu0 %v7529_v32  ;;  %v7536_v32 = vld [vmem:[#allocation7 + $0x128] ss:$16 sps:$4 sm:$0xff]  }
 0x605   :  { %5078 = vmatpush1.bf16.msra.mxu0 %v7527_v33  ;;  %v7544_v33 = vld [vmem:[#allocation7 + $0x14c] ss:$16 sps:$4 sm:$0xff]  }
 0x606   :  { %5079 = vmatprep.subr.bf16.mxu0 %v7535_v13  ;;  %v7542_v13 = vld [vmem:[#allocation7 + $0x148] ss:$16 sps:$4 sm:$0xff]  }
 0x609   :  { %5080 = vmatpush1.bf16.msra.mxu0 %v7533_v34  ;;  %v7550_v34 = vld [vmem:[#allocation7 + $0x16c] ss:$16 sps:$4 sm:$0xff]  }
 0x60a   :  { %5081 = vmatprep.subr.bf16.mxu0 %v7541_v57  ;;  %v7548_v57 = vld [vmem:[#allocation7 + $0x168] ss:$16 sps:$4 sm:$0xff]  }
 0x60d   :  { %5082 = vmatpush1.bf16.msra.mxu0 %v7539_v17  ;;  %v7556_v17 = vld [vmem:[#allocation7 + $0x18c] ss:$16 sps:$4 sm:$0xff]  }
 0x60e   :  { %5083 = vmatprep.subr.bf16.mxu0 %v7547_v44  ;;  %v7554_v44 = vld [vmem:[#allocation7 + $0x188] ss:$16 sps:$4 sm:$0xff]  }
 0x611   :  { %5084 = vmatpush1.bf16.msra.mxu0 %v7545_v35  ;;  %v7559_v35 = vld [vmem:[#allocation7 + $0x1a4] ss:$16 sps:$4 sm:$0xff]  }
 0x612   :  { %5085 = vmatprep.subr.bf16.mxu0 %v7553_v18  ;;  %v7562_v18 = vld [vmem:[#allocation7 + $0x1ac] ss:$16 sps:$4 sm:$0xff]  }
 0x615   :  { %5086 = vmatpush1.bf16.msra.mxu0 %v7551_v36  ;;  %v7557_v36 = vld [vmem:[#allocation7 + $0x1a0] ss:$16 sps:$4 sm:$0xff]  }
 0x616   :  { %5087 = vmatprep.subr.bf16.mxu0 %v7559_v35 }
 0x619   :  { %5088 = vmatpush1.bf16.msra.mxu0 %v7557_v36 }
 0x6b7   :  { %v6792_v26 = vpop.f32.mrb[28].mxu0 }
 0x6b8   :  { %v6793_v31 = vpop.f32.mrb[29].mxu0 }
 0x6b9   :  { %v6794_v16 = vadd.f32 %v6793_v31, %v6792_v26  ;;  %v7560_v26 = vld [vmem:[#allocation7 + $0x1a8] ss:$16 sps:$4 sm:$0xff]   ;;  %v7565_v31 = vld [vmem:[#allocation7 + $0x1c4] ss:$16 sps:$4 sm:$0xff]  }
 0x6ba   :  { %5089 = vmatprep.subr.bf16.mxu0 %v7565_v31 }
 0x6bb   :  { %v4515_v39 = vmul.f32 0.5, %v6794_v16  ;;  %v7568_v16 = vld [vmem:[#allocation7 + $0x1cc] ss:$16 sps:$4 sm:$0xff]  }
 0x6bd   :  { %v4516_v40 = vsel %vm2040_vm0, %v4515_v39, 0.0  ;;  %v4524_v41 = vrot.slane %v4515_v39, 2  ;;  %v7563_v39 = vld [vmem:[#allocation7 + $0x1c0] ss:$16 sps:$4 sm:$0xff]  }
 0x6be   :  { %v4517_v30 = vrot.slane %v4516_v40, 4  ;;  %5090 = vmatpush1.bf16.msra.mxu0 %v7563_v39  ;;  %v5273_v39 = vld [vmem:[#allocation11 + $0x70] sm:$0xff] }
 0x6bf   :  { %v4526_v43 = vsel %vm2040_vm0, %v4524_v41, 0.0  ;;  %v7571_v41 = vld [vmem:[#allocation7 + $0x1e4] ss:$16 sps:$4 sm:$0xff]  }
 0x6c0   :  { %v4518_v45 = vadd.f32 %v4517_v30, %v4516_v40  ;;  %v4527_v46 = vrot.slane %v4526_v43, 4  ;;  %v7566_v40 = vld [vmem:[#allocation7 + $0x1c8] ss:$16 sps:$4 sm:$0xff]   ;;  %v7574_v30 = vld [vmem:[#allocation7 + $0x1ec] ss:$16 sps:$4 sm:$0xff]   ;;  %5091 = vmatprep.subr.bf16.mxu0 %v7571_v41  ;;  %v5274_v41 = vld [vmem:[#allocation11 + $0xb0] sm:$0xff] }
 0x6c2   :  { %v4519_v47 = vrot.slane %v4518_v45, 2  ;;  %v4528_v48 = vadd.f32 %v4527_v46, %v4526_v43  ;;  %v7569_v43 = vld [vmem:[#allocation7 + $0x1e0] ss:$16 sps:$4 sm:$0xff]   ;;  %v7838_v46 = vmov 0.0|0.0  }
 0x6c3   :  { %5092 = vmatpush1.bf16.msra.mxu0 %v7569_v43 }
 0x6c4   :  { %v4520_v49 = vadd.f32 %v4519_v47, %v4518_v45  ;;  %v4529_v61 = vrot.slane %v4528_v48, 2  ;;  %v7572_v45 = vld [vmem:[#allocation7 + $0x1e8] ss:$16 sps:$4 sm:$0xff]   ;;  %7299 = vmatprep.subr.bf16.mxu0 %v7838_v46 }
 0x6c6   :  { %v4521_v12 = vrot.slane %v4520_v49, 1  ;;  %v4530_v50 = vadd.f32 %v4529_v61, %v4528_v48 }
 0x6c8   :  { %v4522_v51 = vadd.f32 %v4521_v12, %v4520_v49  ;;  %v4531_v52 = vrot.slane %v4530_v50, 1 }
 0x6ca   :  { %v4532_v54 = vadd.f32 %v4531_v52, %v4530_v50  ;;  %v4533_v55 = vmul.f32 %v4522_v51, %v4522_v51 }
 0x6cc   :  { %v4534_v56 = vsub.f32 %v4532_v54, %v4533_v55 }
 0x6ce   :  { %v4535_v58 = vadd.f32 1e-05, %v4534_v56 }
 0x6d0   :  { %7625 = vrsqrt.f32 %v4535_v58  ;;  %v5151_v58 = vld [vmem:[#allocation10 + $0x300] sm:$0xff] }
 0x6da   :  { %v7626_v59 = vpop.eup %7625 }
 0x6db   :  { %v4537_v19 = vmul.f32 %v8157_v60, %v7626_v59  ;;  %v5152_v59 = vld [vmem:[#allocation10 + $0x308] sm:$0xff] }
 0x6dd   :  { %v4538_v62 = vmul.f32 %v4537_v19, %v4522_v51  ;;  %v4544_v1 = vrot.slane %v4537_v19, 2 }
 0x6df   :  { %v4540_v63 = vrot.slane %v4538_v62, 7 }
 0x6e1   :  { %v4542_v0 = vsub.f32 %v8157_v60, %v4540_v63  ;;  %v7300_v63 = vpack.c.bf16 %v5152_v59, %v5151_v58  ;;  %v5284_v58 = vld [vmem:[#allocation11 + $0x330] sm:$0xff] }
 0x6e2   :  { %v5285_v59 = vld [vmem:[#allocation11 + $0x370] sm:$0xff] }
 0x6e3   :  { %v4547_v2 = vrot.slane %v4542_v0, 2 }
 0x6e5   :  { %v4549_v5 = vsel %vm2277_vm1, %v4544_v1, %v4547_v2  ;;  %v5153_v1 = vld [vmem:[#allocation10 + $0x310] sm:$0xff]  ;;  %v5154_v2 = vld [vmem:[#allocation10 + $0x318] sm:$0xff] }
 0x6e6   :  { %4647 = vmatmul.mubr.f32.vlgmr.msra.gmra.mrb[28].mxu1 %v4549_v5  ;;  %v5157_v5 = vld [vmem:[#allocation10 + $0x330] sm:$0xff] }
 0x6e7   :  { %5103 = vmatpush1.bf16.msra.mxu1 %v7482_v3  ;;  %v5156_v3 = vld [vmem:[#allocation10 + $0x328] sm:$0xff] }
 0x6e8   :  { %5104 = vmatprep.subr.bf16.mxu1 %v7490_v4 }
 0x6eb   :  { %5105 = vmatpush1.bf16.msra.mxu1 %v7488_v6  ;;  %v5158_v6 = vld [vmem:[#allocation10 + $0x338] sm:$0xff] }
 0x6ec   :  { %5106 = vmatprep.subr.bf16.mxu1 %v7496_v7  ;;  %v7309_v7 = vpack.c.bf16 %v5158_v6, %v5157_v5  ;;  %v7587_v5 = vld [vmem:[#allocation8 + $0x40] ss:$16 sps:$4 sm:$0xff]   ;;  %v7595_v6 = vld [vmem:[#allocation8 + $0x64] ss:$16 sps:$4 sm:$0xff]  }
 0x6ef   :  { %5107 = vmatpush1.bf16.msra.mxu1 %v7494_v8  ;;  %v5159_v8 = vld [vmem:[#allocation10 + $0x340] sm:$0xff] }
 0x6f0   :  { %5108 = vmatprep.subr.bf16.mxu1 %v7502_v14  ;;  %v5160_v14 = vld [vmem:[#allocation10 + $0x348] sm:$0xff] }
 0x6f3   :  { %5109 = vmatpush1.bf16.msra.mxu1 %v7500_v20  ;;  %v7312_v20 = vpack.c.bf16 %v5160_v14, %v5159_v8  ;;  %v7601_v8 = vld [vmem:[#allocation8 + $0x84] ss:$16 sps:$4 sm:$0xff]   ;;  %v7599_v14 = vld [vmem:[#allocation8 + $0x80] ss:$16 sps:$4 sm:$0xff]  }
 0x6f4   :  { %5110 = vmatprep.subr.bf16.mxu1 %v7508_v21  ;;  %v5161_v21 = vld [vmem:[#allocation10 + $0x350] sm:$0xff] }
 0x6f7   :  { %5111 = vmatpush1.bf16.msra.mxu1 %v7506_v22  ;;  %v5162_v22 = vld [vmem:[#allocation10 + $0x358] sm:$0xff] }
 0x6f8   :  { %5112 = vmatprep.subr.bf16.mxu1 %v7514_v37  ;;  %v7315_v37 = vpack.c.bf16 %v5162_v22, %v5161_v21  ;;  %v7605_v21 = vld [vmem:[#allocation8 + $0xa0] ss:$16 sps:$4 sm:$0xff]  }
 0x6fb   :  { %5113 = vmatpush1.bf16.msra.mxu1 %v7512_v53  ;;  %v5163_v53 = vld [vmem:[#allocation10 + $0x360] sm:$0xff] }
 0x6fc   :  { %5114 = vmatprep.subr.bf16.mxu1 %v7520_v23  ;;  %v5164_v23 = vld [vmem:[#allocation10 + $0x368] sm:$0xff] }
 0x6ff   :  { %5115 = vmatpush1.bf16.msra.mxu1 %v7518_v24  ;;  %v7318_v24 = vpack.c.bf16 %v5164_v23, %v5163_v53 }
 0x700   :  { %5116 = vmatprep.subr.bf16.mxu1 %v7526_v25  ;;  %v5165_v25 = vld [vmem:[#allocation10 + $0x370] sm:$0xff] }
 0x703   :  { %5117 = vmatpush1.bf16.msra.mxu1 %v7524_v27  ;;  %v5166_v27 = vld [vmem:[#allocation10 + $0x378] sm:$0xff] }
 0x704   :  { %5118 = vmatprep.subr.bf16.mxu1 %v7532_v28  ;;  %v7321_v28 = vpack.c.bf16 %v5166_v27, %v5165_v25 }
 0x707   :  { %5119 = vmatpush1.bf16.msra.mxu1 %v7530_v38 }
 0x708   :  { %5120 = vmatprep.subr.bf16.mxu1 %v7538_v29 }
 0x70b   :  { %5121 = vmatpush1.bf16.msra.mxu1 %v7536_v32 }
 0x70c   :  { %5122 = vmatprep.subr.bf16.mxu1 %v7544_v33 }
 0x70f   :  { %5123 = vmatpush1.bf16.msra.mxu1 %v7542_v13 }
 0x710   :  { %5124 = vmatprep.subr.bf16.mxu1 %v7550_v34 }
 0x713   :  { %5125 = vmatpush1.bf16.msra.mxu1 %v7548_v57 }
 0x714   :  { %5126 = vmatprep.subr.bf16.mxu1 %v7556_v17 }
 0x717   :  { %5127 = vmatpush1.bf16.msra.mxu1 %v7554_v44 }
 0x718   :  { %5128 = vmatprep.subr.bf16.mxu1 %v7562_v18 }
 0x71b   :  { %5129 = vmatpush1.bf16.msra.mxu1 %v7560_v26 }
 0x71c   :  { %5130 = vmatprep.subr.bf16.mxu1 %v7568_v16  ;;  %v5272_v16 = vld [vmem:[#allocation11 + $0x30] sm:$0xff] }
 0x71f   :  { %5131 = vmatpush1.bf16.msra.mxu1 %v7566_v40  ;;  %v7324_v40 = vpack.c.bf16 %v5273_v39, %v5272_v16 }
 0x720   :  { %5132 = vmatprep.subr.bf16.mxu1 %v7574_v30  ;;  %v5275_v30 = vld [vmem:[#allocation11 + $0xf0] sm:$0xff] }
 0x721   :  { %v7327_v43 = vpack.c.bf16 %v5275_v30, %v5274_v41 }
 0x723   :  { %5133 = vmatpush1.bf16.msra.mxu1 %v7572_v45  ;;  %v5276_v45 = vld [vmem:[#allocation11 + $0x130] sm:$0xff] }
 0x724   :  { %7323 = vmatprep.subr.bf16.mxu1 %v7838_v46 }
 0x7b9   :  { %v4648_v47 = vpop.f32.mrb[28].mxu1 }
 0x7ba   :  { %v4656_v48 = vrot.slane %v4648_v47, %v8095_v9  ;;  %v4650_v49 = vpop.f32.mrb[29].mxu1  ;;  %v4666_v50 = vrot.slane %v4648_v47, %v8097_v10  ;;  %v5277_v47 = vld [vmem:[#allocation11 + $0x170] sm:$0xff] }
 0x7bb   :  { %v4660_v61 = vrot.slane %v4650_v49, %v8095_v9  ;;  %v4670_v52 = vrot.slane %v4650_v49, %v8097_v10  ;;  %v5278_v49 = vld [vmem:[#allocation11 + $0x1b0] sm:$0xff] }
 0x7bc   :  { %v4661_v12 = vmul.f32 %v4656_v48, %v8140_v11  ;;  %v7303_v11 = vpack.c.bf16 %v5154_v2, %v5153_v1  ;;  %v7330_v48 = vpack.c.bf16 %v5277_v47, %v5276_v45  ;;  %v7575_v1 = vld [vmem:[#allocation8] ss:$16 sps:$4 sm:$0xff]   ;;  %v7577_v2 = vld [vmem:[#allocation8 + $0x4] ss:$16 sps:$4 sm:$0xff]   ;;  %v7578_v47 = vld [vmem:[#allocation8 + $0x8] ss:$16 sps:$4 sm:$0xff]  }
 0x7bd   :  { %v4662_v51 = vmul.f32 %v4660_v61, %v8142_v15  ;;  %v5155_v15 = vld [vmem:[#allocation10 + $0x320] sm:$0xff]  ;;  %v5279_v61 = vld [vmem:[#allocation11 + $0x1f0] sm:$0xff] }
 0x7be   :  { %v4671_v54 = vadd.f32 %v4666_v50, %v4661_v12  ;;  %v7306_v4 = vpack.c.bf16 %v5156_v3, %v5155_v15  ;;  %v7333_v12 = vpack.c.bf16 %v5279_v61, %v5278_v49  ;;  %v5280_v50 = vld [vmem:[#allocation11 + $0x230] sm:$0xff]  ;;  %v7584_v61 = vld [vmem:[#allocation8 + $0x28] ss:$16 sps:$4 sm:$0xff]  }
 0x7bf   :  { %v4672_v55 = vadd.f32 %v4670_v52, %v4662_v51  ;;  %v5281_v51 = vld [vmem:[#allocation11 + $0x270] sm:$0xff] }
 0x7c0   :  { %v4673_v56 = vmax.f32 %v4671_v54, 0.0  ;;  %v7336_v52 = vpack.c.bf16 %v5281_v51, %v5280_v50  ;;  %v5282_v54 = vld [vmem:[#allocation11 + $0x2b0] sm:$0xff]  ;;  %v7590_v50 = vld [vmem:[#allocation8 + $0x48] ss:$16 sps:$4 sm:$0xff]   ;;  %v7598_v51 = vld [vmem:[#allocation8 + $0x6c] ss:$16 sps:$4 sm:$0xff]  }
 0x7c1   :  { %v4674_v19 = vmax.f32 %v4672_v55, 0.0  ;;  %v5283_v55 = vld [vmem:[#allocation11 + $0x2f0] sm:$0xff] }
 0x7c2   :  { %v4675_v0 = vpack.c.bf16 %v4673_v56, %v4673_v56  ;;  %v7339_v56 = vpack.c.bf16 %v5283_v55, %v5282_v54  ;;  %v7583_v15 = vld [vmem:[#allocation8 + $0x24] ss:$16 sps:$4 sm:$0xff]   ;;  %v7581_v3 = vld [vmem:[#allocation8 + $0x20] ss:$16 sps:$4 sm:$0xff]   ;;  %v7604_v54 = vld [vmem:[#allocation8 + $0x8c] ss:$16 sps:$4 sm:$0xff]  }
 0x7c3   :  { %v4676_v62 = vpack.c.bf16 %v4674_v19, %v4674_v19  ;;  %v7342_v19 = vpack.c.bf16 %v5285_v59, %v5284_v58  ;;  %v7602_v55 = vld [vmem:[#allocation8 + $0x88] ss:$16 sps:$4 sm:$0xff]   ;;  %v7613_v59 = vld [vmem:[#allocation8 + $0xc4] ss:$16 sps:$4 sm:$0xff]  }
 0x7c4   :  { %v7608_v58 = vld [vmem:[#allocation8 + $0xa8] ss:$16 sps:$4 sm:$0xff]  }
 0x7c5   :  { %5093 = vmatprep.mubr.bf16.mxu0 %v4676_v62  ;;  %5134 = vmatprep.mubr.bf16.mxu1 %v4676_v62  ;;  %v5286_v62 = vld [vmem:[#allocation11 + $0x3b0] sm:$0xff] }
 0x7c6   :  { %5094 = vmatmul.mubr.bf16.vlgmr.msra.gmra.mrb[32].mxu0 %v4675_v0  ;;  %5135 = vmatmul.mubr.bf16.vlgmr.msra.gmra.mrb[32].mxu1 %v4675_v0 }
 0x7c7   :  { %7301 = vmatpush3.bf16.msra.mxu0 %v7300_v63  ;;  %6929 = vmatprep.mubr.msk.f32.mxu0 %vm7839_vm2, %v7837_v42  ;;  %v5287_v63 = vld [vmem:[#allocation11 + $0x3f0] sm:$0xff] }
 0x7c8   :  { %7302 = vmatprep.subr.bf16.mxu0 %v7838_v46  ;;  %6964 = vmatprep.mubr.msk.f32.mxu1 %vm7839_vm2, %v7837_v42  ;;  %v7345_v0 = vpack.c.bf16 %v5287_v63, %v5286_v62  ;;  %v7611_v62 = vld [vmem:[#allocation8 + $0xc0] ss:$16 sps:$4 sm:$0xff]   ;;  %v7614_v63 = vld [vmem:[#allocation8 + $0xc8] ss:$16 sps:$4 sm:$0xff]  }
 0x7c9   :  { %7325 = vmatpush3.bf16.msra.mxu1 %v7324_v40 }
 0x7ca   :  { %7326 = vmatprep.subr.bf16.mxu1 %v7838_v46 }
 0x7cb   :  { %7304 = vmatpush3.bf16.msra.mxu0 %v7303_v11  ;;  %v7580_v11 = vld [vmem:[#allocation8 + $0xc] ss:$16 sps:$4 sm:$0xff]  }
 0x7cc   :  { %7305 = vmatprep.subr.bf16.mxu0 %v7838_v46 }
 0x7cd   :  { %7328 = vmatpush3.bf16.msra.mxu1 %v7327_v43 }
 0x7ce   :  { %7329 = vmatprep.subr.bf16.mxu1 %v7838_v46 }
 0x7cf   :  { %7307 = vmatpush3.bf16.msra.mxu0 %v7306_v4  ;;  %v7589_v4 = vld [vmem:[#allocation8 + $0x44] ss:$16 sps:$4 sm:$0xff]  }
 0x7d0   :  { %7308 = vmatprep.subr.bf16.mxu0 %v7838_v46 }
 0x7d1   :  { %7331 = vmatpush3.bf16.msra.mxu1 %v7330_v48  ;;  %v7586_v48 = vld [vmem:[#allocation8 + $0x2c] ss:$16 sps:$4 sm:$0xff]  }
 0x7d2   :  { %7332 = vmatprep.subr.bf16.mxu1 %v7838_v46 }
 0x7d3   :  { %7310 = vmatpush3.bf16.msra.mxu0 %v7309_v7  ;;  %v7593_v7 = vld [vmem:[#allocation8 + $0x60] ss:$16 sps:$4 sm:$0xff]  }
 0x7d4   :  { %7311 = vmatprep.subr.bf16.mxu0 %v7838_v46 }
 0x7d5   :  { %7334 = vmatpush3.bf16.msra.mxu1 %v7333_v12  ;;  %v7592_v12 = vld [vmem:[#allocation8 + $0x4c] ss:$16 sps:$4 sm:$0xff]  }
 0x7d6   :  { %7335 = vmatprep.subr.bf16.mxu1 %v7838_v46 }
 0x7d7   :  { %7313 = vmatpush3.bf16.msra.mxu0 %v7312_v20  ;;  %v7607_v20 = vld [vmem:[#allocation8 + $0xa4] ss:$16 sps:$4 sm:$0xff]  }
 0x7d8   :  { %7314 = vmatprep.subr.bf16.mxu0 %v7838_v46 }
 0x7d9   :  { %7337 = vmatpush3.bf16.msra.mxu1 %v7336_v52  ;;  %v7596_v52 = vld [vmem:[#allocation8 + $0x68] ss:$16 sps:$4 sm:$0xff]  }
 0x7da   :  { %7338 = vmatprep.subr.bf16.mxu1 %v7838_v46 }
 0x7db   :  { %7316 = vmatpush3.bf16.msra.mxu0 %v7315_v37 }
 0x7dc   :  { %7317 = vmatprep.subr.bf16.mxu0 %v7838_v46 }
 0x7dd   :  { %7340 = vmatpush3.bf16.msra.mxu1 %v7339_v56  ;;  %v7610_v56 = vld [vmem:[#allocation8 + $0xac] ss:$16 sps:$4 sm:$0xff]  }
 0x7de   :  { %7341 = vmatprep.subr.bf16.mxu1 %v7838_v46 }
 0x7df   :  { %7319 = vmatpush3.bf16.msra.mxu0 %v7318_v24 }
 0x7e0   :  { %7320 = vmatprep.subr.bf16.mxu0 %v7838_v46 }
 0x7e1   :  { %7343 = vmatpush3.bf16.msra.mxu1 %v7342_v19  ;;  %v7616_v19 = vld [vmem:[#allocation8 + $0xcc] ss:$16 sps:$4 sm:$0xff]  }
 0x7e2   :  { %7344 = vmatprep.subr.bf16.mxu1 %v7838_v46 }
 0x7e3   :  { %7322 = vmatpush3.bf16.msra.mxu0 %v7321_v28 }
 0x7e4   :  { %5562 = vmatprep.subr.bf16.mxu0 %v7577_v2  ;;  %v7617_v2 = vld [vmem:[#allocation8 + $0xe0] ss:$16 sps:$4 sm:$0xff]  }
 0x7e5   :  { %7346 = vmatpush3.bf16.msra.mxu1 %v7345_v0  ;;  %v7619_v0 = vld [vmem:[#allocation8 + $0xe4] ss:$16 sps:$4 sm:$0xff]  }
 0x7e6   :  { %5603 = vmatprep.subr.bf16.mxu1 %v7580_v11  ;;  %v7620_v11 = vld [vmem:[#allocation8 + $0xe8] ss:$16 sps:$4 sm:$0xff]  }
 0x899   :  { %v5095_v38 = vpop.f32.mrb[32].mxu0  ;;  %v5136_v29 = vpop.f32.mrb[32].mxu1 }
 0x89a   :  { %v5097_v32 = vpop.f32.mrb[33].mxu0  ;;  %v5138_v33 = vpop.f32.mrb[33].mxu1 }
 0x89b   :  { %v5143_v13 = vmax.f32 %v5095_v38, %v5097_v32  ;;  %v5144_v34 = vmax.f32 %v5136_v29, %v5138_v33  ;;  %v5099_v57 = vpop.f32.mrb[34].mxu0  ;;  %v5140_v17 = vpop.f32.mrb[34].mxu1 }
 0x89c   :  { %v5100_v44 = vpop.f32.mrb[35].mxu0  ;;  %v5141_v35 = vpop.f32.mrb[35].mxu1 }
 0x89d   :  { %v8181_v18 = vmax.f32 %v5143_v13, %v5144_v34 }
 0x89f   :  { %v5146_v36 = vmul.f32 %v8181_v18, %v8181_v18 }
 0x8a1   :  { %v5148_v26 = vrot.slane %v5146_v36, 6 }
 0x8a3   :  { %v5150_v31 = vsel %vm2040_vm0, %v8181_v18, %v5148_v26 }
 0x8a4   :  { %6930 = vmatmul.mubr.f32.vlgmr.msra.gmra.mrb[30].mxu0 %v5150_v31 }
 0x8a5   :  { %5563 = vmatpush1.bf16.msra.mxu0 %v7575_v1  ;;  %v7622_v1 = vld [vmem:[#allocation8 + $0xec] ss:$16 sps:$4 sm:$0xff]  }
 0x8a6   :  { %5564 = vmatprep.subr.bf16.mxu0 %v7583_v15  ;;  %v7840_v15 = vmov 0  }
 0x8a7   :  { %5594 = vmatprep.mubr.bf16.mxu0 %v7840_v15 }
 0x8a9   :  { %5565 = vmatpush1.bf16.msra.mxu0 %v7581_v3 }
 0x8aa   :  { %5566 = vmatprep.subr.bf16.mxu0 %v7589_v4 }
 0x8ad   :  { %5567 = vmatpush1.bf16.msra.mxu0 %v7587_v5 }
 0x8ae   :  { %5568 = vmatprep.subr.bf16.mxu0 %v7595_v6 }
 0x8b1   :  { %5569 = vmatpush1.bf16.msra.mxu0 %v7593_v7 }
 0x8b2   :  { %5570 = vmatprep.subr.bf16.mxu0 %v7601_v8 }
 0x8b5   :  { %5571 = vmatpush1.bf16.msra.mxu0 %v7599_v14  ;;  %v5652_v14 = vld [vmem:[#allocation10 + $0x380] sm:$0xff] }
 0x8b6   :  { %5572 = vmatprep.subr.bf16.mxu0 %v7607_v20  ;;  %v5653_v20 = vld [vmem:[#allocation10 + $0x388] sm:$0xff] }
 0x8b9   :  { %5573 = vmatpush1.bf16.msra.mxu0 %v7605_v21 }
 0x8ba   :  { %5574 = vmatprep.subr.bf16.mxu0 %v7613_v59  ;;  %v5776_v59 = vld [vmem:[#allocation11 + $0xf8] sm:$0xff] }
 0x8bd   :  { %5575 = vmatpush1.bf16.msra.mxu0 %v7611_v62  ;;  %v5777_v62 = vld [vmem:[#allocation11 + $0x138] sm:$0xff] }
 0x8be   :  { %5576 = vmatprep.subr.bf16.mxu0 %v7619_v0 }
 0x8c1   :  { %5577 = vmatpush1.bf16.msra.mxu0 %v7617_v2  ;;  %v5780_v2 = vld [vmem:[#allocation11 + $0x1f8] sm:$0xff] }
 0x8c2   :  { %7347 = vmatprep.subr.bf16.mxu0 %v7838_v46 }
 0x977   :  { %v5233_v22 = vpop.f32.mrb[30].mxu0 }
 0x978   :  { %v5237_v37 = vmul.f32 0.5, %v5233_v22  ;;  %v6931_v53 = vpop.f32.mrb[31].mxu0  ;;  %v7348_v22 = vpack.c.bf16 %v5653_v20, %v5652_v14  ;;  %v5786_v14 = vld [vmem:[#allocation11 + $0x378] sm:$0xff] }
 0x979   :  { %v5654_v53 = vld [vmem:[#allocation10 + $0x390] sm:$0xff] }
 0x97a   :  { %v5238_v23 = vsel %vm2040_vm0, %v5237_v37, 0.0  ;;  %v5246_v24 = vrot.slane %v5237_v37, 2 }
 0x97b   :  { %v5239_v25 = vrot.slane %v5238_v23, 4 }
 0x97c   :  { %v5248_v27 = vsel %vm2040_vm0, %v5246_v24, 0.0 }
 0x97d   :  { %v5240_v28 = vadd.f32 %v5239_v25, %v5238_v23  ;;  %v5249_v38 = vrot.slane %v5248_v27, 4  ;;  %v5655_v23 = vld [vmem:[#allocation10 + $0x398] sm:$0xff]  ;;  %v5657_v25 = vld [vmem:[#allocation10 + $0x3a8] sm:$0xff] }
 0x97e   :  { %v7351_v24 = vpack.c.bf16 %v5655_v23, %v5654_v53  ;;  %v5870_v53 = vld [vmem:[#allocation13] sm:$0xff]  ;;  %v5871_v23 = vld [vmem:[#allocation13 + $0x8] sm:$0xff] }
 0x97f   :  { %v5241_v29 = vrot.slane %v5240_v28, 2  ;;  %v5250_v32 = vadd.f32 %v5249_v38, %v5248_v27  ;;  %v5659_v38 = vld [vmem:[#allocation10 + $0x3b8] sm:$0xff] }
 0x981   :  { %v5242_v33 = vadd.f32 %v5241_v29, %v5240_v28  ;;  %v5251_v13 = vrot.slane %v5250_v32, 2  ;;  %v5658_v28 = vld [vmem:[#allocation10 + $0x3b0] sm:$0xff] }
 0x982   :  { %v7357_v29 = vpack.c.bf16 %v5659_v38, %v5658_v28  ;;  %v5874_v28 = vld [vmem:[#allocation13 + $0x20] sm:$0xff]  ;;  %v5875_v38 = vld [vmem:[#allocation13 + $0x28] sm:$0xff] }
 0x983   :  { %v5243_v34 = vrot.slane %v5242_v33, 1  ;;  %v5252_v57 = vadd.f32 %v5251_v13, %v5250_v32  ;;  %v5660_v32 = vld [vmem:[#allocation10 + $0x3c0] sm:$0xff] }
 0x985   :  { %v5244_v17 = vadd.f32 %v5243_v34, %v5242_v33  ;;  %v5253_v44 = vrot.slane %v5252_v57, 1  ;;  %v5661_v33 = vld [vmem:[#allocation10 + $0x3c8] sm:$0xff]  ;;  %v5662_v34 = vld [vmem:[#allocation10 + $0x3d0] sm:$0xff] }
 0x986   :  { %v7360_v13 = vpack.c.bf16 %v5661_v33, %v5660_v32  ;;  %v5876_v32 = vld [vmem:[#allocation13 + $0x30] sm:$0xff]  ;;  %v5877_v33 = vld [vmem:[#allocation13 + $0x38] sm:$0xff] }
 0x987   :  { %v5254_v35 = vadd.f32 %v5253_v44, %v5252_v57  ;;  %v5255_v36 = vmul.f32 %v5244_v17, %v5244_v17  ;;  %v5663_v57 = vld [vmem:[#allocation10 + $0x3d8] sm:$0xff]  ;;  %v5664_v44 = vld [vmem:[#allocation10 + $0x3e0] sm:$0xff] }
 0x989   :  { %v5256_v26 = vsub.f32 %v5254_v35, %v5255_v36  ;;  %v5665_v35 = vld [vmem:[#allocation10 + $0x3e8] sm:$0xff] }
 0x98a   :  { %v7366_v36 = vpack.c.bf16 %v5665_v35, %v5664_v44  ;;  %v5880_v44 = vld [vmem:[#allocation13 + $0x50] sm:$0xff]  ;;  %v5881_v35 = vld [vmem:[#allocation13 + $0x58] sm:$0xff] }
 0x98b   :  { %v5257_v31 = vadd.f32 1e-05, %v5256_v26  ;;  %v5666_v26 = vld [vmem:[#allocation10 + $0x3f0] sm:$0xff] }
 0x98d   :  { %7627 = vrsqrt.f32 %v5257_v31  ;;  %v5667_v31 = vld [vmem:[#allocation10 + $0x3f8] sm:$0xff] }
 0x997   :  { %v7628_v16 = vpop.eup %7627 }
 0x998   :  { %v5259_v39 = vmul.f32 %v8157_v60, %v7628_v16  ;;  %v7369_v16 = vpack.c.bf16 %v5667_v31, %v5666_v26 }
 0x99a   :  { %v5260_v40 = vmul.f32 %v5259_v39, %v5244_v17  ;;  %v5266_v43 = vrot.slane %v5259_v39, 4  ;;  %v7363_v17 = vpack.c.bf16 %v5663_v57, %v5662_v34  ;;  %v5878_v34 = vld [vmem:[#allocation13 + $0x40] sm:$0xff]  ;;  %v5879_v57 = vld [vmem:[#allocation13 + $0x48] sm:$0xff] }
 0x99c   :  { %v5262_v41 = vrot.slane %v5260_v40, 7 }
 0x99e   :  { %v5264_v30 = vsub.f32 %v8157_v60, %v5262_v41 }
 0x9a0   :  { %v5269_v45 = vrot.slane %v5264_v30, 4 }
 0x9a2   :  { %v5271_v49 = vsel %vm2277_vm1, %v5266_v43, %v5269_v45 }
 0x9a3   :  { %6965 = vmatmul.mubr.f32.vlgmr.msra.gmra.mrb[30].mxu1 %v5271_v49 }
 0x9a4   :  { %5604 = vmatpush1.bf16.msra.mxu1 %v7578_v47  ;;  %5635 = vmatprep.mubr.bf16.mxu1 %v7840_v15  ;;  %v5781_v15 = vld [vmem:[#allocation11 + $0x238] sm:$0xff] }
 0x9a5   :  { %5605 = vmatprep.subr.bf16.mxu1 %v7586_v48 }
 0x9a8   :  { %5606 = vmatpush1.bf16.msra.mxu1 %v7584_v61 }
 0x9a9   :  { %5607 = vmatprep.subr.bf16.mxu1 %v7592_v12 }
 0x9ac   :  { %5608 = vmatpush1.bf16.msra.mxu1 %v7590_v50 }
 0x9ad   :  { %5609 = vmatprep.subr.bf16.mxu1 %v7598_v51 }
 0x9b0   :  { %5610 = vmatpush1.bf16.msra.mxu1 %v7596_v52 }
 0x9b1   :  { %5611 = vmatprep.subr.bf16.mxu1 %v7604_v54  ;;  %v5773_v54 = vld [vmem:[#allocation11 + $0x38] sm:$0xff] }
 0x9b4   :  { %5612 = vmatpush1.bf16.msra.mxu1 %v7602_v55  ;;  %v5774_v55 = vld [vmem:[#allocation11 + $0x78] sm:$0xff] }
 0x9b5   :  { %5613 = vmatprep.subr.bf16.mxu1 %v7610_v56  ;;  %v7372_v56 = vpack.c.bf16 %v5774_v55, %v5773_v54 }
 0x9b8   :  { %5614 = vmatpush1.bf16.msra.mxu1 %v7608_v58  ;;  %v5775_v58 = vld [vmem:[#allocation11 + $0xb8] sm:$0xff] }
 0x9b9   :  { %5615 = vmatprep.subr.bf16.mxu1 %v7616_v19  ;;  %v7375_v19 = vpack.c.bf16 %v5776_v59, %v5775_v58 }
 0x9bc   :  { %5616 = vmatpush1.bf16.msra.mxu1 %v7614_v63  ;;  %v5778_v63 = vld [vmem:[#allocation11 + $0x178] sm:$0xff] }
 0x9bd   :  { %5617 = vmatprep.subr.bf16.mxu1 %v7622_v1  ;;  %v7378_v0 = vpack.c.bf16 %v5778_v63, %v5777_v62  ;;  %v5779_v1 = vld [vmem:[#allocation11 + $0x1b8] sm:$0xff] }
 0x9c0   :  { %5618 = vmatpush1.bf16.msra.mxu1 %v7620_v11  ;;  %v7381_v11 = vpack.c.bf16 %v5780_v2, %v5779_v1 }
 0x9c1   :  { %7371 = vmatprep.subr.bf16.mxu1 %v7838_v46 }
 0xa76   :  { %v5354_v3 = vpop.f32.mrb[30].mxu1 }
 0xa77   :  { %v5361_v4 = vrot.slane %v5354_v3, %v8095_v9  ;;  %v6966_v5 = vpop.f32.mrb[31].mxu1  ;;  %v5366_v7 = vrot.slane %v5354_v3, %v8097_v10  ;;  %v5782_v3 = vld [vmem:[#allocation11 + $0x278] sm:$0xff] }
 0xa78   :  { %v5783_v5 = vld [vmem:[#allocation11 + $0x2b8] sm:$0xff] }
 0xa79   :  { %v5362_v6 = vmul.f32 %v5361_v4, %v8181_v18  ;;  %v5656_v18 = vld [vmem:[#allocation10 + $0x3a0] sm:$0xff]  ;;  %v7384_v4 = vpack.c.bf16 %v5782_v3, %v5781_v15 }
 0xa7a   :  { %v7354_v27 = vpack.c.bf16 %v5657_v25, %v5656_v18  ;;  %v7396_v18 = vpack.c.bf16 %v5871_v23, %v5870_v53  ;;  %v5873_v25 = vld [vmem:[#allocation13 + $0x18] sm:$0xff]  ;;  %v5882_v3 = vld [vmem:[#allocation13 + $0x60] sm:$0xff]  ;;  %v5966_v53 = vld [vmem:[#allocation13 + $0xa8] sm:$0xff] }
 0xa7b   :  { %v5367_v8 = vadd.f32 %v5366_v7, %v5362_v6  ;;  %v5784_v6 = vld [vmem:[#allocation11 + $0x2f8] sm:$0xff] }
 0xa7c   :  { %v7387_v7 = vpack.c.bf16 %v5784_v6, %v5783_v5  ;;  %v5884_v6 = vld [vmem:[#allocation13 + $0x70] sm:$0xff] }
 0xa7d   :  { %v5368_v21 = vmax.f32 %v5367_v8, 0.0  ;;  %v5785_v8 = vld [vmem:[#allocation11 + $0x338] sm:$0xff] }
 0xa7e   :  { %v7390_v20 = vpack.c.bf16 %v5786_v14, %v5785_v8  ;;  %v5961_v14 = vld [vmem:[#allocation13 + $0x80] sm:$0xff] }
 0xa7f   :  { %v5369_v37 = vpack.c.bf16 %v5368_v21, %v5368_v21  ;;  %v5787_v21 = vld [vmem:[#allocation11 + $0x3b8] sm:$0xff] }
 0xa81   :  { %5595 = vmatmul.mubr.bf16.vlgmr.msra.gmra.mrb[36].mxu0 %v5369_v37  ;;  %5636 = vmatmul.mubr.bf16.vlgmr.msra.gmra.mrb[36].mxu1 %v5369_v37 }
 0xa82   :  { %7349 = vmatpush3.bf16.msra.mxu0 %v7348_v22  ;;  %6999 = vmatprep.mubr.msk.f32.mxu0 %vm7839_vm2, %v7837_v42  ;;  %v5788_v22 = vld [vmem:[#allocation11 + $0x3f8] sm:$0xff] }
 0xa83   :  { %7350 = vmatprep.subr.bf16.mxu0 %v7838_v46  ;;  %7034 = vmatprep.mubr.msk.f32.mxu1 %vm7839_vm2, %v7837_v42  ;;  %v7393_v37 = vpack.c.bf16 %v5788_v22, %v5787_v21  ;;  %v5964_v22 = vld [vmem:[#allocation13 + $0x98] sm:$0xff] }
 0xa84   :  { %7373 = vmatpush3.bf16.msra.mxu1 %v7372_v56 }
 0xa85   :  { %7374 = vmatprep.subr.bf16.mxu1 %v7838_v46 }
 0xa86   :  { %7352 = vmatpush3.bf16.msra.mxu0 %v7351_v24  ;;  %v5872_v24 = vld [vmem:[#allocation13 + $0x10] sm:$0xff] }
 0xa87   :  { %7353 = vmatprep.subr.bf16.mxu0 %v7838_v46 }
 0xa88   :  { %7376 = vmatpush3.bf16.msra.mxu1 %v7375_v19 }
 0xa89   :  { %7377 = vmatprep.subr.bf16.mxu1 %v7838_v46 }
 0xa8a   :  { %7355 = vmatpush3.bf16.msra.mxu0 %v7354_v27  ;;  %v7399_v27 = vpack.c.bf16 %v5873_v25, %v5872_v24  ;;  %v5967_v24 = vld [vmem:[#allocation13 + $0xb0] sm:$0xff] }
 0xa8b   :  { %7356 = vmatprep.subr.bf16.mxu0 %v7838_v46 }
 0xa8c   :  { %7379 = vmatpush3.bf16.msra.mxu1 %v7378_v0 }
 0xa8d   :  { %7380 = vmatprep.subr.bf16.mxu1 %v7838_v46 }
 0xa8e   :  { %7358 = vmatpush3.bf16.msra.mxu0 %v7357_v29  ;;  %v7402_v29 = vpack.c.bf16 %v5875_v38, %v5874_v28  ;;  %v5970_v28 = vld [vmem:[#allocation13 + $0xc8] sm:$0xff] }
 0xa8f   :  { %7359 = vmatprep.subr.bf16.mxu0 %v7838_v46 }
 0xa90   :  { %7382 = vmatpush3.bf16.msra.mxu1 %v7381_v11 }
 0xa91   :  { %7383 = vmatprep.subr.bf16.mxu1 %v7838_v46 }
 0xa92   :  { %7361 = vmatpush3.bf16.msra.mxu0 %v7360_v13  ;;  %v7405_v13 = vpack.c.bf16 %v5877_v33, %v5876_v32  ;;  %v5972_v32 = vld [vmem:[#allocation13 + $0xd8] sm:$0xff] }
 0xa93   :  { %7362 = vmatprep.subr.bf16.mxu0 %v7838_v46 }
 0xa94   :  { %7385 = vmatpush3.bf16.msra.mxu1 %v7384_v4  ;;  %v5883_v4 = vld [vmem:[#allocation13 + $0x68] sm:$0xff] }
 0xa95   :  { %7386 = vmatprep.subr.bf16.mxu1 %v7838_v46  ;;  %v7414_v5 = vpack.c.bf16 %v5883_v4, %v5882_v3 }
 0xa96   :  { %7364 = vmatpush3.bf16.msra.mxu0 %v7363_v17  ;;  %v7408_v17 = vpack.c.bf16 %v5879_v57, %v5878_v34  ;;  %v5974_v34 = vld [vmem:[#allocation13 + $0xe8] sm:$0xff] }
 0xa97   :  { %7365 = vmatprep.subr.bf16.mxu0 %v7838_v46 }
 0xa98   :  { %7388 = vmatpush3.bf16.msra.mxu1 %v7387_v7  ;;  %v5885_v7 = vld [vmem:[#allocation13 + $0x78] sm:$0xff] }
 0xa99   :  { %7389 = vmatprep.subr.bf16.mxu1 %v7838_v46  ;;  %v7417_v8 = vpack.c.bf16 %v5885_v7, %v5884_v6 }
 0xa9a   :  { %7367 = vmatpush3.bf16.msra.mxu0 %v7366_v36  ;;  %v7411_v36 = vpack.c.bf16 %v5881_v35, %v5880_v44 }
 0xa9b   :  { %7368 = vmatprep.subr.bf16.mxu0 %v7838_v46 }
 0xa9c   :  { %7391 = vmatpush3.bf16.msra.mxu1 %v7390_v20  ;;  %v5963_v20 = vld [vmem:[#allocation13 + $0x90] sm:$0xff] }
 0xa9d   :  { %7392 = vmatprep.subr.bf16.mxu1 %v7838_v46 }
 0xa9e   :  { %7370 = vmatpush3.bf16.msra.mxu0 %v7369_v16 }
 0xa9f   :  { %7395 = vmatprep.subr.bf16.mxu0 %v7838_v46 }
 0xaa0   :  { %7394 = vmatpush3.bf16.msra.mxu1 %v7393_v37  ;;  %v7423_v37 = vpack.c.bf16 %v5964_v22, %v5963_v20 }
 0xaa1   :  { %7419 = vmatprep.subr.bf16.mxu1 %v7838_v46 }
 0xb54   :  { %v5596_v39 = vpop.f32.mrb[36].mxu0  ;;  %v5637_v40 = vpop.f32.mrb[36].mxu1 }
 0xb55   :  { %v5598_v41 = vpop.f32.mrb[37].mxu0  ;;  %v5639_v30 = vpop.f32.mrb[37].mxu1 }
 0xb56   :  { %v5644_v43 = vmax.f32 %v5596_v39, %v5598_v41  ;;  %v5645_v45 = vmax.f32 %v5637_v40, %v5639_v30  ;;  %v5600_v47 = vpop.f32.mrb[38].mxu0  ;;  %v5641_v48 = vpop.f32.mrb[38].mxu1 }
 0xb57   :  { %v5601_v49 = vpop.f32.mrb[39].mxu0  ;;  %v5642_v61 = vpop.f32.mrb[39].mxu1 }
 0xb58   :  { %v8216_v12 = vmax.f32 %v5644_v43, %v5645_v45 }
 0xb5a   :  { %v5647_v50 = vmul.f32 %v8216_v12, %v8216_v12 }
 0xb5c   :  { %v5649_v51 = vrot.slane %v5647_v50, 6 }
 0xb5e   :  { %v5651_v52 = vsel %vm2040_vm0, %v8216_v12, %v5649_v51 }
 0xb5f   :  { %7000 = vmatmul.mubr.f32.vlgmr.msra.gmra.mrb[40].mxu0 %v5651_v52 }
 0xb60   :  { %7069 = vmatprep.mubr.msk.f32.mxu0 %vm7839_vm2, %v7837_v42  ;;  %7397 = vmatpush3.bf16.msra.mxu0 %v7396_v18  ;;  %v5968_v18 = vld [vmem:[#allocation13 + $0xb8] sm:$0xff] }
 0xb61   :  { %7398 = vmatprep.subr.bf16.mxu0 %v7838_v46  ;;  %v7429_v25 = vpack.c.bf16 %v5968_v18, %v5967_v24 }
 0xb64   :  { %7400 = vmatpush3.bf16.msra.mxu0 %v7399_v27  ;;  %v5969_v27 = vld [vmem:[#allocation13 + $0xc0] sm:$0xff] }
 0xb65   :  { %7401 = vmatprep.subr.bf16.mxu0 %v7838_v46  ;;  %v7432_v38 = vpack.c.bf16 %v5970_v28, %v5969_v27 }
 0xb68   :  { %7403 = vmatpush3.bf16.msra.mxu0 %v7402_v29  ;;  %v5971_v29 = vld [vmem:[#allocation13 + $0xd0] sm:$0xff] }
 0xb69   :  { %7404 = vmatprep.subr.bf16.mxu0 %v7838_v46  ;;  %v7435_v33 = vpack.c.bf16 %v5972_v32, %v5971_v29 }
 0xb6c   :  { %7406 = vmatpush3.bf16.msra.mxu0 %v7405_v13  ;;  %v5973_v13 = vld [vmem:[#allocation13 + $0xe0] sm:$0xff] }
 0xb6d   :  { %7407 = vmatprep.subr.bf16.mxu0 %v7838_v46  ;;  %v7438_v57 = vpack.c.bf16 %v5974_v34, %v5973_v13 }
 0xb70   :  { %7409 = vmatpush3.bf16.msra.mxu0 %v7408_v17 }
 0xb71   :  { %7410 = vmatprep.subr.bf16.mxu0 %v7838_v46 }
 0xb74   :  { %7412 = vmatpush3.bf16.msra.mxu0 %v7411_v36 }
 0xb75   :  { %7413 = vmatprep.subr.bf16.mxu0 %v7838_v46 }
 0xb78   :  { %7415 = vmatpush3.bf16.msra.mxu0 %v7414_v5 }
 0xb79   :  { %7416 = vmatprep.subr.bf16.mxu0 %v7838_v46 }
 0xb7c   :  { %7418 = vmatpush3.bf16.msra.mxu0 %v7417_v8 }
 0xc32   :  { %v5734_v26 = vpop.f32.mrb[40].mxu0 }
 0xc33   :  { %v5738_v31 = vmul.f32 0.5, %v5734_v26  ;;  %v7001_v16 = vpop.f32.mrb[41].mxu0 }
 0xc35   :  { %v5739_v39 = vsel %vm2040_vm0, %v5738_v31, 0.0  ;;  %v5747_v40 = vrot.slane %v5738_v31, 2 }
 0xc36   :  { %v5740_v41 = vrot.slane %v5739_v39, 4 }
 0xc37   :  { %v5749_v30 = vsel %vm2040_vm0, %v5747_v40, 0.0  ;;  %v5976_v40 = vld [vmem:[#allocation13 + $0xf8] sm:$0xff] }
 0xc38   :  { %v5741_v43 = vadd.f32 %v5740_v41, %v5739_v39  ;;  %v5750_v45 = vrot.slane %v5749_v30, 4  ;;  %v5975_v39 = vld [vmem:[#allocation13 + $0xf0] sm:$0xff] }
 0xc39   :  { %v7441_v41 = vpack.c.bf16 %v5976_v40, %v5975_v39 }
 0xc3a   :  { %v5742_v47 = vrot.slane %v5741_v43, 2  ;;  %v5751_v48 = vadd.f32 %v5750_v45, %v5749_v30  ;;  %v133_v30 = vld [vmem:[%s8284_s9] sm:$0x3]  ;;  %s7841_s9 = smov [#allocation14]  }
 0xc3b   :  { %s6069_s22 = sshll.u32 %s7841_s9, 4  ;;  %s6070_s22 = int_to_ptr.vmem [resolvable:$true] %s6069_s22 }
 0xc3c   :  { %v5743_v49 = vadd.f32 %v5742_v47, %v5741_v43  ;;  %v5752_v61 = vrot.slane %v5751_v48, 2  ;;  %s7790_s24 = scalar_lea.vmem %s6070_s22, 32  ;;  %p7795_p1 = scmp.lt.s32.totalorder %s6070_s22, %s6070_s22 }
 0xc3d   :  { %p7791_p0 = scmp.ne.s32.totalorder %s6070_s22, %s7790_s24  ;;  %p7796_p2 = scmp.lt.s32.totalorder %s7790_s24, %s7790_s24 }
 0xc3e   :  { %v5744_v50 = vrot.slane %v5743_v49, 1  ;;  %v5753_v51 = vadd.f32 %v5752_v61, %v5751_v48 }
 0xc3f   :  { %p7797_p3 = por %p7796_p2, %p7795_p1 }
 0xc40   :  { %v5745_v52 = vadd.f32 %v5744_v50, %v5743_v49  ;;  %v5754_v54 = vrot.slane %v5753_v51, 1 }
 0xc41   :  { %p7798_p4 = pnand %p7797_p3, %p7791_p0 }
 0xc42   :  { %v5755_v55 = vadd.f32 %v5754_v54, %v5753_v51  ;;  %v5756_v56 = vmul.f32 %v5745_v52, %v5745_v52 }
 0xc44   :  { %v5757_v58 = vsub.f32 %v5755_v55, %v5756_v56 }
 0xc46   :  { %v5758_v59 = vadd.f32 1e-05, %v5757_v58 }
 0xc48   :  { %7629 = vrsqrt.f32 %v5758_v59 }
 0xc52   :  { %v7630_v19 = vpop.eup %7629 }
 0xc53   :  { %v5760_v62 = vmul.f32 %v8157_v60, %v7630_v19 }
 0xc55   :  { %v5761_v63 = vmul.f32 %v5760_v62, %v5745_v52  ;;  %v5767_v2 = vrot.slane %v5760_v62, 6 }
 0xc57   :  { %v5763_v0 = vrot.slane %v5761_v63, 7 }
 0xc59   :  { %v5765_v1 = vsub.f32 %v8157_v60, %v5763_v0  ;;  %v5962_v60 = vld [vmem:[#allocation13 + $0x88] sm:$0xff] }
 0xc5a   :  { %v7420_v21 = vpack.c.bf16 %v5962_v60, %v5961_v14 }
 0xc5b   :  { %v5770_v11 = vrot.slane %v5765_v1, 6 }
 0xc5d   :  { %v5772_v15 = vsel %vm2277_vm1, %v5767_v2, %v5770_v11 }
 0xc5e   :  { %7035 = vmatmul.mubr.f32.vlgmr.msra.gmra.mrb[40].mxu1 %v5772_v15 }
 0xc5f   :  { %7104 = vmatprep.mubr.msk.f32.mxu1 %vm7839_vm2, %v7837_v42  ;;  %7421 = vmatpush3.bf16.msra.mxu1 %v7420_v21  ;;  %v5965_v42 = vld [vmem:[#allocation13 + $0xa0] sm:$0xff] }
 0xc60   :  { %7422 = vmatprep.subr.bf16.mxu1 %v7838_v46  ;;  %v7426_v23 = vpack.c.bf16 %v5966_v53, %v5965_v42 }
 0xc63   :  { %7424 = vmatpush3.bf16.msra.mxu1 %v7423_v37 }
 0xc64   :  { %7425 = vmatprep.subr.bf16.mxu1 %v7838_v46 }
 0xc67   :  { %7427 = vmatpush3.bf16.msra.mxu1 %v7426_v23 }
 0xc68   :  { %7428 = vmatprep.subr.bf16.mxu1 %v7838_v46 }
 0xc6b   :  { %7430 = vmatpush3.bf16.msra.mxu1 %v7429_v25 }
 0xc6c   :  { %7431 = vmatprep.subr.bf16.mxu1 %v7838_v46 }
 0xc6f   :  { %7433 = vmatpush3.bf16.msra.mxu1 %v7432_v38 }
 0xc70   :  { %7434 = vmatprep.subr.bf16.mxu1 %v7838_v46 }
 0xc73   :  { %7436 = vmatpush3.bf16.msra.mxu1 %v7435_v33 }
 0xc74   :  { %7437 = vmatprep.subr.bf16.mxu1 %v7838_v46 }
 0xc77   :  { %7439 = vmatpush3.bf16.msra.mxu1 %v7438_v57 }
 0xc78   :  { %7440 = vmatprep.subr.bf16.mxu1 %v7838_v46  ;;  %v5889_v46 = vrot.slane %v133_v30, %v8095_v9 }
 0xc7b   :  { %7442 = vmatpush3.bf16.msra.mxu1 %v7441_v41 }
 0xd31   :  { %v5855_v17 = vpop.f32.mrb[40].mxu1 }
 0xd32   :  { %v5862_v44 = vrot.slane %v5855_v17, %v8095_v9  ;;  %v7036_v35 = vpop.f32.mrb[41].mxu1  ;;  %v5867_v26 = vrot.slane %v5855_v17, %v8097_v10 }
 0xd34   :  { %v5863_v36 = vmul.f32 %v5862_v44, %v8216_v12  ;;  %v5980_v12 = vrot.slane %v133_v30, %v8097_v10 }
 0xd36   :  { %v5868_v31 = vadd.f32 %v5867_v26, %v5863_v36 }
 0xd38   :  { %v5869_v16 = vmax.f32 %v5868_v31, 0.0 }
 0xd3a   :  { %7070 = vmatmul.mubr.f32.vlgmr.msra.gmra.mrb[42].mxu0 %v5869_v16 }
 0xe0d   :  { %v5956_v43 = vpop.f32.mrb[42].mxu0 }
 0xe0e   :  { %v5957_v45 = vadd.f32 %v5956_v43, %v5889_v46  ;;  %v7071_v47 = vpop.f32.mrb[43].mxu0 }
 0xe10   :  { %v5960_v48 = vmax.f32 %v5957_v45, 0.0 }
 0xe12   :  { %7105 = vmatmul.mubr.f32.vlgmr.msra.gmra.mrb[42].mxu1 %v5960_v48 }
 0xee5   :  { %v6047_v49 = vpop.f32.mrb[42].mxu1 }
 0xee6   :  { %v6048_v61 = vadd.f32 %v6047_v49, %v5980_v12  ;;  %v7106_v50 = vpop.f32.mrb[43].mxu1 }
 0xee8   :  { %v6051_v51 = vsel %vm2040_vm0, %v6048_v61, -inf }
 0xee9   :  { %6052 = vmax.xlane.f32.xlu0 %v6051_v51 }
 0xf76   :  { %v6053_v52 = vpop.xlane.xlu0 %6052 }
 0xf77   :  { %v6054_v54 = vsub.f32 %v6048_v61, %v6053_v52 }
 0xf79   :  { %v6055_v55 = vmul.f32 1.442695, %v6054_v54 }
 0xf7b   :  { %7631 = vpow2.f32 %v6055_v55 }
 0xf85   :  { %v7632_v56 = vpop.eup %7631 }
 0xf86   :  { %v6057_v9 = vsel %vm2040_vm0, %v7632_v56, 0.0 }
 0xf87   :  { %6058 = vadd.xlane.f32.xlu0 %v6057_v9 }
0x1014   :  { %v6059_v58 = vpop.xlane.xlu0 %6058 }
0x1015   :  { %7633 = vrcp.f32 %v6059_v58 }
0x101f   :  { %v7634_v59 = vpop.eup %7633 }
0x1020   :  { %v6061_v10 = vmul.f32 %v7634_v59, %v7632_v56 }
0x1022   :  { %6062 = vst [vmem:[#allocation14] sm:$0x3] %v6061_v10 }
0x1023   :  { %7801 = shalt.err (!%p7798_p4)
}
0x1024   :  { %s7802_s21 = scalar_lea.hbm %s8285_s10, 32 }
0x1025   :  { %p7803_p5 = scmp.ne.s32.totalorder %s8285_s10, %s7802_s21  ;;  %p7806_p6 = scmp.lt.u32.totalorder %s7802_s21, %s8285_s10 }
0x1027   :  { %p7808_p7 = pnand %p7806_p6, %p7803_p5 }
0x1029   :  { %7811 = shalt.err (!%p7808_p7)
}
0x102a   :  { %6072 = dma.vmem_to_hbm [thread:$0]  %s6070_s22, 32, %s8285_s10, [#allocation4]  }
0x102b   :  { %7820 = dma.done.wait [#allocation4], 32  }
0x102c   :  { %7821 = vsyncadd [#allocation4], 4294967264 }
0x102d   :  { %6076 = vsyncpa [#allocation3], 1 }
0x102e   :  { %6077 = vsyncpa [#allocation6], 1 }
0x102f   :  { %6078 = vsyncpa [#allocation9], 1 }
0x1030   :  { %6079 = vsyncpa [#allocation12], 1 }
0x1031   :  { %6080 = vsyncpa [#allocation4], 1 }

</bundles_post_ra>
